<compile_context>
chip_gen: v5e
topology: v5e:2x2
jax: 0.10.0
libtpu: 0.0.40
codegen_flags: <defaults>
</compile_context>

<pallas_src>
import numpy as np
import jax
import jax.numpy as jnp
from jax.experimental import pallas as pl
from jax.experimental.pallas import tpu as pltpu

# ---------------- module hyper-parameters (from __init__ defaults) ----------------
SAMPLE_RATE = 32000
N_FFT = 1024
WIN_LENGTH = 1024
HOP_LENGTH = 320
N_MELS = 64
FMIN = 50.0
FMAX = 14000.0
AMIN = 1e-10
REF = 1.0                      # ref=1.0 -> "- 10*log10(max(amin, ref))" == 0
BN_EPS = 1e-5

N_FREQ = N_FFT // 2 + 1        # 513
# Mel weights are exactly zero for FFT bins >= 449 (fmax=14 kHz), so the frequency axis is
# truncated to 512 = 4x128 lanes (asserted in make_params()).
F_BINS = 512
N_MELS_PAD = 128               # lane-dense output; sliced to N_MELS in the wrapper
T_TILE_MAX = 512               # frames per time tile (grid axis)
TAIL = WIN_LENGTH - 3 * HOP_LENGTH      # 64: samples of the 4th hop row a frame uses
LOG10_SCALE = 10.0 / np.log(10.0)       # 10*log10(x) == LOG10_SCALE * ln(x)


# ---------------- deterministic parameter construction (plain numpy glue) ----------------
def _hz_to_mel(f):
    f = np.asarray(f, dtype=np.float64)
    f_sp = 200.0 / 3.0
    mels = f / f_sp
    min_log_hz = 1000.0
    min_log_mel = min_log_hz / f_sp
    logstep = np.log(6.4) / 27.0
    mels = np.where(f >= min_log_hz,
                    min_log_mel + np.log(np.maximum(f, 1e-10) / min_log_hz) / logstep,
                    mels)
    return mels


def _mel_to_hz(m):
    m = np.asarray(m, dtype=np.float64)
    f_sp = 200.0 / 3.0
    freqs = f_sp * m
    min_log_hz = 1000.0
    min_log_mel = min_log_hz / f_sp
    logstep = np.log(6.4) / 27.0
    freqs = np.where(m >= min_log_mel,
                     min_log_hz * np.exp(logstep * (m - min_log_mel)),
                     freqs)
    return freqs


def make_mel_filterbank(sr, n_fft, n_mels, fmin, fmax):
    """librosa.filters.mel (slaney scale, slaney norm) -> (n_freq, n_mels)."""
    n_freq = n_fft // 2 + 1
    fftfreqs = np.linspace(0.0, sr / 2.0, n_freq)
    mel_pts = _mel_to_hz(np.linspace(_hz_to_mel(fmin), _hz_to_mel(fmax), n_mels + 2))
    fdiff = np.diff(mel_pts)
    ramps = mel_pts[:, None] - fftfreqs[None, :]
    weights = np.zeros((n_mels, n_freq), dtype=np.float64)
    for i in range(n_mels):
        lower = -ramps[i] / fdiff[i]
        upper = ramps[i + 2] / fdiff[i + 1]
        weights[i] = np.maximum(0.0, np.minimum(lower, upper))
    enorm = 2.0 / (mel_pts[2:n_mels + 2] - mel_pts[:n_mels])
    weights *= enorm[:, None]
    return weights.T.astype(np.float32)          # (n_freq, n_mels)


def make_params(bn_gamma=None, bn_beta=None, bn_running_mean=None, bn_running_var=None):
    """Returns (basis bf16 (WIN, 2F), mel_w bf16 (F, 128), scale f32 (1,128), bias f32 (1,128)).

    BatchNorm2d(64) eval-mode stats default to PyTorch init (gamma=1, beta=0, mean=0, var=1);
    pass trained values to match a real checkpoint.
    """
    # Merged hann-windowed DFT basis: columns [0:F) = cos, [F:2F) = sin (sign irrelevant for power).
    n = np.arange(WIN_LENGTH, dtype=np.float64)
    hann = 0.5 * (1.0 - np.cos(2.0 * np.pi * n / WIN_LENGTH))   # periodic hann
    k = np.arange(F_BINS, dtype=np.float64)
    ang = 2.0 * np.pi * np.outer(n, k) / N_FFT                  # (WIN, F_BINS)
    basis = np.concatenate([hann[:, None] * np.cos(ang),
                            hann[:, None] * np.sin(ang)], axis=1).astype(np.float32)

    mel_full = make_mel_filterbank(SAMPLE_RATE, N_FFT, N_MELS, FMIN, FMAX)  # (513, 64)
    # Safety check for the 513 -> 512 truncation: dropped bins carry exactly zero mel weight.
    assert float(np.abs(mel_full[F_BINS:, :]).max()) == 0.0
    mel_w = np.zeros((F_BINS, N_MELS_PAD), np.float32)
    mel_w[:, :N_MELS] = mel_full[:F_BINS, :]

    gamma = np.ones((N_MELS,), np.float32) if bn_gamma is None else np.asarray(bn_gamma, np.float32)
    beta = np.zeros((N_MELS,), np.float32) if bn_beta is None else np.asarray(bn_beta, np.float32)
    run_mean = (np.zeros((N_MELS,), np.float32) if bn_running_mean is None
                else np.asarray(bn_running_mean, np.float32))
    run_var = (np.ones((N_MELS,), np.float32) if bn_running_var is None
               else np.asarray(bn_running_var, np.float32))
    bn_scale = gamma / np.sqrt(run_var + BN_EPS)
    bn_bias = beta - run_mean * bn_scale
    # Fold 10/ln(10) into the scale so the kernel epilogue is: ln(mel) * scale + bias.
    scale = np.zeros((1, N_MELS_PAD), np.float32)
    bias = np.zeros((1, N_MELS_PAD), np.float32)
    scale[0, :N_MELS] = bn_scale * LOG10_SCALE
    bias[0, :N_MELS] = bn_bias

    return (jnp.asarray(basis, dtype=jnp.bfloat16),
            jnp.asarray(mel_w, dtype=jnp.bfloat16),
            jnp.asarray(scale, dtype=jnp.float32),
            jnp.asarray(bias, dtype=jnp.float32))


# ------------- Pallas kernel: in-VMEM framing + STFT matmul + power + log-mel + BN -------------
def _logmel_kernel(main_ref, extra_ref, basis_ref, melw_ref, scale_ref, bias_ref, out_ref):
    t_tile = main_ref.shape[1]
    main = main_ref[0]                                             # (t_tile, HOP) f32
    extra = extra_ref[0]                                           # (8, HOP) f32 (next tile's rows)
    rows = jnp.concatenate([main, extra], axis=0)                  # (t_tile + 8, HOP)
    # frame t = padded[t*HOP : t*HOP + WIN] = rows[t] | rows[t+1] | rows[t+2] | rows[t+3][:TAIL]
    frames = jnp.concatenate(
        [rows[0:t_tile],
         rows[1:t_tile + 1],
         rows[2:t_tile + 2],
         rows[3:t_tile + 3, :TAIL]],
        axis=1).astype(jnp.bfloat16)                               # (t_tile, WIN) bf16

    # Single MXU pass over the merged cos|sin basis, f32 accumulation.
    y = jnp.dot(frames, basis_ref[...], preferred_element_type=jnp.float32)  # (t_tile, 2F)
    real = y[:, :F_BINS]
    imag = y[:, F_BINS:]
    power = real * real + imag * imag                              # (t_tile, F_BINS) f32
    # bf16 cast kept knowingly: mel matmul is ~6% of MXU FLOPs; error ~O(0.4%) per bin pre-log.
    mel = jnp.dot(power.astype(jnp.bfloat16), melw_ref[...],
                  preferred_element_type=jnp.float32)              # (t_tile, 128) f32
    mel = jnp.maximum(mel, AMIN)
    # 10*log10(mel) * bn_scale + bn_bias  (10/ln10 folded into scale, ref term == 0, top_db=None)
    out_ref[0] = jnp.log(mel) * scale_ref[...] + bias_ref[...]


def _round_up(x, m):
    return (x + m - 1) // m * m


def mel_spectrogram_extractor(waveform, params):
    """waveform: (B, L) float32 -> log-mel (B, 1, T, N_MELS) float32.  Requires L > N_FFT//2."""
    basis, mel_w, bn_scale, bn_bias = params
    B, L = waveform.shape
    T = 1 + L // HOP_LENGTH

    t_tile = min(T_TILE_MAX, _round_up(T, 8))
    n_tiles = -(-T // t_tile)
    t_pad = n_tiles * t_tile
    n_hops = t_pad + 8                        # +8 hop rows so the last tile's frame tails exist

    # ---- glue: center reflect-pad, zero-pad tail, contiguous reshape to hop rows (no gather) ----
    padded = jnp.pad(waveform, ((0, 0), (N_FFT // 2, N_FFT // 2)), mode="reflect")
    padded = jnp.pad(padded, ((0, 0), (0, n_hops * HOP_LENGTH - padded.shape[1])))
    wave3d = padded.reshape(B, n_hops, HOP_LENGTH)                 # (B, n_hops, 320)

    grid_spec = pltpu.PrefetchScalarGridSpec(
        num_scalar_prefetch=0,
        grid=(B, n_tiles),
        in_specs=[
            # main: hop rows [t*t_tile, (t+1)*t_tile) of batch b
            pl.BlockSpec((1, t_tile, HOP_LENGTH), lambda b, t: (b, t, 0)),
            # extra: the next 8 hop rows (frame-tail overlap into the following tile)
            pl.BlockSpec((1, 8, HOP_LENGTH),
                         lambda b, t: (b, (t + 1) * (t_tile // 8), 0)),
            pl.BlockSpec((WIN_LENGTH, 2 * F_BINS), lambda b, t: (0, 0)),
            pl.BlockSpec((F_BINS, N_MELS_PAD), lambda b, t: (0, 0)),
            pl.BlockSpec((1, N_MELS_PAD), lambda b, t: (0, 0)),
            pl.BlockSpec((1, N_MELS_PAD), lambda b, t: (0, 0)),
        ],
        out_specs=pl.BlockSpec((1, t_tile, N_MELS_PAD), lambda b, t: (b, t, 0)),
    )

    out = pl.pallas_call(
        _logmel_kernel,
        out_shape=jax.ShapeDtypeStruct((B, t_pad, N_MELS_PAD), jnp.float32),
        grid_spec=grid_spec,
        compiler_params=pltpu.CompilerParams(
            dimension_semantics=("parallel", "parallel"),
            vmem_limit_bytes=48 << 20,          # v7x-safe (64 MiB physical per TC)
        ),
    )(wave3d, wave3d, basis, mel_w, bn_scale, bn_bias)

    # slice away time/mel padding, restore PyTorch (B, 1, T, n_mels) layout
    return out[:, :T, :N_MELS][:, None, :, :]


if __name__ == "__main__":
    key = jax.random.PRNGKey(0)
    B = 2
    L = 15 * HOP_LENGTH                      # 4800 samples -> T = 16 frames
    waveform = jax.random.normal(key, (B, L), dtype=jnp.float32)

    params = make_params()
    out = mel_spectrogram_extractor(waveform, params)
    out = jax.block_until_ready(out)

    T = 1 + L // HOP_LENGTH
    assert out.shape == (B, 1, T, N_MELS), out.shape
    assert out.dtype == jnp.float32
    assert bool(jnp.all(jnp.isfinite(out)))
    print("KERNEL_OK")
</pallas_src>

<mosaic_0001>
module attributes {stable_mosaic.version = 11 : i64} {
  func.func @_logmel_kernel(%arg0: i32, %arg1: i32, %arg2: memref<1x16x320xf32, #tpu.memory_space<vmem>>, %arg3: memref<1x8x320xf32, #tpu.memory_space<vmem>>, %arg4: memref<1024x1024xbf16, #tpu.memory_space<vmem>>, %arg5: memref<512x128xbf16, #tpu.memory_space<vmem>>, %arg6: memref<1x128xf32, #tpu.memory_space<vmem>>, %arg7: memref<1x128xf32, #tpu.memory_space<vmem>>, %arg8: memref<1x16x128xf32, #tpu.memory_space<vmem>>) attributes {dimension_semantics = [#tpu.dimension_semantics<parallel>, #tpu.dimension_semantics<parallel>], iteration_bounds = array<i64: 2, 1>, scalar_prefetch = 0 : i64, scratch_operands = 0 : i64, tpu.core_type = #tpu.core_type<tc>, window_params = [{transform_indices = @transform_0, window_bounds = array<i64: 1, 16, 320>}, {transform_indices = @transform_1, window_bounds = array<i64: 1, 8, 320>}, {pipeline_mode = #tpu.pipeline_mode<synchronous>, transform_indices = @transform_2, window_bounds = array<i64: 1024, 1024>}, {pipeline_mode = #tpu.pipeline_mode<synchronous>, transform_indices = @transform_3, window_bounds = array<i64: 512, 128>}, {pipeline_mode = #tpu.pipeline_mode<synchronous>, transform_indices = @transform_4, window_bounds = array<i64: 1, 128>}, {pipeline_mode = #tpu.pipeline_mode<synchronous>, transform_indices = @transform_5, window_bounds = array<i64: 1, 128>}, {transform_indices = @transform_6, window_bounds = array<i64: 1, 16, 128>}]} {
    %c0 = arith.constant 0 : index
    %c0_0 = arith.constant 0 : index
    %c0_1 = arith.constant 0 : index
    %0 = vector.load %arg2[%c0, %c0_0, %c0_1] : memref<1x16x320xf32, #tpu.memory_space<vmem>>, vector<1x16x320xf32>
    %1 = vector.shape_cast %0 : vector<1x16x320xf32> to vector<16x320xf32>
    %c0_2 = arith.constant 0 : index
    %c0_3 = arith.constant 0 : index
    %c0_4 = arith.constant 0 : index
    %2 = vector.load %arg3[%c0_2, %c0_3, %c0_4] : memref<1x8x320xf32, #tpu.memory_space<vmem>>, vector<1x8x320xf32>
    %3 = vector.shape_cast %2 : vector<1x8x320xf32> to vector<8x320xf32>
    %4 = tpu.concatenate %1, %3 in 0 : vector<16x320xf32>, vector<8x320xf32> -> vector<24x320xf32>
    %5 = vector.extract_strided_slice %4 {offsets = [0, 0], sizes = [16, 320], strides = [1, 1]} : vector<24x320xf32> to vector<16x320xf32>
    %6 = vector.extract_strided_slice %4 {offsets = [1, 0], sizes = [16, 320], strides = [1, 1]} : vector<24x320xf32> to vector<16x320xf32>
    %7 = vector.extract_strided_slice %4 {offsets = [2, 0], sizes = [16, 320], strides = [1, 1]} : vector<24x320xf32> to vector<16x320xf32>
    %8 = vector.extract_strided_slice %4 {offsets = [3, 0], sizes = [16, 64], strides = [1, 1]} : vector<24x320xf32> to vector<16x64xf32>
    %9 = tpu.concatenate %5, %6, %7, %8 in 1 : vector<16x320xf32>, vector<16x320xf32>, vector<16x320xf32>, vector<16x64xf32> -> vector<16x1024xf32>
    %10 = arith.truncf %9 : vector<16x1024xf32> to vector<16x1024xbf16>
    %c0_5 = arith.constant 0 : index
    %c0_6 = arith.constant 0 : index
    %11 = vector.load %arg4[%c0_5, %c0_6] : memref<1024x1024xbf16, #tpu.memory_space<vmem>>, vector<1024x1024xbf16>
    %cst = arith.constant dense<0.000000e+00> : vector<16x1024xf32>
    %12 = tpu.matmul %10, %11, %cst {dimension_numbers = #tpu.dot_dimension_numbers<[1], [0], [0], [1], [0, 0, 1, 1], [], []>} : vector<16x1024xbf16>, vector<1024x1024xbf16>, vector<16x1024xf32> -> vector<16x1024xf32>
    %13 = vector.extract_strided_slice %12 {offsets = [0, 0], sizes = [16, 512], strides = [1, 1]} : vector<16x1024xf32> to vector<16x512xf32>
    %14 = vector.extract_strided_slice %12 {offsets = [0, 512], sizes = [16, 512], strides = [1, 1]} : vector<16x1024xf32> to vector<16x512xf32>
    %15 = arith.mulf %13, %13 : vector<16x512xf32>
    %16 = arith.mulf %14, %14 : vector<16x512xf32>
    %17 = arith.addf %15, %16 : vector<16x512xf32>
    %18 = arith.truncf %17 : vector<16x512xf32> to vector<16x512xbf16>
    %c0_7 = arith.constant 0 : index
    %c0_8 = arith.constant 0 : index
    %19 = vector.load %arg5[%c0_7, %c0_8] : memref<512x128xbf16, #tpu.memory_space<vmem>>, vector<512x128xbf16>
    %cst_9 = arith.constant dense<0.000000e+00> : vector<16x128xf32>
    %20 = tpu.matmul %18, %19, %cst_9 {dimension_numbers = #tpu.dot_dimension_numbers<[1], [0], [0], [1], [0, 0, 1, 1], [], []>} : vector<16x512xbf16>, vector<512x128xbf16>, vector<16x128xf32> -> vector<16x128xf32>
    %cst_10 = arith.constant 1.000000e-10 : f32
    %21 = vector.broadcast %cst_10 : f32 to vector<16x128xf32>
    %22 = arith.maximumf %20, %21 : vector<16x128xf32>
    %23 = math.log %22 : vector<16x128xf32>
    %c0_11 = arith.constant 0 : index
    %c0_12 = arith.constant 0 : index
    %24 = vector.load %arg6[%c0_11, %c0_12] : memref<1x128xf32, #tpu.memory_space<vmem>>, vector<1x128xf32>
    %25 = vector.broadcast %24 : vector<1x128xf32> to vector<16x128xf32>
    %26 = arith.mulf %23, %25 : vector<16x128xf32>
    %c0_13 = arith.constant 0 : index
    %c0_14 = arith.constant 0 : index
    %27 = vector.load %arg7[%c0_13, %c0_14] : memref<1x128xf32, #tpu.memory_space<vmem>>, vector<1x128xf32>
    %28 = vector.broadcast %27 : vector<1x128xf32> to vector<16x128xf32>
    %29 = arith.addf %26, %28 : vector<16x128xf32>
    %c0_15 = arith.constant 0 : index
    %c0_16 = arith.constant 0 : index
    %c0_17 = arith.constant 0 : index
    %30 = vector.load %arg8[%c0_15, %c0_16, %c0_17] : memref<1x16x128xf32, #tpu.memory_space<vmem>>, vector<1x16x128xf32>
    %31 = vector.shape_cast %30 : vector<1x16x128xf32> to vector<16x128xf32>
    %32 = vector.shape_cast %29 : vector<16x128xf32> to vector<1x16x128xf32>
    tpu.vector_store %arg8[%c0_15, %c0_16, %c0_17], %32 {strides = array<i32>} : memref<1x16x128xf32, #tpu.memory_space<vmem>>, vector<1x16x128xf32>,
    return
  }
  func.func @transform_0(%arg0: i32, %arg1: i32) -> (i32, i32, i32) {
    %c0_i32 = arith.constant 0 : i32
    %c0_i32_0 = arith.constant 0 : i32
    return %arg0, %arg1, %c0_i32 : i32, i32, i32
  }
  func.func @transform_1(%arg0: i32, %arg1: i32) -> (i32, i32, i32) {
    %c1_i32 = arith.constant 1 : i32
    %0 = arith.addi %arg1, %c1_i32 : i32
    %c2_i32 = arith.constant 2 : i32
    %1 = arith.muli %0, %c2_i32 : i32
    %c0_i32 = arith.constant 0 : i32
    %c0_i32_0 = arith.constant 0 : i32
    return %arg0, %1, %c0_i32 : i32, i32, i32
  }
  func.func @transform_2(%arg0: i32, %arg1: i32) -> (i32, i32) {
    %c0_i32 = arith.constant 0 : i32
    %c0_i32_0 = arith.constant 0 : i32
    %c0_i32_1 = arith.constant 0 : i32
    return %c0_i32, %c0_i32_0 : i32, i32
  }
  func.func @transform_3(%arg0: i32, %arg1: i32) -> (i32, i32) {
    %c0_i32 = arith.constant 0 : i32
    %c0_i32_0 = arith.constant 0 : i32
    %c0_i32_1 = arith.constant 0 : i32
    return %c0_i32, %c0_i32_0 : i32, i32
  }
  func.func @transform_4(%arg0: i32, %arg1: i32) -> (i32, i32) {
    %c0_i32 = arith.constant 0 : i32
    %c0_i32_0 = arith.constant 0 : i32
    %c0_i32_1 = arith.constant 0 : i32
    return %c0_i32, %c0_i32_0 : i32, i32
  }
  func.func @transform_5(%arg0: i32, %arg1: i32) -> (i32, i32) {
    %c0_i32 = arith.constant 0 : i32
    %c0_i32_0 = arith.constant 0 : i32
    %c0_i32_1 = arith.constant 0 : i32
    return %c0_i32, %c0_i32_0 : i32, i32
  }
  func.func @transform_6(%arg0: i32, %arg1: i32) -> (i32, i32, i32) {
    %c0_i32 = arith.constant 0 : i32
    %c0_i32_0 = arith.constant 0 : i32
    return %arg0, %arg1, %c0_i32 : i32, i32, i32
  }
}

</mosaic_0001>

<bundles_post_ra>
// kernel: tpu_custom_call.1
= control target key start
LH: loop header
LB: loop body
LE: loop exit
PB: predicated region body
PF: predicated region fallthrough
CT: control target
= control target key end

     0   :  { %s8716_s0 = inlined_call_operand.hbm [shape: f32[2,24,320], index: 0, kind: input, shape index: {}]   ;;  %s8717_s1 = inlined_call_operand.hbm [shape: f32[2,24,320], index: 1, kind: input, shape index: {}]   ;;  %s8718_s2 = inlined_call_operand.hbm [shape: bf16[1024,1024], index: 2, kind: input, shape index: {}]   ;;  %s8719_s3 = inlined_call_operand.hbm [shape: bf16[512,128], index: 3, kind: input, shape index: {}]   ;;  %s8720_s4 = inlined_call_operand.hbm [shape: f32[1,128], index: 4, kind: input, shape index: {}]   ;;  %s8721_s5 = inlined_call_operand.hbm [shape: f32[1,128], index: 5, kind: input, shape index: {}]   ;;  %s8722_s6 = inlined_call_operand.hbm [shape: f32[2,16,128], index: 6, kind: output, shape index: {}]  }
   0x1   :  { %8726 = sst [smem:[#allocation24_spill]] %s8718_s2 }
   0x2   :  { %8727 = sst [smem:[#allocation25_spill]] %s8719_s3 }
   0x3   :  { %8728 = sst [smem:[#allocation26_spill]] %s8720_s4 }
   0x4   :  { %8729 = sst [smem:[#allocation27_spill]] %s8721_s5 }
   0x5   :  { %11 = vsyncpa [#allocation3], 0 }
   0x6   :  { %13 = vsyncpa [#allocation3 + $0x1], 0 }
   0x7   :  { %14 = vsyncpa [#allocation6], 0 }
   0x8   :  { %16 = vsyncpa [#allocation6 + $0x1], 0 }
   0x9   :  { %17 = vsyncpa [#allocation9], 0 }
   0xa   :  { %18 = vsyncpa [#allocation12], 0 }
   0xb   :  { %19 = vsyncpa [#allocation4], 0 }
   0xc   :  { %21 = vsyncpa [#allocation4 + $0x1], 0  ;;  %s8239_s21 = smov 0   ;;  %s8241_s22 = smov 0  }
   0xd   :  { %s8243_s23 = smov 0   ;;  %s8245_s24 = smov 0  }
   0xe   :  { %s8247_s25 = smov 0   ;;  %s8249_s26 = smov 0  }
   0xf LB: > { %8730 = sst [smem:[#allocation20_spill]] %s8177_s23  ;;  %s8270_s27 = sadd.s32 4294967295, %s8189_s26   ;;  %s8189_s26 = sphi %s8249_s26, %s27_s26   ;;  %s8185_s25 = sphi %s8247_s25, %s8750_s25   ;;  %s8181_s24 = sphi %s8245_s24, %s8746_s24   ;;  %s8177_s23 = sphi %s8243_s23, %s8745_s23   ;;  %s8173_s22 = sphi %s8241_s22, %s8749_s22   ;;  %s8169_s21 = sphi %s8239_s21, %s8748_s21  }
  0x10   : > { %8731 = sst [smem:[#allocation21_spill]] %s8185_s25  ;;  %s5022_s28 = sadd.s32 4294967294, %s8189_s26  }
  0x11   : > { %p61_p0 = scmp.ne.s32.totalorder %s8173_s22, %s8169_s21  ;;  %p62_p1 = scmp.eq.s32.totalorder %s8270_s27, 0 }
  0x12   : > { %p203_p2 = scmp.eq.s32.totalorder %s8270_s27, 1  ;;  %p209_p3 = scmp.eq.s32.totalorder %s5022_s28, 1 }
  0x13   : > { %p8279_p4 = por %p62_p1, %p61_p0  ;;  %p5023_p5 = scmp.ge.s32.totalorder %s8189_s26, 1 }
  0x14   : > { %p8284_p6 = por %p209_p3, %p61_p0  ;;  %p216_p7 = scmp.lt.s32.totalorder %s8189_s26, 3 }
  0x15   : > { %s8734_s2 = sld [smem:[#allocation24_spill]]  ;;  %s8191_s11 = smov [#allocation7]  }
  0x16   : > { %p8292_p8 = pnand %p5023_p5, %p216_p7  ;;  %s229_s12 = sshll.u32 %s8191_s11, 4  ;;  %s230_s12 = int_to_ptr.vmem [resolvable:$true] %s229_s12 }
  0x17   : > { %p5028_p11 = scmp.ge.s32.totalorder %s8189_s26, 2  ;;  %s8737_s3 = sld [smem:[#allocation25_spill]] }
  0x18   : > { %p7790_p9 = pneg %p8292_p8  ;;  %s8192_s17 = smov 512  }
  0x19   : > { %s8193_s18 = smov 32   ;;  %s8194_s19 = smov [#allocation8]  }
  0x1a   : > { %p8300_p10 = pnand %p7790_p9, %p62_p1  ;;  %s243_s20 = sshll.u32 %s8194_s19, 4  ;;  %s244_s20 = int_to_ptr.vmem [resolvable:$true] %s243_s20 }
  0x1b   : > { %s227_s9 = sshll.u32 %s8734_s2, 4  ;;  %s8195_s28 = smov 64   ;;  %s228_s9 = int_to_ptr.hbm [resolvable:$true] %s227_s9 }
  0x1c   : > { %7793 = dma.hbm_to_vmem [thread:$0]  (!%p8300_p10), %s228_s9, 65536, %s230_s12, [#allocation6], %s8192_s17, %s8192_s17, %s8193_s18  }
  0x1d   : > { %s241_s16 = sshll.u32 %s8737_s3, 4  ;;  %s8196_s7 = smov 4   ;;  %s242_s16 = int_to_ptr.hbm [resolvable:$true] %s241_s16 }
  0x1e   : > { %7796 = dma.hbm_to_vmem [thread:$0]  (!%p8300_p10), %s242_s16, 4096, %s244_s20, [#allocation9], %s8195_s28, %s8195_s28, %s8196_s7  }
  0x1f   : > { %s8738_s4 = sld [smem:[#allocation26_spill]]  ;;  %s8197_s9 = smov [#allocation10]  }
  0x20   : > { %s258_s12 = sshll.u32 %s8197_s9, 4  ;;  %s8739_s5 = sld [smem:[#allocation27_spill]]  ;;  %s259_s12 = int_to_ptr.vmem [resolvable:$true] %s258_s12 }
  0x21   : > { %s8198_s16 = smov [#allocation11]   ;;  %s39_s20 = sadd.s32 1, %s8185_s25 }
  0x22   : > { %s270_s19 = sshll.u32 %s8198_s16, 4  ;;  %s48_s28 = sadd.s32 1, %s8177_s23  ;;  %s271_s19 = int_to_ptr.vmem [resolvable:$true] %s270_s19 }
  0x23   : > { %p41_p12 = scmp.ge.s32.totalorder %s39_s20, 2  ;;  %p55_p13 = scmp.ne.s32.totalorder %s8177_s23, %s8173_s22 }
  0x24   : > { %p56_p0 = scmp.eq.s32.totalorder %s8189_s26, 0  ;;  %p7818_p3 = scmp.lt.s32.totalorder %s8189_s26, 2 }
  0x25   : > { %s256_s14 = sshll.u32 %s8738_s4, 4  ;;  %s8752_s20 = smov (%p41_p12, %s39_s20), 0  ;;  %s257_s14 = int_to_ptr.hbm [resolvable:$true] %s256_s14 }
  0x26   : > { %s268_s18 = sshll.u32 %s8739_s5, 4  ;;  %8740 = sst [smem:[#allocation22_spill]] %s8752_s20  ;;  %s269_s18 = int_to_ptr.hbm [resolvable:$true] %s268_s18 }
  0x27   : > { %7799 = dma.hbm_to_vmem [thread:$0]  (!%p8300_p10), %s257_s14, 16, %s259_s12, [#allocation9]  }
  0x28   : > { %7802 = dma.hbm_to_vmem [thread:$0]  (!%p8300_p10), %s269_s18, 16, %s271_s19, [#allocation12]  }
  0x29   : > { %p57_p5 = por %p56_p0, %p55_p13  ;;  %p8332_p7 = por %p203_p2, %p55_p13 }
  0x2a   : > { %s43_s8 = ssub.s32 %s8185_s25, %s8752_s20  ;;  %s281_s13 = sand.u32 1, %s8177_s23  }
  0x2b   : > { %p46_p9 = scmp.eq.s32.totalorder %s43_s8, 0  ;;  %s7763_s11 = smul.u32 48, %s281_s13 }
  0x2c   : > { %p8339_p10 = pnand %p7818_p3, %p57_p5  ;;  %s7764_s12 = smul.u32 72, %s8185_s25 }
  0x2d   : > { %s8344_s9 = scalar_select %p46_p9, %s8177_s23, %s48_s28  }
  0x2e   : > { %s285_s15 = scalar_lea.vmem [#allocation2], %s7763_s11  ;;  %s300_s19 = scalar_lea.hbm %s8716_s0, %s7764_s12 }
  0x2f   : > { %8743 = sst [smem:[#allocation23_spill]] %s8344_s9  ;;  %s304_s17 = sshll.u32 %s285_s15, 4  ;;  %s305_s17 = int_to_ptr.vmem [resolvable:$true] %s304_s17 }
  0x30   : > { %s302_s2 = sshll.u32 %s300_s19, 4  ;;  %s282_s8 = scalar_lea.sflag [#allocation3], %s281_s13  ;;  %s303_s2 = int_to_ptr.hbm [resolvable:$true] %s302_s2 }
  0x31   : > { %s8199_s3 = smov 384   ;;  %s8200_s4 = smov 24  }
  0x32   : > { %7806 = dma.hbm_to_vmem [thread:$0]  (!%p8339_p10), %s303_s2, 768, %s305_s17, %s282_s8, %s8199_s3, %s8199_s3, %s8200_s4  }
  0x33   : > { %s314_s5 = sand.u32 1, %s8189_s26   ;;  %s7765_s20 = smul.u32 24, %s281_s13 }
  0x34   : > { %s4916_s11 = scalar_lea.hbm %s8717_s1, %s7764_s12  ;;  %s315_s16 = scalar_lea.sflag [#allocation6], %s314_s5 }
  0x35   : > { %s4917_s15 = scalar_lea.hbm %s4916_s11, 48  ;;  %s318_s23 = scalar_lea.vmem [#allocation5], %s7765_s20 }
  0x36   : > { %s329_s25 = sshll.u32 %s4917_s15, 4  ;;  %s331_s18 = sshll.u32 %s318_s23, 4  ;;  %s330_s25 = int_to_ptr.hbm [resolvable:$true] %s329_s25  ;;  %s332_s18 = int_to_ptr.vmem [resolvable:$true] %s331_s18 }
  0x37   : > { %7809 = dma.hbm_to_vmem [thread:$0]  (!%p8339_p10), %s330_s25, 384, %s332_s18, %s315_s16  }
  0x38   : > { %340 = sbr.rel (%p8292_p8) target bundleno = 1069 (0x42d), region = 44  ;;  %s8361_s2 = sand.u32 (!%p8292_p8), 1, %s8173_s22  }
  0x39   : > { %s7766_s3 = smul.u32 (!%p8292_p8), 48, %s8361_s2  ;;  %s343_s4 = scalar_lea.sflag (!%p8292_p8), [#allocation3], %s8361_s2 }
  0x3b   : > { %s8365_s13 = scalar_lea.vmem (!%p8292_p8), [#allocation2], %s7766_s3 }
  0x3d   : > { %8144 = dma.done.wait (%p8279_p4), %s343_s4, 768  }
  0x3e   : > { %8146 = vsyncadd (%p8279_p4), %s343_s4, 4294966528  ;;  %s352_s5 = sand.u32 1, %s8270_s27   ;;  %s7767_s23 = smul.u32 24, %s8361_s2 }
  0x3f   : > { %s353_s25 = scalar_lea.sflag [#allocation6], %s352_s5 }
  0x40   : > { %s8373_s10 = scalar_lea.vmem [#allocation5], %s7767_s23 }
  0x41   : > { %8148 = dma.done.wait (%p8279_p4), %s353_s25, 384  }
  0x42   : > { %8150 = vsyncadd (%p8279_p4), %s353_s25, 4294966912 }
  0x43   : > { %8152 = dma.done.wait (%p62_p1), [#allocation6], 65536  }
  0x44   : > { %8154 = vsyncadd (%p62_p1), [#allocation6], 4294901760 }
  0x45   : > { %8156 = dma.done.wait (%p62_p1), [#allocation9], 4112  }
  0x46   : > { %8158 = vsyncadd (%p62_p1), [#allocation9], 4294963184 }
  0x47   : > { %8160 = dma.done.wait (%p62_p1), [#allocation12], 16  }
  0x48   : > { %8162 = vsyncadd (%p62_p1), [#allocation12], 4294967280  ;;  %v8392_v0 = vld [vmem:[%s8365_s13] sm:$0xff]  ;;  %v8395_v1 = vld [vmem:[%s8365_s13 + $0x18] sm:$0xff]  ;;  %vm438_vm0 = vcmask 1046528   ;;  %vm477_vm1 = vcmask 1045504  }
  0x49   : > { %v426_v2 = vld [vmem:[%s8373_s10] sm:$0xff]  ;;  %v439_v3 = vrot.slane %v8392_v0, 1  ;;  %v440_v4 = vrot.slane %v8395_v1, 1  ;;  %v478_v6 = vrot.slane %v8392_v0, 2  ;;  %v8402_v7 = vld [vmem:[%s8365_s13 + $0x10] sm:$0xff]  ;;  %v479_v9 = vrot.slane %v8395_v1, 2 }
  0x4a   : > { %v448_v5 = vrot.slane %v426_v2, 1  ;;  %v8405_v8 = vld [vmem:[%s8365_s13 + $0x28] sm:$0xff]  ;;  %v487_v10 = vrot.slane %v426_v2, 2  ;;  %v8409_v11 = vld [vmem:[%s8373_s10 + $0x10] sm:$0xff]  ;;  %v445_v12 = vrot.slane %v8402_v7, 1  ;;  %v8420_v18 = vld [vmem:[%s8365_s13 + $0x20] sm:$0xff] }
  0x4b   : > { %v441_v13 = vsel %vm438_vm0, %v439_v3, %v440_v4  ;;  %v446_v15 = vrot.slane %v8405_v8, 1  ;;  %v452_v16 = vrot.slane %v8409_v11, 1  ;;  %v8417_v17 = vld [vmem:[%s8365_s13 + $0x8] sm:$0xff]  ;;  %v480_v19 = vsel %vm477_vm1, %v478_v6, %v479_v9  ;;  %s8201_s27 = smov 64   ;;  %v5263_v29 = vld [vmem:[#allocation7 + $0x1c0] sm:$0xf] }
  0x4c   : > { %v449_v14 = vsel %vm438_vm0, %v440_v4, %v448_v5  ;;  %v488_v20 = vsel %vm477_vm1, %v479_v9, %v487_v10  ;;  %v427_v22 = vld [vmem:[%s8373_s10 + $0x8] sm:$0xff]  ;;  %v442_v27 = vrot.slane %v8417_v17, 1  ;;  %v443_v28 = vrot.slane %v8420_v18, 1  ;;  %v7278_v34 = vld [vmem:[#allocation7 + $0x1dc] sm:$0xf0]  ;;  %s5036_s29 = sshll.u32 %s8361_s2, 4 }
  0x4d   : > { %v7885_v21 = vpack.i.bf16 %v449_v14, %v441_v13  ;;  %v8425_v23 = vpack.c.bf16 %v488_v20, %v480_v19  ;;  %v447_v24 = vsel %vm438_vm0, %v445_v12, %v446_v15  ;;  %v453_v25 = vsel %vm438_vm0, %v446_v15, %v452_v16  ;;  %v5519_v38 = vld [vmem:[#allocation7 + $0x3c0] sm:$0xf]  ;;  %s7762_s20 = sshll.u32 %s8181_s24, 4  ;;  %s410_s17 = scalar_lea.vmem [#allocation13], %s5036_s29 }
  0x4e   : > { %v7895_v26 = vpack.i.bf16 %v453_v25, %v447_v24  ;;  %vm499_vm2 = vcmask 1044480   ;;  %v450_v30 = vrot.slane %v427_v22, 1  ;;  %v481_v31 = vrot.slane %v8417_v17, 2  ;;  %v7342_v39 = vld [vmem:[#allocation7 + $0x3dc] sm:$0xf0]  ;;  %s4865_s12 = scalar_lea.hbm %s8722_s6, %s7762_s20  ;;  %s4866_s19 = sshll.u32 %s410_s17, 4  ;;  %s4867_s19 = int_to_ptr.vmem [resolvable:$true] %s4866_s19 }
  0x4f   : > { %7886 = vrot.lane.b32.xlu0 %v7885_v21, %s8201_s27  ;;  %v482_v32 = vrot.slane %v8420_v18, 2  ;;  %v489_v33 = vrot.slane %v427_v22, 2  ;;  %v444_v35 = vsel %vm438_vm0, %v442_v27, %v443_v28  ;;  %v500_v36 = vrot.slane %v8392_v0, 3  ;;  %v5231_v44 = vld [vmem:[#allocation7 + $0x180] sm:$0xf]  ;;  %s4868_s8 = sshll.u32 %s4865_s12, 4  ;;  %s4869_s8 = int_to_ptr.hbm [resolvable:$true] %s4868_s8 }
  0x50   : > { %7896 = vrot.lane.b32.xlu1 %v7895_v26, %s8201_s27  ;;  %v501_v37 = vrot.slane %v8395_v1, 3  ;;  %v451_v40 = vsel %vm438_vm0, %v443_v28, %v450_v30  ;;  %v503_v43 = vrot.slane %v426_v2, 3  ;;  %v7270_v45 = vld [vmem:[#allocation7 + $0x19c] sm:$0xf0]  ;;  %v5264_v49 = vor.u32 %v7278_v34, %v5263_v29  ;;  %s4852_s28 = scalar_lea.sflag [#allocation4], %s8361_s2  ;;  %s8105_s11 = sshra.s32 %s4869_s8, 4  ;;  %s8106_s11 = int_to_ptr.hbm [resolvable:$true] %s8105_s11 }
  0x51   : > { %v483_v41 = vsel %vm477_vm1, %v481_v31, %v482_v32  ;;  %v490_v42 = vsel %vm477_vm1, %v482_v32, %v489_v33  ;;  %v7890_v47 = vpack.i.bf16 %v451_v40, %v444_v35  ;;  %v5487_v50 = vld [vmem:[#allocation7 + $0x380] sm:$0xf]  ;;  %v5520_v53 = vor.u32 %v7342_v39, %v5519_v38  ;;  %s8107_s24 = scalar_lea.hbm %s8106_s11, 16  ;;  %s8111_s16 = scalar_lea.hbm %s8722_s6, 32 }
  0x52   : > { %v8441_v46 = vpack.c.bf16 %v490_v42, %v483_v41  ;;  %v502_v48 = vsel %vm499_vm2, %v500_v36, %v501_v37  ;;  %v7334_v51 = vld [vmem:[#allocation7 + $0x39c] sm:$0xf0]  ;;  %v504_v52 = vsel %vm499_vm2, %v501_v37, %v503_v43  ;;  %3595 = vmatpush.bf16.msra.mxu0 %v5264_v49  ;;  %v5232_v55 = vor.u32 %v7270_v45, %v5231_v44  ;;  %p8108_p1 = scmp.ne.s32.totalorder %s8106_s11, %s8107_s24  ;;  %p8112_p8 = scmp.lt.s32.totalorder %s8106_s11, %s8722_s6 }
  0x53   : > { %v7900_v54 = vpack.i.bf16 %v504_v52, %v502_v48  ;;  %v5775_v56 = vld [vmem:[#allocation7 + $0x5c0] sm:$0xf]  ;;  %3609 = vmatpush.bf16.msra.mxu1 %v5520_v53  ;;  %v5488_v60 = vor.u32 %v7334_v51, %v5487_v50  ;;  %vm466_vm3 = vcmask 523264   ;;  %p8113_p12 = scmp.lt.s32.totalorder %s8111_s16, %s8107_s24 }
  0x54   : > { %v7406_v57 = vld [vmem:[#allocation7 + $0x5dc] sm:$0xf0]  ;;  %p8109_p2 = pnand %p8108_p1, %p8332_p7 }
  0x55   : > { %v5199_v58 = vld [vmem:[#allocation7 + $0x140] sm:$0xf]  ;;  %v5776_v62 = vor.u32 %v7406_v57, %v5775_v56  ;;  %p8114_p13 = por %p8113_p12, %p8112_p8 }
  0x56   : > { %v7262_v59 = vld [vmem:[#allocation7 + $0x15c] sm:$0xf0]  ;;  %3596 = vmatpush.bf16.msra.mxu0 %v5232_v55  ;;  %p8110_p4 = pneg %p8109_p2 }
  0x57   : > { %v5455_v61 = vld [vmem:[#allocation7 + $0x340] sm:$0xf]  ;;  %7891 = vrot.lane.b32.xlu0 %v7890_v47, %s8201_s27  ;;  %3623 = vmatpush.bf16.msra.mxu2 %v5776_v62  ;;  %v5200_v5 = vor.u32 %v7262_v59, %v5199_v58 }
  0x58   : > { %v7326_v63 = vld [vmem:[#allocation7 + $0x35c] sm:$0xf0]  ;;  %7901 = vrot.lane.b32.xlu1 %v7900_v54, %s8201_s27  ;;  %3610 = vmatpush.bf16.msra.mxu1 %v5488_v60  ;;  %p8115_p0 = pnand %p8114_p13, %p8110_p4 }
  0x59   : > { %v5743_v2 = vld [vmem:[#allocation7 + $0x580] sm:$0xf]  ;;  %v5456_v13 = vor.u32 %v7326_v63, %v5455_v61 }
  0x5a   : > { %v7398_v3 = vld [vmem:[#allocation7 + $0x59c] sm:$0xf0]  ;;  %3597 = vmatpush.bf16.msra.mxu0 %v5200_v5 }
  0x5b   : > { %v5744_v4 = vor.u32 %v7398_v3, %v5743_v2  ;;  %v5167_v6 = vld [vmem:[#allocation7 + $0x100] sm:$0xf] }
  0x5c   : > { %v5711_v9 = vld [vmem:[#allocation7 + $0x540] sm:$0xf]  ;;  %3611 = vmatpush.bf16.msra.mxu1 %v5456_v13 }
  0x5d   : > { %v7390_v10 = vld [vmem:[#allocation7 + $0x55c] sm:$0xf0]  ;;  %3624 = vmatpush.bf16.msra.mxu2 %v5744_v4 }
  0x5e   : > { %v7254_v12 = vld [vmem:[#allocation7 + $0x11c] sm:$0xf0]  ;;  %v5712_v21 = vor.u32 %v7390_v10, %v5711_v9 }
  0x5f   : > { %v6031_v14 = vld [vmem:[#allocation7 + $0x7c0] sm:$0xf]  ;;  %v5168_v24 = vor.u32 %v7254_v12, %v5167_v6 }
  0x60   : > { %v7470_v15 = vld [vmem:[#allocation7 + $0x7dc] sm:$0xf0] }
  0x61   : > { %v5423_v16 = vld [vmem:[#allocation7 + $0x300] sm:$0xf]  ;;  %v6032_v20 = vor.u32 %v7470_v15, %v6031_v14  ;;  %3625 = vmatpush.bf16.msra.mxu2 %v5712_v21  ;;  %3598 = vmatpush.bf16.msra.mxu0 %v5168_v24 }
  0x62   : > { %v7318_v19 = vld [vmem:[#allocation7 + $0x31c] sm:$0xf0] }
  0x63   : > { %v5999_v22 = vld [vmem:[#allocation7 + $0x780] sm:$0xf]  ;;  %3637 = vmatpush.bf16.msra.mxu3 %v6032_v20  ;;  %v5424_v30 = vor.u32 %v7318_v19, %v5423_v16 }
  0x64   : > { %v5679_v25 = vld [vmem:[#allocation7 + $0x500] sm:$0xf] }
  0x65   : > { %v7382_v26 = vld [vmem:[#allocation7 + $0x51c] sm:$0xf0]  ;;  %3612 = vmatpush.bf16.msra.mxu1 %v5424_v30 }
  0x66   : > { %v7462_v27 = vld [vmem:[#allocation7 + $0x79c] sm:$0xf0]  ;;  %v5680_v36 = vor.u32 %v7382_v26, %v5679_v25 }
  0x67   : > { %v5135_v28 = vld [vmem:[#allocation7 + $0xc0] sm:$0xf]  ;;  %v6000_v32 = vor.u32 %v7462_v27, %v5999_v22 }
  0x68   : > { %v7246_v29 = vld [vmem:[#allocation7 + $0xdc] sm:$0xf0]  ;;  %3626 = vmatpush.bf16.msra.mxu2 %v5680_v36 }
  0x69   : > { %v5391_v31 = vld [vmem:[#allocation7 + $0x2c0] sm:$0xf]  ;;  %v5136_v37 = vor.u32 %v7246_v29, %v5135_v28  ;;  %3638 = vmatpush.bf16.msra.mxu3 %v6000_v32 }
  0x6a   : > { %v7310_v33 = vld [vmem:[#allocation7 + $0x2dc] sm:$0xf0] }
  0x6b   : > { %v5967_v34 = vld [vmem:[#allocation7 + $0x740] sm:$0xf]  ;;  %v5392_v43 = vor.u32 %v7310_v33, %v5391_v31  ;;  %3599 = vmatpush.bf16.msra.mxu0 %v5136_v37 }
  0x6c   : > { %v7454_v35 = vld [vmem:[#allocation7 + $0x75c] sm:$0xf0] }
  0x6d   : > { %v5647_v38 = vld [vmem:[#allocation7 + $0x4c0] sm:$0xf]  ;;  %v5968_v40 = vor.u32 %v7454_v35, %v5967_v34  ;;  %3613 = vmatpush.bf16.msra.mxu1 %v5392_v43  ;;  %v8449_v35 = vpack.c.bf16 %v8395_v1, %v8392_v0  ;;  %v8453_v43 = vpack.c.bf16 %v8420_v18, %v8417_v17 }
  0x6e   : > { %v7374_v39 = vld [vmem:[#allocation7 + $0x4dc] sm:$0xf0] }
  0x6f   : > { %v5103_v41 = vld [vmem:[#allocation7 + $0x80] sm:$0xf]  ;;  %v5648_v49 = vor.u32 %v7374_v39, %v5647_v38  ;;  %3639 = vmatpush.bf16.msra.mxu3 %v5968_v40 }
  0x70   : > { %v7238_v42 = vld [vmem:[#allocation7 + $0x9c] sm:$0xf0] }
  0x71   : > { %v5935_v44 = vld [vmem:[#allocation7 + $0x700] sm:$0xf]  ;;  %v5104_v50 = vor.u32 %v7238_v42, %v5103_v41  ;;  %3627 = vmatpush.bf16.msra.mxu2 %v5648_v49 }
  0x72   : > { %v5359_v45 = vld [vmem:[#allocation7 + $0x280] sm:$0xf] }
  0x73   : > { %v7302_v47 = vld [vmem:[#allocation7 + $0x29c] sm:$0xf0]  ;;  %3600 = vmatpush.bf16.msra.mxu0 %v5104_v50 }
  0x74   : > { %v7446_v48 = vld [vmem:[#allocation7 + $0x71c] sm:$0xf0]  ;;  %v5360_v56 = vor.u32 %v7302_v47, %v5359_v45 }
  0x75   : > { %v5071_v51 = vld [vmem:[#allocation7 + $0x40] sm:$0xf]  ;;  %v5936_v54 = vor.u32 %v7446_v48, %v5935_v44 }
  0x76   : > { %v5615_v52 = vld [vmem:[#allocation7 + $0x480] sm:$0xf]  ;;  %3614 = vmatpush.bf16.msra.mxu1 %v5360_v56 }
  0x77   : > { %v7366_v53 = vld [vmem:[#allocation7 + $0x49c] sm:$0xf0]  ;;  %3640 = vmatpush.bf16.msra.mxu3 %v5936_v54 }
  0x78   : > { %v7230_v55 = vld [vmem:[#allocation7 + $0x5c] sm:$0xf0]  ;;  %v5616_v62 = vor.u32 %v7366_v53, %v5615_v52 }
  0x79   : > { %v5903_v57 = vld [vmem:[#allocation7 + $0x6c0] sm:$0xf]  ;;  %v5072_v63 = vor.u32 %v7230_v55, %v5071_v51 }
  0x7a   : > { %v7438_v58 = vld [vmem:[#allocation7 + $0x6dc] sm:$0xf0]  ;;  %3628 = vmatpush.bf16.msra.mxu2 %v5616_v62 }
  0x7b   : > { %v5327_v59 = vld [vmem:[#allocation7 + $0x240] sm:$0xf]  ;;  %v5904_v5 = vor.u32 %v7438_v58, %v5903_v57  ;;  %3601 = vmatpush.bf16.msra.mxu0 %v5072_v63 }
  0x7c   : > { %v7294_v60 = vld [vmem:[#allocation7 + $0x25c] sm:$0xf0] }
  0x7d   : > { %v5039_v61 = vld [vmem:[#allocation7] sm:$0xf]  ;;  %v5328_v9 = vor.u32 %v7294_v60, %v5327_v59  ;;  %3641 = vmatpush.bf16.msra.mxu3 %v5904_v5 }
  0x7e   : > { %v7222_v2 = vld [vmem:[#allocation7 + $0x1c] sm:$0xf0] }
  0x7f   : > { %v5583_v3 = vld [vmem:[#allocation7 + $0x440] sm:$0xf]  ;;  %v5040_v21 = vor.u32 %v7222_v2, %v5039_v61  ;;  %3615 = vmatpush.bf16.msra.mxu1 %v5328_v9 }
  0x80   : > { %v7358_v4 = vld [vmem:[#allocation7 + $0x45c] sm:$0xf0] }
  0x81   : > { %v6287_v6 = vld [vmem:[#allocation7 + $0x9c0] sm:$0xf]  ;;  %v5584_v20 = vor.u32 %v7358_v4, %v5583_v3  ;;  %3602 = vmatpush.bf16.msra.mxu0 %v5040_v21 }
  0x82   : > { %v5871_v10 = vld [vmem:[#allocation7 + $0x680] sm:$0xf] }
  0x83   : > { %v7430_v12 = vld [vmem:[#allocation7 + $0x69c] sm:$0xf0]  ;;  %3629 = vmatpush.bf16.msra.mxu2 %v5584_v20 }
  0x84   : > { %v7534_v13 = vld [vmem:[#allocation7 + $0x9dc] sm:$0xf0]  ;;  %v5872_v25 = vor.u32 %v7430_v12, %v5871_v10  ;;  %3603 = vmatmul.bf16.vlgmr.msra.gmra.mxu0 %v8449_v35 }
  0x85   : > { %v5295_v14 = vld [vmem:[#allocation7 + $0x200] sm:$0xf]  ;;  %v6288_v27 = vor.u32 %v7534_v13, %v6287_v6 }
  0x86   : > { %v7286_v15 = vld [vmem:[#allocation7 + $0x21c] sm:$0xf0]  ;;  %3642 = vmatpush.bf16.msra.mxu3 %v5872_v25 }
  0x87   : > { %v6543_v16 = vld [vmem:[#allocation7 + $0xbc0] sm:$0xf]  ;;  %v5296_v28 = vor.u32 %v7286_v15, %v5295_v14  ;;  %3651 = vmatpush.bf16.msrb.mxu0 %v6288_v27 }
  0x88   : > { %v7598_v19 = vld [vmem:[#allocation7 + $0xbdc] sm:$0xf0] }
  0x89   : > { %v5551_v22 = vld [vmem:[#allocation7 + $0x400] sm:$0xf]  ;;  %v6544_v34 = vor.u32 %v7598_v19, %v6543_v16  ;;  %3616 = vmatpush.bf16.msra.mxu1 %v5296_v28 }
  0x8a   : > { %v7350_v24 = vld [vmem:[#allocation7 + $0x41c] sm:$0xf0] }
  0x8b   : > { %v6799_v26 = vld [vmem:[#allocation7 + $0xdc0] sm:$0xf]  ;;  %v5552_v38 = vor.u32 %v7350_v24, %v5551_v22 }
  0x8c   : > { %v7662_v29 = vld [vmem:[#allocation7 + $0xddc] sm:$0xf0]  ;;  %3617 = vmatmul.bf16.vlgmr.msra.gmra.mxu1 %v8453_v43 }
  0x8d   : > { %v5839_v30 = vld [vmem:[#allocation7 + $0x640] sm:$0xf]  ;;  %v6800_v40 = vor.u32 %v7662_v29, %v6799_v26  ;;  %3665 = vmatpush.bf16.msrb.mxu1 %v6544_v34  ;;  %3630 = vmatpush.bf16.msra.mxu2 %v5552_v38 }
  0x8e   : > { %v7422_v31 = vld [vmem:[#allocation7 + $0x65c] sm:$0xf0] }
  0x8f   : > { %v6255_v32 = vld [vmem:[#allocation7 + $0x980] sm:$0xf]  ;;  %v5840_v41 = vor.u32 %v7422_v31, %v5839_v30 }
  0x90   : > { %v7526_v33 = vld [vmem:[#allocation7 + $0x99c] sm:$0xf0] }
  0x91   : > { %v6511_v36 = vld [vmem:[#allocation7 + $0xb80] sm:$0xf]  ;;  %v6256_v44 = vor.u32 %v7526_v33, %v6255_v32  ;;  %3679 = vmatpush.bf16.msrb.mxu2 %v6800_v40  ;;  %3643 = vmatpush.bf16.msra.mxu3 %v5840_v41 }
  0x92   : > { %v7590_v37 = vld [vmem:[#allocation7 + $0xb9c] sm:$0xf0] }
  0x93   : > { %v6223_v39 = vld [vmem:[#allocation7 + $0x940] sm:$0xf]  ;;  %v6512_v48 = vor.u32 %v7590_v37, %v6511_v36  ;;  %3652 = vmatpush.bf16.msrb.mxu0 %v6256_v44 }
  0x94   : > { %v6767_v42 = vld [vmem:[#allocation7 + $0xd80] sm:$0xf] }
  0x95   : > { %v7654_v45 = vld [vmem:[#allocation7 + $0xd9c] sm:$0xf0]  ;;  %3666 = vmatpush.bf16.msrb.mxu1 %v6512_v48 }
  0x96   : > { %v5807_v0 = vld [vmem:[#allocation7 + $0x600] sm:$0xf]  ;;  %v6768_v17 = vor.u32 %v7654_v45, %v6767_v42 }
  0x97   : > { %v7414_v1 = vld [vmem:[#allocation7 + $0x61c] sm:$0xf0] }
  0x98   : > { %v7518_v47 = vld [vmem:[#allocation7 + $0x95c] sm:$0xf0]  ;;  %v5808_v18 = vor.u32 %v7414_v1, %v5807_v0  ;;  %3680 = vmatpush.bf16.msrb.mxu2 %v6768_v17 }
  0x99   : > { %v7055_v49 = vld [vmem:[#allocation7 + $0xfc0] sm:$0xf]  ;;  %v6224_v55 = vor.u32 %v7518_v47, %v6223_v39  ;;  %v7274_v47 = vld [vmem:[#allocation7 + $0x1c4] sm:$0xf] }
  0x9a   : > { %v7726_v50 = vld [vmem:[#allocation7 + $0xfdc] sm:$0xf0]  ;;  %3644 = vmatpush.bf16.msra.mxu3 %v5808_v18 }
  0x9b   : > { %v6479_v51 = vld [vmem:[#allocation7 + $0xb40] sm:$0xf]  ;;  %v7056_v57 = vor.u32 %v7726_v50, %v7055_v49  ;;  %3653 = vmatpush.bf16.msrb.mxu0 %v6224_v55  ;;  %v5265_v49 = vld [vmem:[#allocation7 + $0x1e0] sm:$0xf0] }
  0x9c   : > { %v7582_v52 = vld [vmem:[#allocation7 + $0xb5c] sm:$0xf0]  ;;  %v5268_v18 = vor.u32 %v7274_v47, %v5265_v49  ;;  %v7266_v55 = vld [vmem:[#allocation7 + $0x184] sm:$0xf] }
  0x9d   : > { %v6191_v53 = vld [vmem:[#allocation7 + $0x900] sm:$0xf]  ;;  %v6480_v59 = vor.u32 %v7582_v52, %v6479_v51  ;;  %v7338_v52 = vld [vmem:[#allocation7 + $0x3c4] sm:$0xf] }
  0x9e   : > { %v6735_v54 = vld [vmem:[#allocation7 + $0xd40] sm:$0xf]  ;;  %3693 = vmatpush.bf16.msrb.mxu3 %v7056_v57 }
  0x9f   : > { %v7646_v56 = vld [vmem:[#allocation7 + $0xd5c] sm:$0xf0]  ;;  %3667 = vmatpush.bf16.msrb.mxu1 %v6480_v59  ;;  %v5489_v59 = vld [vmem:[#allocation7 + $0x3a0] sm:$0xf0] }
  0xa0   : > { %v7510_v58 = vld [vmem:[#allocation7 + $0x91c] sm:$0xf0]  ;;  %v6736_v2 = vor.u32 %v7646_v56, %v6735_v54  ;;  %v5233_v56 = vld [vmem:[#allocation7 + $0x1a0] sm:$0xf0] }
  0xa1   : > { %v7023_v60 = vld [vmem:[#allocation7 + $0xf80] sm:$0xf]  ;;  %v6192_v3 = vor.u32 %v7510_v58, %v6191_v53  ;;  %v5521_v53 = vld [vmem:[#allocation7 + $0x3e0] sm:$0xf0] }
  0xa2   : > { %v7718_v61 = vld [vmem:[#allocation7 + $0xf9c] sm:$0xf0]  ;;  %3681 = vmatpush.bf16.msrb.mxu2 %v6736_v2  ;;  %v5524_v57 = vor.u32 %v7338_v52, %v5521_v53  ;;  %v7330_v58 = vld [vmem:[#allocation7 + $0x384] sm:$0xf] }
  0xa3   : > { %v6447_v62 = vld [vmem:[#allocation7 + $0xb00] sm:$0xf]  ;;  %v7024_v9 = vor.u32 %v7718_v61, %v7023_v60  ;;  %3654 = vmatpush.bf16.msrb.mxu0 %v6192_v3  ;;  %v5236_v60 = vor.u32 %v7266_v55, %v5233_v56  ;;  %v7258_v61 = vld [vmem:[#allocation7 + $0x144] sm:$0xf] }
  0xa4   : > { %v7574_v63 = vld [vmem:[#allocation7 + $0xb1c] sm:$0xf0]  ;;  %v7250_v3 = vld [vmem:[#allocation7 + $0x104] sm:$0xf] }
  0xa5   : > { %v6159_v4 = vld [vmem:[#allocation7 + $0x8c0] sm:$0xf]  ;;  %v6448_v12 = vor.u32 %v7574_v63, %v6447_v62  ;;  %3694 = vmatpush.bf16.msrb.mxu3 %v7024_v9  ;;  %v5201_v62 = vld [vmem:[#allocation7 + $0x160] sm:$0xf0]  ;;  %v5492_v63 = vor.u32 %v7330_v58, %v5489_v59 }
  0xa6   : > { %v6703_v5 = vld [vmem:[#allocation7 + $0xd00] sm:$0xf]  ;;  %v5204_v2 = vor.u32 %v7258_v61, %v5201_v62  ;;  %v7298_v52 = vld [vmem:[#allocation7 + $0x284] sm:$0xf] }
  0xa7   : > { %v7638_v6 = vld [vmem:[#allocation7 + $0xd1c] sm:$0xf0]  ;;  %3668 = vmatpush.bf16.msrb.mxu1 %v6448_v12  ;;  %v5361_v53 = vld [vmem:[#allocation7 + $0x2a0] sm:$0xf0] }
  0xa8   : > { %v7502_v10 = vld [vmem:[#allocation7 + $0x8dc] sm:$0xf0]  ;;  %v6704_v19 = vor.u32 %v7638_v6, %v6703_v5  ;;  %v7282_v56 = vld [vmem:[#allocation7 + $0x204] sm:$0xf] }
  0xa9   : > { %v6991_v13 = vld [vmem:[#allocation7 + $0xf40] sm:$0xf]  ;;  %v6160_v20 = vor.u32 %v7502_v10, %v6159_v4  ;;  %v5169_v4 = vld [vmem:[#allocation7 + $0x120] sm:$0xf0] }
  0xaa   : > { %v7710_v14 = vld [vmem:[#allocation7 + $0xf5c] sm:$0xf0]  ;;  %3682 = vmatpush.bf16.msrb.mxu2 %v6704_v19  ;;  %v5172_v5 = vor.u32 %v7250_v3, %v5169_v4  ;;  %v7594_v58 = vld [vmem:[#allocation7 + $0xbc4] sm:$0xf] }
  0xab   : > { %v6415_v15 = vld [vmem:[#allocation7 + $0xac0] sm:$0xf]  ;;  %v6992_v25 = vor.u32 %v7710_v14, %v6991_v13  ;;  %3655 = vmatpush.bf16.msrb.mxu0 %v6160_v20  ;;  %v7242_v14 = vld [vmem:[#allocation7 + $0xc4] sm:$0xf] }
  0xac   : > { %v7566_v16 = vld [vmem:[#allocation7 + $0xadc] sm:$0xf0]  ;;  %v7322_v20 = vld [vmem:[#allocation7 + $0x344] sm:$0xf] }
  0xad   : > { %v6127_v21 = vld [vmem:[#allocation7 + $0x880] sm:$0xf]  ;;  %v6416_v27 = vor.u32 %v7566_v16, %v6415_v15  ;;  %3695 = vmatpush.bf16.msrb.mxu3 %v6992_v25  ;;  %v5137_v15 = vld [vmem:[#allocation7 + $0xe0] sm:$0xf0] }
  0xae   : > { %v6671_v22 = vld [vmem:[#allocation7 + $0xcc0] sm:$0xf]  ;;  %v5140_v19 = vor.u32 %v7242_v14, %v5137_v15  ;;  %v7586_v62 = vld [vmem:[#allocation7 + $0xb84] sm:$0xf] }
  0xaf   : > { %v7630_v24 = vld [vmem:[#allocation7 + $0xcdc] sm:$0xf0]  ;;  %3669 = vmatpush.bf16.msrb.mxu1 %v6416_v27  ;;  %v7578_v3 = vld [vmem:[#allocation7 + $0xb44] sm:$0xf] }
  0xb0   : > { %v7494_v26 = vld [vmem:[#allocation7 + $0x89c] sm:$0xf0]  ;;  %v6672_v32 = vor.u32 %v7630_v24, %v6671_v22  ;;  %v6481_v4 = vld [vmem:[#allocation7 + $0xb60] sm:$0xf0] }
  0xb1   : > { %v6959_v28 = vld [vmem:[#allocation7 + $0xf00] sm:$0xf]  ;;  %v6128_v33 = vor.u32 %v7494_v26, %v6127_v21  ;;  %v5457_v21 = vld [vmem:[#allocation7 + $0x360] sm:$0xf0] }
  0xb2   : > { %v7702_v29 = vld [vmem:[#allocation7 + $0xf1c] sm:$0xf0]  ;;  %3683 = vmatpush.bf16.msrb.mxu2 %v6672_v32  ;;  %v5460_v22 = vor.u32 %v7322_v20, %v5457_v21  ;;  %v6449_v20 = vld [vmem:[#allocation7 + $0xb20] sm:$0xf0] }
  0xb3   : > { %v6383_v30 = vld [vmem:[#allocation7 + $0xa80] sm:$0xf]  ;;  %v6960_v37 = vor.u32 %v7702_v29, %v6959_v28  ;;  %3656 = vmatpush.bf16.msrb.mxu0 %v6128_v33  ;;  %v7234_v29 = vld [vmem:[#allocation7 + $0x84] sm:$0xf] }
  0xb4   : > { %v7558_v31 = vld [vmem:[#allocation7 + $0xa9c] sm:$0xf0]  ;;  %v7314_v33 = vld [vmem:[#allocation7 + $0x304] sm:$0xf] }
  0xb5   : > { %v6639_v34 = vld [vmem:[#allocation7 + $0xc80] sm:$0xf]  ;;  %v6384_v40 = vor.u32 %v7558_v31, %v6383_v30  ;;  %3696 = vmatpush.bf16.msrb.mxu3 %v6960_v37  ;;  %v5105_v30 = vld [vmem:[#allocation7 + $0xa0] sm:$0xf0] }
  0xb6   : > { %v7622_v36 = vld [vmem:[#allocation7 + $0xc9c] sm:$0xf0]  ;;  %v5108_v32 = vor.u32 %v7234_v29, %v5105_v30  ;;  %v7466_v29 = vld [vmem:[#allocation7 + $0x7c4] sm:$0xf] }
  0xb7   : > { %v6095_v38 = vld [vmem:[#allocation7 + $0x840] sm:$0xf]  ;;  %v6640_v44 = vor.u32 %v7622_v36, %v6639_v34  ;;  %3670 = vmatpush.bf16.msrb.mxu1 %v6384_v40  ;;  %v5425_v34 = vld [vmem:[#allocation7 + $0x320] sm:$0xf0] }
  0xb8   : > { %v7486_v39 = vld [vmem:[#allocation7 + $0x85c] sm:$0xf0]  ;;  %v5428_v36 = vor.u32 %v7314_v33, %v5425_v34  ;;  %v6033_v33 = vld [vmem:[#allocation7 + $0x7e0] sm:$0xf0] }
  0xb9   : > { %v6351_v41 = vld [vmem:[#allocation7 + $0xa40] sm:$0xf]  ;;  %v6096_v45 = vor.u32 %v7486_v39, %v6095_v38  ;;  %3684 = vmatpush.bf16.msrb.mxu2 %v6640_v44  ;;  %v7226_v39 = vld [vmem:[#allocation7 + $0x44] sm:$0xf] }
  0xba   : > { %v7550_v42 = vld [vmem:[#allocation7 + $0xa5c] sm:$0xf0]  ;;  %v7306_v44 = vld [vmem:[#allocation7 + $0x2c4] sm:$0xf] }
  0xbb   : > { %v6063_v0 = vld [vmem:[#allocation7 + $0x800] sm:$0xf]  ;;  %v6352_v48 = vor.u32 %v7550_v42, %v6351_v41  ;;  %3657 = vmatpush.bf16.msrb.mxu0 %v6096_v45  ;;  %v5073_v41 = vld [vmem:[#allocation7 + $0x60] sm:$0xf0] }
  0xbc   : > { %v7478_v1 = vld [vmem:[#allocation7 + $0x81c] sm:$0xf0]  ;;  %v5076_v42 = vor.u32 %v7226_v39, %v5073_v41  ;;  %v5393_v45 = vld [vmem:[#allocation7 + $0x2e0] sm:$0xf0] }
  0xbd   : > { %v6319_v50 = vld [vmem:[#allocation7 + $0xa00] sm:$0xf]  ;;  %v6064_v17 = vor.u32 %v7478_v1, %v6063_v0  ;;  %3671 = vmatpush.bf16.msrb.mxu1 %v6352_v48  ;;  %v5396_v0 = vor.u32 %v7306_v44, %v5393_v45  ;;  %v7218_v48 = vld [vmem:[#allocation7 + $0x4] sm:$0xf]  ;;  %v6036_v45 = vor.u32 %v7466_v29, %v6033_v33 }
  0xbe   : > { %v7542_v51 = vld [vmem:[#allocation7 + $0xa1c] sm:$0xf0]  ;;  %v7562_v34 = vld [vmem:[#allocation7 + $0xac4] sm:$0xf] }
  0xbf   : > { %v6320_v54 = vor.u32 %v7542_v51, %v6319_v50  ;;  %3658 = vmatpush.bf16.msrb.mxu0 %v6064_v17  ;;  %v6607_v6 = vld [vmem:[#allocation7 + $0xc40] sm:$0xf]  ;;  %v5041_v50 = vld [vmem:[#allocation7 + $0x20] sm:$0xf0]  ;;  %v5364_v17 = vor.u32 %v7298_v52, %v5361_v53 }
  0xc0   : > { %v7614_v9 = vld [vmem:[#allocation7 + $0xc5c] sm:$0xf0]  ;;  %v5044_v51 = vor.u32 %v7218_v48, %v5041_v50  ;;  %v7530_v41 = vld [vmem:[#allocation7 + $0x9c4] sm:$0xf] }
  0xc1   : > { %3672 = vmatpush.bf16.msrb.mxu1 %v6320_v54  ;;  %v6927_v10 = vld [vmem:[#allocation7 + $0xec0] sm:$0xf]  ;;  %v6608_v12 = vor.u32 %v7614_v9, %v6607_v6  ;;  %v5329_v54 = vld [vmem:[#allocation7 + $0x260] sm:$0xf0] }
  0xc2   : > { %v7694_v13 = vld [vmem:[#allocation7 + $0xedc] sm:$0xf0]  ;;  %v7402_v6 = vld [vmem:[#allocation7 + $0x5c4] sm:$0xf] }
  0xc3   : > { %3707 = vmatpush.bf16.msra.mxu0 %v5268_v18  ;;  %v6928_v16 = vor.u32 %v7694_v13, %v6927_v10  ;;  %3685 = vmatpush.bf16.msrb.mxu2 %v6608_v12  ;;  %v6575_v24 = vld [vmem:[#allocation7 + $0xc00] sm:$0xf]  ;;  %v7290_v18 = vld [vmem:[#allocation7 + $0x244] sm:$0xf]  ;;  %v6484_v10 = vor.u32 %v7578_v3, %v6481_v4 }
  0xc4   : > { %3673 = vmatmul.bf16.vlgmr.msrb.gmra.mxu1 %v8425_v23  ;;  %v7606_v25 = vld [vmem:[#allocation7 + $0xc1c] sm:$0xf0]  ;;  %v5332_v55 = vor.u32 %v7290_v18, %v5329_v54  ;;  %v5777_v9 = vld [vmem:[#allocation7 + $0x5e0] sm:$0xf0] }
  0xc5   : > { %3721 = vmatpush.bf16.msra.mxu1 %v5524_v57  ;;  %3697 = vmatpush.bf16.msrb.mxu3 %v6928_v16  ;;  %v6895_v26 = vld [vmem:[#allocation7 + $0xe80] sm:$0xf]  ;;  %v6576_v27 = vor.u32 %v7606_v25, %v6575_v24  ;;  %v5297_v57 = vld [vmem:[#allocation7 + $0x220] sm:$0xf0]  ;;  %v5780_v16 = vor.u32 %v7402_v6, %v5777_v9 }
  0xc6   : > { %v7686_v28 = vld [vmem:[#allocation7 + $0xe9c] sm:$0xf0]  ;;  %v5300_v59 = vor.u32 %v7282_v56, %v5297_v57  ;;  %v7394_v24 = vld [vmem:[#allocation7 + $0x584] sm:$0xf]  ;;  %v484_v56 = vrot.slane %v8402_v7, 2 }
  0xc7   : > { %3708 = vmatpush.bf16.msra.mxu0 %v5236_v60  ;;  %v6896_v31 = vor.u32 %v7686_v28, %v6895_v26  ;;  %3686 = vmatpush.bf16.msrb.mxu2 %v6576_v27  ;;  %v6863_v37 = vld [vmem:[#allocation7 + $0xe40] sm:$0xf]  ;;  %v6545_v60 = vld [vmem:[#allocation7 + $0xbe0] sm:$0xf0] }
  0xc8   : > { %v7678_v38 = vld [vmem:[#allocation7 + $0xe5c] sm:$0xf0]  ;;  %v6548_v61 = vor.u32 %v7594_v58, %v6545_v60  ;;  %v5745_v25 = vld [vmem:[#allocation7 + $0x5a0] sm:$0xf0]  ;;  %v485_v60 = vrot.slane %v8405_v8, 2 }
  0xc9   : > { %3722 = vmatpush.bf16.msra.mxu1 %v5492_v63  ;;  %3698 = vmatpush.bf16.msrb.mxu3 %v6896_v31  ;;  %v6864_v40 = vor.u32 %v7678_v38, %v6863_v37  ;;  %v6831_v1 = vld [vmem:[#allocation7 + $0xe00] sm:$0xf]  ;;  %v6513_v63 = vld [vmem:[#allocation7 + $0xba0] sm:$0xf0] }
  0xca   : > { %v7670_v47 = vld [vmem:[#allocation7 + $0xe1c] sm:$0xf0]  ;;  %v7386_v27 = vld [vmem:[#allocation7 + $0x544] sm:$0xf] }
  0xcb   : > { %3709 = vmatpush.bf16.msra.mxu0 %v5204_v2  ;;  %v6832_v49 = vor.u32 %v7670_v47, %v6831_v1  ;;  %v6516_v2 = vor.u32 %v7586_v62, %v6513_v63  ;;  %v5713_v28 = vld [vmem:[#allocation7 + $0x560] sm:$0xf0] }
  0xcc   : > { %v5716_v44 = vor.u32 %v7386_v27, %v5713_v28  ;;  %v5681_v50 = vld [vmem:[#allocation7 + $0x520] sm:$0xf0]  ;;  %v486_v27 = vsel %vm477_vm1, %v484_v56, %v485_v60 }
  0xcd   : > { %3723 = vmatpush.bf16.msra.mxu1 %v5460_v22  ;;  %3699 = vmatpush.bf16.msrb.mxu3 %v6864_v40  ;;  %v7897_v22 = vpop.permute.xlu1 %7896  ;;  %v6001_v18 = vld [vmem:[#allocation7 + $0x7a0] sm:$0xf0] }
  0xce   : > { %v7899_v30 = vunpack.i.h.bf16 %v7897_v22  ;;  %v7898_v31 = vunpack.i.l.bf16 %v7897_v22  ;;  %v7554_v54 = vld [vmem:[#allocation7 + $0xa84] sm:$0xf] }
  0xcf   : > { %3710 = vmatpush.bf16.msra.mxu0 %v5172_v5  ;;  %v7887_v5 = vpop.permute.xlu0 %7886  ;;  %v7522_v57 = vld [vmem:[#allocation7 + $0x984] sm:$0xf] }
  0xd0   : > { %v7889_v12 = vunpack.i.h.bf16 %v7887_v5  ;;  %v7888_v13 = vunpack.i.l.bf16 %v7887_v5  ;;  %v6257_v58 = vld [vmem:[#allocation7 + $0x9a0] sm:$0xf0] }
  0xd1   : > { %3724 = vmatpush.bf16.msra.mxu1 %v5428_v36  ;;  %3700 = vmatpush.bf16.msrb.mxu3 %v6832_v49  ;;  %v6417_v36 = vld [vmem:[#allocation7 + $0xae0] sm:$0xf0]  ;;  %v6260_v6 = vor.u32 %v7522_v57, %v6257_v58 }
  0xd2   : > { %v512_v14 = vsel %vm466_vm3, %v8405_v8, %v7889_v12  ;;  %v511_v15 = vsel %vm466_vm3, %v8402_v7, %v7888_v13  ;;  %v6420_v38 = vor.u32 %v7562_v34, %v6417_v36  ;;  %v7378_v49 = vld [vmem:[#allocation7 + $0x504] sm:$0xf] }
  0xd3   : > { %3711 = vmatpush.bf16.msra.mxu0 %v5140_v19  ;;  %v7570_v19 = vld [vmem:[#allocation7 + $0xb04] sm:$0xf]  ;;  %v8463_v21 = vpack.c.bf16 %v512_v14, %v511_v15 }
  0xd4   : > { %v6452_v26 = vor.u32 %v7570_v19, %v6449_v20  ;;  %v7370_v62 = vld [vmem:[#allocation7 + $0x4c4] sm:$0xf] }
  0xd5   : > { %3725 = vmatpush.bf16.msra.mxu1 %v5396_v0  ;;  %3631 = vmatmul.bf16.vlgmr.msra.gmra.mxu2 %v8463_v21  ;;  %v5649_v63 = vld [vmem:[#allocation7 + $0x4e0] sm:$0xf0] }
  0xd6   : > { %3735 = vmatpush.bf16.msra.mxu2 %v5780_v16  ;;  %v7450_v4 = vld [vmem:[#allocation7 + $0x744] sm:$0xf] }
  0xd7   : > { %3712 = vmatpush.bf16.msra.mxu0 %v5108_v32  ;;  %v5748_v32 = vor.u32 %v7394_v24, %v5745_v25  ;;  %v7892_v37 = vpop.permute.xlu0 %7891  ;;  %v5969_v5 = vld [vmem:[#allocation7 + $0x760] sm:$0xf0] }
  0xd8   : > { %v7894_v39 = vunpack.i.h.bf16 %v7892_v37  ;;  %v7893_v40 = vunpack.i.l.bf16 %v7892_v37  ;;  %v7514_v7 = vld [vmem:[#allocation7 + $0x944] sm:$0xf]  ;;  %v5972_v16 = vor.u32 %v7450_v4, %v5969_v5 }
  0xd9   : > { %3726 = vmatpush.bf16.msra.mxu1 %v5364_v17  ;;  %v6225_v9 = vld [vmem:[#allocation7 + $0x960] sm:$0xf0] }
  0xda   : > { %v470_v0 = vsel %vm466_vm3, %v7894_v39, %v7899_v30  ;;  %v467_v1 = vsel %vm466_vm3, %v7888_v13, %v7893_v40  ;;  %v468_v47 = vsel %vm466_vm3, %v7893_v40, %v7898_v31  ;;  %v469_v48 = vsel %vm466_vm3, %v7889_v12, %v7894_v39  ;;  %3736 = vmatpush.bf16.msra.mxu2 %v5748_v32  ;;  %v7546_v8 = vld [vmem:[#allocation7 + $0xa44] sm:$0xf]  ;;  %v5527_v31 = vld [vmem:[#allocation7 + $0x3c8] sm:$0xf] }
  0xdb   : > { %3713 = vmatpush.bf16.msra.mxu0 %v5076_v42  ;;  %v6289_v42 = vld [vmem:[#allocation7 + $0x9e0] sm:$0xf0]  ;;  %v8470_v52 = vpack.c.bf16 %v469_v48, %v467_v1  ;;  %v8472_v53 = vpack.c.bf16 %v470_v0, %v468_v47  ;;  %v5652_v13 = vor.u32 %v7370_v62, %v5649_v63  ;;  %v6228_v19 = vor.u32 %v7514_v7, %v6225_v9  ;;  %v7343_v32 = vld [vmem:[#allocation7 + $0x3e4] sm:$0xf0] }
  0xdc   : > { %v6292_v17 = vor.u32 %v7530_v41, %v6289_v42  ;;  %v7362_v14 = vld [vmem:[#allocation7 + $0x484] sm:$0xf]  ;;  %v5528_v36 = vor.u32 %v7343_v32, %v5527_v31  ;;  %v5495_v1 = vld [vmem:[#allocation7 + $0x388] sm:$0xf] }
  0xdd   : > { %3727 = vmatpush.bf16.msra.mxu1 %v5332_v55  ;;  %v6385_v55 = vld [vmem:[#allocation7 + $0xaa0] sm:$0xf0]  ;;  %3645 = vmatmul.bf16.vlgmr.msra.gmra.mxu3 %v8470_v52  ;;  %v7335_v47 = vld [vmem:[#allocation7 + $0x3a4] sm:$0xf0] }
  0xde   : > { %3659 = vmatmul.bf16.vlgmr.msrb.gmra.mxu0 %v8472_v53  ;;  %3737 = vmatpush.bf16.msra.mxu2 %v5716_v44  ;;  %v5617_v15 = vld [vmem:[#allocation7 + $0x4a0] sm:$0xf0] }
  0xdf   : > { %3714 = vmatpush.bf16.msra.mxu0 %v5044_v51  ;;  %v7458_v51 = vld [vmem:[#allocation7 + $0x784] sm:$0xf]  ;;  %3749 = vmatpush.bf16.msra.mxu3 %v6036_v45  ;;  %v5620_v37 = vor.u32 %v7362_v14, %v5617_v15 }
  0xe0   : > { %v6004_v3 = vor.u32 %v7458_v51, %v6001_v18  ;;  %v7442_v24 = vld [vmem:[#allocation7 + $0x704] sm:$0xf] }
  0xe1   : > { %3728 = vmatpush.bf16.msra.mxu1 %v5300_v59  ;;  %v6388_v59 = vor.u32 %v7554_v54, %v6385_v55  ;;  %v7538_v25 = vld [vmem:[#allocation7 + $0xa04] sm:$0xf] }
  0xe2   : > { %v5937_v29 = vld [vmem:[#allocation7 + $0x720] sm:$0xf0] }
  0xe3   : > { %3763 = vmatpush.bf16.msrb.mxu0 %v6292_v17  ;;  %3750 = vmatpush.bf16.msra.mxu3 %v6004_v3  ;;  %v7506_v33 = vld [vmem:[#allocation7 + $0x904] sm:$0xf]  ;;  %v5940_v40 = vor.u32 %v7442_v24, %v5937_v29  ;;  %v7311_v29 = vld [vmem:[#allocation7 + $0x2e4] sm:$0xf0] }
  0xe4   : > { %3729 = vmatmul.bf16.vlgmr.msra.gmra.mxu1 %v8453_v43  ;;  %v6193_v34 = vld [vmem:[#allocation7 + $0x920] sm:$0xf0] }
  0xe5   : > { %3777 = vmatpush.bf16.msrb.mxu1 %v6548_v61  ;;  %v491_v61 = vrot.slane %v8409_v11, 2  ;;  %v6353_v11 = vld [vmem:[#allocation7 + $0xa60] sm:$0xf0]  ;;  %3687 = vmatmul.bf16.vlgmr.msrb.gmra.mxu2 %v8441_v46  ;;  %v6196_v45 = vor.u32 %v7506_v33, %v6193_v34 }
  0xe6   : > { %v6356_v12 = vor.u32 %v7546_v8, %v6353_v11  ;;  %v7354_v41 = vld [vmem:[#allocation7 + $0x444] sm:$0xf]  ;;  %v5431_v11 = vld [vmem:[#allocation7 + $0x308] sm:$0xf] }
  0xe7   : > { %3764 = vmatpush.bf16.msrb.mxu0 %v6260_v6  ;;  %v492_v28 = vsel %vm477_vm1, %v485_v60, %v491_v61  ;;  %3751 = vmatpush.bf16.msra.mxu3 %v5972_v16  ;;  %v5585_v42 = vld [vmem:[#allocation7 + $0x460] sm:$0xf0]  ;;  %v5463_v60 = vld [vmem:[#allocation7 + $0x348] sm:$0xf] }
  0xe8   : > { %v7434_v44 = vld [vmem:[#allocation7 + $0x6c4] sm:$0xf]  ;;  %v5588_v18 = vor.u32 %v7354_v41, %v5585_v42  ;;  %v7327_v61 = vld [vmem:[#allocation7 + $0x364] sm:$0xf0] }
  0xe9   : > { %3778 = vmatpush.bf16.msrb.mxu1 %v6516_v2  ;;  %v5684_v2 = vor.u32 %v7378_v49, %v5681_v50  ;;  %v5905_v0 = vld [vmem:[#allocation7 + $0x6e0] sm:$0xf0]  ;;  %v5496_v50 = vor.u32 %v7335_v47, %v5495_v1  ;;  %v5464_v3 = vor.u32 %v7327_v61, %v5463_v60  ;;  %v5367_v1 = vld [vmem:[#allocation7 + $0x288] sm:$0xf] }
  0xea   : > { %v7498_v48 = vld [vmem:[#allocation7 + $0x8c4] sm:$0xf]  ;;  %v5908_v54 = vor.u32 %v7434_v44, %v5905_v0  ;;  %v7303_v47 = vld [vmem:[#allocation7 + $0x2a4] sm:$0xf0] }
  0xeb   : > { %3738 = vmatpush.bf16.msra.mxu2 %v5684_v2  ;;  %3765 = vmatpush.bf16.msrb.mxu0 %v6228_v19  ;;  %v6161_v49 = vld [vmem:[#allocation7 + $0x8e0] sm:$0xf0]  ;;  %v5207_v60 = vld [vmem:[#allocation7 + $0x148] sm:$0xf] }
  0xec   : > { %v7346_v17 = vld [vmem:[#allocation7 + $0x404] sm:$0xf]  ;;  %3752 = vmatpush.bf16.msra.mxu3 %v5940_v40  ;;  %v6164_v58 = vor.u32 %v7498_v48, %v6161_v49  ;;  %v5239_v49 = vld [vmem:[#allocation7 + $0x188] sm:$0xf] }
  0xed   : > { %3779 = vmatpush.bf16.msrb.mxu1 %v6484_v10  ;;  %v7902_v10 = vpop.permute.xlu1 %7901  ;;  %v5553_v55 = vld [vmem:[#allocation7 + $0x420] sm:$0xf0]  ;;  %v7263_v61 = vld [vmem:[#allocation7 + $0x164] sm:$0xf0] }
  0xee   : > { %v7904_v20 = vunpack.i.h.bf16 %v7902_v10  ;;  %v7903_v22 = vunpack.i.l.bf16 %v7902_v10  ;;  %v7426_v56 = vld [vmem:[#allocation7 + $0x684] sm:$0xf]  ;;  %3715 = vmatmul.bf16.vlgmr.msra.gmra.mxu0 %v8449_v35  ;;  %v5556_v4 = vor.u32 %v7346_v17, %v5553_v55  ;;  %v5368_v17 = vor.u32 %v7303_v47, %v5367_v1  ;;  %v5783_v1 = vld [vmem:[#allocation7 + $0x5c8] sm:$0xf] }
  0xef   : > { %3739 = vmatpush.bf16.msra.mxu2 %v5652_v13  ;;  %v5873_v57 = vld [vmem:[#allocation7 + $0x6a0] sm:$0xf0]  ;;  %3766 = vmatpush.bf16.msrb.mxu0 %v6196_v45  ;;  %v7407_v47 = vld [vmem:[#allocation7 + $0x5e4] sm:$0xf0] }
  0xf0   : > { %v513_v39 = vsel %vm466_vm3, %v486_v27, %v7903_v22  ;;  %v6129_v62 = vld [vmem:[#allocation7 + $0x8a0] sm:$0xf0]  ;;  %3753 = vmatpush.bf16.msra.mxu3 %v5908_v54  ;;  %v5876_v5 = vor.u32 %v7426_v56, %v5873_v57 }
  0xf1   : > { %3780 = vmatpush.bf16.msrb.mxu1 %v6452_v26  ;;  %v6321_v26 = vld [vmem:[#allocation7 + $0xa20] sm:$0xf0] }
  0xf2   : > { %v6324_v30 = vor.u32 %v7538_v25, %v6321_v26  ;;  %v7658_v63 = vld [vmem:[#allocation7 + $0xdc4] sm:$0xf] }
  0xf3   : > { %3740 = vmatpush.bf16.msra.mxu2 %v5620_v37  ;;  %v6801_v2 = vld [vmem:[#allocation7 + $0xde0] sm:$0xf0]  ;;  %3767 = vmatpush.bf16.msrb.mxu0 %v6164_v58  ;;  %v7279_v37 = vld [vmem:[#allocation7 + $0x1e4] sm:$0xf0] }
  0xf4   : > { %v7418_v7 = vld [vmem:[#allocation7 + $0x644] sm:$0xf]  ;;  %v6804_v10 = vor.u32 %v7658_v63, %v6801_v2  ;;  %3754 = vmatpush.bf16.msra.mxu3 %v5876_v5  ;;  %v7295_v63 = vld [vmem:[#allocation7 + $0x264] sm:$0xf0] }
  0xf5   : > { %3781 = vmatpush.bf16.msrb.mxu1 %v6420_v38  ;;  %v514_v38 = vsel %vm466_vm3, %v492_v28, %v7904_v20  ;;  %v5841_v6 = vld [vmem:[#allocation7 + $0x660] sm:$0xf0]  ;;  %v5399_v28 = vld [vmem:[#allocation7 + $0x2c8] sm:$0xf] }
  0xf6   : > { %v8484_v51 = vpack.c.bf16 %v514_v38, %v513_v39  ;;  %v7482_v8 = vld [vmem:[#allocation7 + $0x844] sm:$0xf]  ;;  %v5844_v19 = vor.u32 %v7418_v7, %v5841_v6  ;;  %v5400_v33 = vor.u32 %v7311_v29, %v5399_v28  ;;  %v5143_v29 = vld [vmem:[#allocation7 + $0xc8] sm:$0xf] }
  0xf7   : > { %3741 = vmatpush.bf16.msra.mxu2 %v5588_v18  ;;  %v6097_v13 = vld [vmem:[#allocation7 + $0x860] sm:$0xf0] }
  0xf8   : > { %3701 = vmatmul.bf16.vlgmr.msrb.gmra.mxu3 %v8484_v51  ;;  %v7650_v14 = vld [vmem:[#allocation7 + $0xd84] sm:$0xf]  ;;  %v6100_v25 = vor.u32 %v7482_v8, %v6097_v13  ;;  %v5175_v8 = vld [vmem:[#allocation7 + $0x108] sm:$0xf] }
  0xf9   : > { %3782 = vmatpush.bf16.msrb.mxu1 %v6388_v59  ;;  %v7490_v59 = vld [vmem:[#allocation7 + $0x884] sm:$0xf]  ;;  %3755 = vmatpush.bf16.msra.mxu3 %v5844_v19  ;;  %v7255_v13 = vld [vmem:[#allocation7 + $0x124] sm:$0xf0] }
  0xfa   : > { %v6132_v9 = vor.u32 %v7490_v59, %v6129_v62  ;;  %v6769_v15 = vld [vmem:[#allocation7 + $0xda0] sm:$0xf0]  ;;  %v5335_v62 = vld [vmem:[#allocation7 + $0x248] sm:$0xf] }
  0xfb   : > { %3742 = vmatpush.bf16.msra.mxu2 %v5556_v4  ;;  %v7410_v20 = vld [vmem:[#allocation7 + $0x604] sm:$0xf]  ;;  %v6772_v26 = vor.u32 %v7650_v14, %v6769_v15  ;;  %v6551_v15 = vld [vmem:[#allocation7 + $0xbc8] sm:$0xf] }
  0xfc   : > { %v5809_v22 = vld [vmem:[#allocation7 + $0x620] sm:$0xf0]  ;;  %3768 = vmatpush.bf16.msrb.mxu0 %v6132_v9 }
  0xfd   : > { %3783 = vmatpush.bf16.msrb.mxu1 %v6356_v12  ;;  %v7319_v12 = vld [vmem:[#allocation7 + $0x324] sm:$0xf0]  ;;  %v7474_v24 = vld [vmem:[#allocation7 + $0x804] sm:$0xf]  ;;  %v5812_v38 = vor.u32 %v7410_v20, %v5809_v22 }
  0xfe   : > { %v5432_v16 = vor.u32 %v7319_v12, %v5431_v11  ;;  %v6065_v27 = vld [vmem:[#allocation7 + $0x820] sm:$0xf0]  ;;  %3743 = vmatmul.bf16.vlgmr.msra.gmra.mxu2 %v8463_v21  ;;  %v5303_v11 = vld [vmem:[#allocation7 + $0x208] sm:$0xf] }
  0xff   : > { %3791 = vmatpush.bf16.msrb.mxu2 %v6804_v10  ;;  %v6737_v31 = vld [vmem:[#allocation7 + $0xd60] sm:$0xf0]  ;;  %v6068_v39 = vor.u32 %v7474_v24, %v6065_v27  ;;  %3756 = vmatpush.bf16.msra.mxu3 %v5812_v38  ;;  %v5208_v10 = vor.u32 %v7263_v61, %v5207_v60  ;;  %v7287_v12 = vld [vmem:[#allocation7 + $0x224] sm:$0xf0] }
 0x100   : > { %v7722_v32 = vld [vmem:[#allocation7 + $0xfc4] sm:$0xf]  ;;  %3769 = vmatpush.bf16.msrb.mxu0 %v6100_v25  ;;  %v5304_v14 = vor.u32 %v7287_v12, %v5303_v11  ;;  %v5751_v60 = vld [vmem:[#allocation7 + $0x588] sm:$0xf] }
 0x101   : > { %3784 = vmatpush.bf16.msrb.mxu1 %v6324_v30  ;;  %v7642_v30 = vld [vmem:[#allocation7 + $0xd44] sm:$0xf]  ;;  %v7399_v61 = vld [vmem:[#allocation7 + $0x5a4] sm:$0xf0] }
 0x102   : > { %v7057_v34 = vld [vmem:[#allocation7 + $0xfe0] sm:$0xf0]  ;;  %v6740_v40 = vor.u32 %v7642_v30, %v6737_v31  ;;  %v7247_v30 = vld [vmem:[#allocation7 + $0xe4] sm:$0xf0] }
 0x103   : > { %3792 = vmatpush.bf16.msrb.mxu2 %v6772_v26  ;;  %v7634_v41 = vld [vmem:[#allocation7 + $0xd04] sm:$0xf]  ;;  %v7060_v44 = vor.u32 %v7722_v32, %v7057_v34  ;;  %v5176_v26 = vor.u32 %v7255_v13, %v5175_v8  ;;  %v6519_v31 = vld [vmem:[#allocation7 + $0xb88] sm:$0xf] }
 0x104   : > { %3785 = vmatmul.bf16.vlgmr.msrb.gmra.mxu1 %v8425_v23  ;;  %v6705_v42 = vld [vmem:[#allocation7 + $0xd20] sm:$0xf0]  ;;  %3770 = vmatpush.bf16.msrb.mxu0 %v6068_v39  ;;  %v7591_v32 = vld [vmem:[#allocation7 + $0xba4] sm:$0xf0]  ;;  %v5144_v39 = vor.u32 %v7247_v30, %v5143_v29 }
 0x105   : > { %3833 = vmatpush.bf16.msra.mxu1 %v5528_v36  ;;  %v5271_v36 = vld [vmem:[#allocation7 + $0x1c8] sm:$0xf]  ;;  %v7714_v0 = vld [vmem:[#allocation7 + $0xf84] sm:$0xf]  ;;  %v6708_v18 = vor.u32 %v7634_v41, %v6705_v42  ;;  %3805 = vmatpush.bf16.msrb.mxu3 %v7060_v44 }
 0x106   : > { %v5272_v45 = vor.u32 %v7279_v37, %v5271_v36  ;;  %v7025_v48 = vld [vmem:[#allocation7 + $0xfa0] sm:$0xf0]  ;;  %v5111_v42 = vld [vmem:[#allocation7 + $0x88] sm:$0xf] }
 0x107   : > { %3793 = vmatpush.bf16.msrb.mxu2 %v6740_v40  ;;  %v7626_v54 = vld [vmem:[#allocation7 + $0xcc4] sm:$0xf]  ;;  %v7028_v56 = vor.u32 %v7714_v0, %v7025_v48  ;;  %3771 = vmatmul.bf16.vlgmr.msrb.gmra.mxu0 %v8472_v53  ;;  %v7239_v44 = vld [vmem:[#allocation7 + $0xa4] sm:$0xf0] }
 0x108   : > { %v6673_v55 = vld [vmem:[#allocation7 + $0xce0] sm:$0xf0]  ;;  %3819 = vmatpush.bf16.msra.mxu0 %v5272_v45  ;;  %3757 = vmatmul.bf16.vlgmr.msra.gmra.mxu3 %v8470_v52  ;;  %v6487_v45 = vld [vmem:[#allocation7 + $0xb48] sm:$0xf] }
 0x109   : > { %3834 = vmatpush.bf16.msra.mxu1 %v5496_v50  ;;  %v7271_v50 = vld [vmem:[#allocation7 + $0x1a4] sm:$0xf0]  ;;  %v7706_v58 = vld [vmem:[#allocation7 + $0xf44] sm:$0xf]  ;;  %v6676_v4 = vor.u32 %v7626_v54, %v6673_v55  ;;  %3806 = vmatpush.bf16.msrb.mxu3 %v7028_v56  ;;  %v5784_v56 = vor.u32 %v7407_v47, %v5783_v1 }
 0x10a   : > { %v5240_v57 = vor.u32 %v7271_v50, %v5239_v49  ;;  %v6993_v59 = vld [vmem:[#allocation7 + $0xf60] sm:$0xf0]  ;;  %v7583_v0 = vld [vmem:[#allocation7 + $0xb64] sm:$0xf0] }
 0x10b   : > { %v7618_v2 = vld [vmem:[#allocation7 + $0xc84] sm:$0xf]  ;;  %3794 = vmatpush.bf16.msrb.mxu2 %v6708_v18  ;;  %v6996_v9 = vor.u32 %v7706_v58, %v6993_v59  ;;  %v6488_v48 = vor.u32 %v7583_v0, %v6487_v45  ;;  %v5079_v55 = vld [vmem:[#allocation7 + $0x48] sm:$0xf] }
 0x10c   : > { %v6641_v5 = vld [vmem:[#allocation7 + $0xca0] sm:$0xf0]  ;;  %3820 = vmatpush.bf16.msra.mxu0 %v5240_v57  ;;  %v7231_v57 = vld [vmem:[#allocation7 + $0x64] sm:$0xf0] }
 0x10d   : > { %3835 = vmatpush.bf16.msra.mxu1 %v5464_v3  ;;  %v5336_v3 = vor.u32 %v7295_v63, %v5335_v62  ;;  %v7698_v7 = vld [vmem:[#allocation7 + $0xf04] sm:$0xf]  ;;  %v6644_v20 = vor.u32 %v7618_v2, %v6641_v5  ;;  %3807 = vmatpush.bf16.msrb.mxu3 %v6996_v9  ;;  %v6455_v58 = vld [vmem:[#allocation7 + $0xb08] sm:$0xf] }
 0x10e   : > { %v6961_v6 = vld [vmem:[#allocation7 + $0xf20] sm:$0xf0]  ;;  %v7575_v59 = vld [vmem:[#allocation7 + $0xb24] sm:$0xf0] }
 0x10f   : > { %3795 = vmatpush.bf16.msrb.mxu2 %v6676_v4  ;;  %v7610_v22 = vld [vmem:[#allocation7 + $0xc44] sm:$0xf]  ;;  %v6964_v25 = vor.u32 %v7698_v7, %v6961_v6  ;;  %v6456_v62 = vor.u32 %v7575_v59, %v6455_v58  ;;  %v5047_v5 = vld [vmem:[#allocation7 + $0x8] sm:$0xf]  ;;  %v5752_v6 = vor.u32 %v7399_v61, %v5751_v60  ;;  %v7339_v59 = vld [vmem:[#allocation7 + $0x3cc] sm:$0xf] }
 0x110   : > { %v6609_v24 = vld [vmem:[#allocation7 + $0xc60] sm:$0xf0]  ;;  %3821 = vmatpush.bf16.msra.mxu0 %v5208_v10  ;;  %v7223_v7 = vld [vmem:[#allocation7 + $0x24] sm:$0xf0]  ;;  %v5529_v60 = vld [vmem:[#allocation7 + $0x3e8] sm:$0xf0] }
 0x111   : > { %3836 = vmatpush.bf16.msra.mxu1 %v5432_v16  ;;  %v7599_v16 = vld [vmem:[#allocation7 + $0xbe4] sm:$0xf0]  ;;  %v7690_v27 = vld [vmem:[#allocation7 + $0xec4] sm:$0xf]  ;;  %v6612_v34 = vor.u32 %v7610_v22, %v6609_v24  ;;  %3808 = vmatpush.bf16.msrb.mxu3 %v6964_v25 }
 0x112   : > { %v6552_v19 = vor.u32 %v7599_v16, %v6551_v15  ;;  %v6929_v28 = vld [vmem:[#allocation7 + $0xee0] sm:$0xf0]  ;;  %v5719_v9 = vld [vmem:[#allocation7 + $0x548] sm:$0xf] }
 0x113   : > { %3796 = vmatpush.bf16.msrb.mxu2 %v6644_v20  ;;  %v7602_v36 = vld [vmem:[#allocation7 + $0xc04] sm:$0xf]  ;;  %v6932_v38 = vor.u32 %v7690_v27, %v6929_v28  ;;  %v6423_v10 = vld [vmem:[#allocation7 + $0xac8] sm:$0xf]  ;;  %v5048_v20 = vor.u32 %v7223_v7, %v5047_v5 }
 0x114   : > { %v6577_v37 = vld [vmem:[#allocation7 + $0xc20] sm:$0xf0]  ;;  %3822 = vmatpush.bf16.msra.mxu0 %v5176_v26  ;;  %v7567_v8 = vld [vmem:[#allocation7 + $0xae4] sm:$0xf0] }
 0x115   : > { %3837 = vmatpush.bf16.msra.mxu1 %v5400_v33  ;;  %v6520_v33 = vor.u32 %v7591_v32, %v6519_v31  ;;  %v7682_v40 = vld [vmem:[#allocation7 + $0xe84] sm:$0xf]  ;;  %v6580_v49 = vor.u32 %v7602_v36, %v6577_v37  ;;  %3809 = vmatpush.bf16.msrb.mxu3 %v6932_v38  ;;  %v7391_v11 = vld [vmem:[#allocation7 + $0x564] sm:$0xf0] }
 0x116   : > { %v6897_v41 = vld [vmem:[#allocation7 + $0xea0] sm:$0xf0]  ;;  %v6039_v12 = vld [vmem:[#allocation7 + $0x7c8] sm:$0xf]  ;;  %v5720_v22 = vor.u32 %v7391_v11, %v5719_v9 }
 0x117   : > { %3797 = vmatpush.bf16.msrb.mxu2 %v6612_v34  ;;  %v6900_v50 = vor.u32 %v7682_v40, %v6897_v41  ;;  %v7674_v18 = vld [vmem:[#allocation7 + $0xe44] sm:$0xf]  ;;  %v7471_v13 = vld [vmem:[#allocation7 + $0x7e4] sm:$0xf0] }
 0x118   : > { %3823 = vmatpush.bf16.msra.mxu0 %v5144_v39  ;;  %v6865_v54 = vld [vmem:[#allocation7 + $0xe60] sm:$0xf0]  ;;  %v6295_v15 = vld [vmem:[#allocation7 + $0x9c8] sm:$0xf]  ;;  %v6040_v24 = vor.u32 %v7471_v13, %v6039_v12 }
 0x119   : > { %3838 = vmatpush.bf16.msra.mxu1 %v5368_v17  ;;  %v5112_v17 = vor.u32 %v7239_v44, %v5111_v42  ;;  %v7666_v63 = vld [vmem:[#allocation7 + $0xe04] sm:$0xf]  ;;  %3810 = vmatpush.bf16.msrb.mxu3 %v6900_v50  ;;  %v6868_v2 = vor.u32 %v7674_v18, %v6865_v54  ;;  %v7535_v16 = vld [vmem:[#allocation7 + $0x9e4] sm:$0xf0] }
 0x11a   : > { %v6833_v4 = vld [vmem:[#allocation7 + $0xe20] sm:$0xf0]  ;;  %v5687_v25 = vld [vmem:[#allocation7 + $0x508] sm:$0xf]  ;;  %v6296_v28 = vor.u32 %v7535_v16, %v6295_v15 }
 0x11b   : > { %3798 = vmatpush.bf16.msrb.mxu2 %v6580_v49  ;;  %v7383_v26 = vld [vmem:[#allocation7 + $0x524] sm:$0xf0] }
 0x11c   : > { %3824 = vmatpush.bf16.msra.mxu0 %v5112_v17  ;;  %v6007_v27 = vld [vmem:[#allocation7 + $0x788] sm:$0xf]  ;;  %v5688_v36 = vor.u32 %v7383_v26, %v5687_v25  ;;  %v7323_v26 = vld [vmem:[#allocation7 + $0x34c] sm:$0xf] }
 0x11d   : > { %3839 = vmatpush.bf16.msra.mxu1 %v5336_v3  ;;  %v5080_v3 = vor.u32 %v7231_v57, %v5079_v55  ;;  %3811 = vmatpush.bf16.msrb.mxu3 %v6868_v2  ;;  %v7463_v29 = vld [vmem:[#allocation7 + $0x7a4] sm:$0xf0] }
 0x11e   : > { %3799 = vmatmul.bf16.vlgmr.msrb.gmra.mxu2 %v8441_v46  ;;  %v6391_v30 = vld [vmem:[#allocation7 + $0xa88] sm:$0xf]  ;;  %v6008_v37 = vor.u32 %v7463_v29, %v6007_v27  ;;  %v5465_v27 = vld [vmem:[#allocation7 + $0x368] sm:$0xf0] }
 0x11f   : > { %3847 = vmatpush.bf16.msra.mxu2 %v5784_v56  ;;  %v7559_v31 = vld [vmem:[#allocation7 + $0xaa4] sm:$0xf0] }
 0x120   : > { %3825 = vmatpush.bf16.msra.mxu0 %v5080_v3  ;;  %v6263_v32 = vld [vmem:[#allocation7 + $0x988] sm:$0xf]  ;;  %v6392_v34 = vor.u32 %v7559_v31, %v6391_v30  ;;  %v5468_v31 = vor.u32 %v7323_v26, %v5465_v27 }
 0x121   : > { %3840 = vmatpush.bf16.msra.mxu1 %v5304_v14  ;;  %v6424_v14 = vor.u32 %v7567_v8, %v6423_v10  ;;  %v5655_v38 = vld [vmem:[#allocation7 + $0x4c8] sm:$0xf]  ;;  %v7331_v10 = vld [vmem:[#allocation7 + $0x38c] sm:$0xf] }
 0x122   : > { %v7375_v39 = vld [vmem:[#allocation7 + $0x4e4] sm:$0xf0]  ;;  %v5497_v8 = vld [vmem:[#allocation7 + $0x3a8] sm:$0xf0] }
 0x123   : > { %3848 = vmatpush.bf16.msra.mxu2 %v5752_v6  ;;  %v5975_v40 = vld [vmem:[#allocation7 + $0x748] sm:$0xf]  ;;  %v5656_v50 = vor.u32 %v7375_v39, %v5655_v38  ;;  %v5500_v13 = vor.u32 %v7331_v10, %v5497_v8  ;;  %v7299_v10 = vld [vmem:[#allocation7 + $0x28c] sm:$0xf] }
 0x124   : > { %3841 = vmatmul.bf16.vlgmr.msra.gmra.mxu1 %v8453_v43  ;;  %3826 = vmatpush.bf16.msra.mxu0 %v5048_v20  ;;  %v7455_v42 = vld [vmem:[#allocation7 + $0x764] sm:$0xf0]  ;;  %v5369_v8 = vld [vmem:[#allocation7 + $0x2a8] sm:$0xf0] }
 0x125   : > { %3889 = vmatpush.bf16.msrb.mxu1 %v6552_v19  ;;  %v6836_v19 = vor.u32 %v7666_v63, %v6833_v4  ;;  %v6359_v44 = vld [vmem:[#allocation7 + $0xa48] sm:$0xf]  ;;  %v5976_v17 = vor.u32 %v7455_v42, %v5975_v40  ;;  %v5532_v63 = vor.u32 %v7339_v59, %v5529_v60  ;;  %v7315_v40 = vld [vmem:[#allocation7 + $0x30c] sm:$0xf] }
 0x126   : > { %v7551_v45 = vld [vmem:[#allocation7 + $0xa64] sm:$0xf0] }
 0x127   : > { %3812 = vmatpush.bf16.msrb.mxu3 %v6836_v19  ;;  %3849 = vmatpush.bf16.msra.mxu2 %v5720_v22  ;;  %v6231_v0 = vld [vmem:[#allocation7 + $0x948] sm:$0xf]  ;;  %v6360_v47 = vor.u32 %v7551_v45, %v6359_v44 }
 0x128   : > { %3875 = vmatpush.bf16.msrb.mxu0 %v6296_v28  ;;  %v7519_v1 = vld [vmem:[#allocation7 + $0x964] sm:$0xf0] }
 0x129   : > { %3890 = vmatpush.bf16.msrb.mxu1 %v6520_v33  ;;  %v7527_v33 = vld [vmem:[#allocation7 + $0x9a4] sm:$0xf0]  ;;  %3827 = vmatmul.bf16.vlgmr.msra.gmra.mxu0 %v8449_v35  ;;  %v6232_v56 = vor.u32 %v7519_v1, %v6231_v0 }
 0x12a   : > { %v6264_v41 = vor.u32 %v7527_v33, %v6263_v32  ;;  %3813 = vmatmul.bf16.vlgmr.msrb.gmra.mxu3 %v8484_v51  ;;  %v7367_v49 = vld [vmem:[#allocation7 + $0x4a4] sm:$0xf0] }
 0x12b   : > { %3861 = vmatpush.bf16.msra.mxu3 %v6040_v24  ;;  %3850 = vmatpush.bf16.msra.mxu2 %v5688_v36  ;;  %v5943_v18 = vld [vmem:[#allocation7 + $0x708] sm:$0xf] }
 0x12c   : > { %v6327_v54 = vld [vmem:[#allocation7 + $0xa08] sm:$0xf]  ;;  %3876 = vmatpush.bf16.msrb.mxu0 %v6264_v41  ;;  %v5433_v41 = vld [vmem:[#allocation7 + $0x328] sm:$0xf0] }
 0x12d   : > { %3891 = vmatpush.bf16.msrb.mxu1 %v6488_v48  ;;  %v5623_v48 = vld [vmem:[#allocation7 + $0x488] sm:$0xf]  ;;  %v5436_v0 = vor.u32 %v7315_v40, %v5433_v41 }
 0x12e   : > { %v7543_v55 = vld [vmem:[#allocation7 + $0xa24] sm:$0xf0]  ;;  %v5624_v2 = vor.u32 %v7367_v49, %v5623_v48 }
 0x12f   : > { %3862 = vmatpush.bf16.msra.mxu3 %v6008_v37  ;;  %v7447_v57 = vld [vmem:[#allocation7 + $0x724] sm:$0xf0]  ;;  %v6328_v58 = vor.u32 %v7543_v55, %v6327_v54  ;;  %3851 = vmatpush.bf16.msra.mxu2 %v5656_v50  ;;  %v7307_v54 = vld [vmem:[#allocation7 + $0x2cc] sm:$0xf] }
 0x130   : > { %v6199_v61 = vld [vmem:[#allocation7 + $0x908] sm:$0xf]  ;;  %v5944_v3 = vor.u32 %v7447_v57, %v5943_v18  ;;  %3877 = vmatpush.bf16.msrb.mxu0 %v6232_v56  ;;  %v5401_v55 = vld [vmem:[#allocation7 + $0x2e8] sm:$0xf0] }
 0x131   : > { %3892 = vmatpush.bf16.msrb.mxu1 %v6456_v62  ;;  %v7511_v62 = vld [vmem:[#allocation7 + $0x924] sm:$0xf0]  ;;  %v5404_v59 = vor.u32 %v7307_v54, %v5401_v55 }
 0x132   : > { %v5591_v4 = vld [vmem:[#allocation7 + $0x448] sm:$0xf]  ;;  %v6200_v6 = vor.u32 %v7511_v62, %v6199_v61  ;;  %v7275_v61 = vld [vmem:[#allocation7 + $0x1cc] sm:$0xf] }
 0x133   : > { %3863 = vmatpush.bf16.msra.mxu3 %v5976_v17  ;;  %v7359_v5 = vld [vmem:[#allocation7 + $0x464] sm:$0xf0]  ;;  %3852 = vmatpush.bf16.msra.mxu2 %v5624_v2  ;;  %v5273_v62 = vld [vmem:[#allocation7 + $0x1e8] sm:$0xf0] }
 0x134   : > { %v5911_v7 = vld [vmem:[#allocation7 + $0x6c8] sm:$0xf]  ;;  %v5592_v15 = vor.u32 %v7359_v5, %v5591_v4  ;;  %3878 = vmatpush.bf16.msrb.mxu0 %v6200_v6  ;;  %v5276_v6 = vor.u32 %v7275_v61, %v5273_v62  ;;  %v6521_v61 = vld [vmem:[#allocation7 + $0xba8] sm:$0xf0] }
 0x135   : > { %3893 = vmatpush.bf16.msrb.mxu1 %v6424_v14  ;;  %v7439_v9 = vld [vmem:[#allocation7 + $0x6e4] sm:$0xf0] }
 0x136   : > { %v6167_v11 = vld [vmem:[#allocation7 + $0x8c8] sm:$0xf]  ;;  %v5912_v16 = vor.u32 %v7439_v9, %v5911_v7 }
 0x137   : > { %v7503_v12 = vld [vmem:[#allocation7 + $0x8e4] sm:$0xf0]  ;;  %3864 = vmatpush.bf16.msra.mxu3 %v5944_v3  ;;  %3853 = vmatpush.bf16.msra.mxu2 %v5592_v15  ;;  %v3604_v15 = vpop.f32.mrf.mxu0 }
 0x138   : > { %v5559_v14 = vld [vmem:[#allocation7 + $0x408] sm:$0xf]  ;;  %v6168_v24 = vor.u32 %v7503_v12, %v6167_v11  ;;  %v7267_v12 = vld [vmem:[#allocation7 + $0x18c] sm:$0xf] }
 0x139   : > { %3894 = vmatpush.bf16.msrb.mxu1 %v6392_v34  ;;  %v7351_v19 = vld [vmem:[#allocation7 + $0x424] sm:$0xf0] }
 0x13a   : > { %v5879_v20 = vld [vmem:[#allocation7 + $0x688] sm:$0xf]  ;;  %v5560_v32 = vor.u32 %v7351_v19, %v5559_v14  ;;  %3879 = vmatpush.bf16.msrb.mxu0 %v6168_v24  ;;  %v5372_v14 = vor.u32 %v7299_v10, %v5369_v8  ;;  %v5113_v10 = vld [vmem:[#allocation7 + $0xa8] sm:$0xf0] }
 0x13b   : > { %v7431_v22 = vld [vmem:[#allocation7 + $0x6a4] sm:$0xf0]  ;;  %3865 = vmatpush.bf16.msra.mxu3 %v5912_v16  ;;  %v3618_v16 = vpop.f32.mrf.mxu1  ;;  %v7579_v8 = vld [vmem:[#allocation7 + $0xb4c] sm:$0xf] }
 0x13c   : > { %v6135_v25 = vld [vmem:[#allocation7 + $0x888] sm:$0xf]  ;;  %v5880_v33 = vor.u32 %v7431_v22, %v5879_v20  ;;  %3854 = vmatpush.bf16.msra.mxu2 %v5560_v32  ;;  %v8498_v24 = vadd.f32 %v3618_v16, %v3604_v15  ;;  %v5337_v32 = vld [vmem:[#allocation7 + $0x268] sm:$0xf0] }
 0x13d   : > { %3895 = vmatpush.bf16.msrb.mxu1 %v6360_v47  ;;  %v7495_v28 = vld [vmem:[#allocation7 + $0x8a4] sm:$0xf0] }
 0x13e   : > { %v6807_v29 = vld [vmem:[#allocation7 + $0xdc8] sm:$0xf]  ;;  %v6136_v37 = vor.u32 %v7495_v28, %v6135_v25 }
 0x13f   : > { %v7663_v30 = vld [vmem:[#allocation7 + $0xde4] sm:$0xf0]  ;;  %3866 = vmatpush.bf16.msra.mxu3 %v5880_v33  ;;  %3855 = vmatmul.bf16.vlgmr.msra.gmra.mxu2 %v8463_v21 }
 0x140   : > { %v5847_v34 = vld [vmem:[#allocation7 + $0x648] sm:$0xf]  ;;  %v6808_v38 = vor.u32 %v7663_v30, %v6807_v29  ;;  %3880 = vmatpush.bf16.msrb.mxu0 %v6136_v37  ;;  %v7259_v29 = vld [vmem:[#allocation7 + $0x14c] sm:$0xf] }
 0x141   : > { %3896 = vmatpush.bf16.msrb.mxu1 %v6328_v58  ;;  %v7423_v36 = vld [vmem:[#allocation7 + $0x664] sm:$0xf0]  ;;  %v5209_v30 = vld [vmem:[#allocation7 + $0x168] sm:$0xf0] }
 0x142   : > { %v6103_v39 = vld [vmem:[#allocation7 + $0x848] sm:$0xf]  ;;  %v5848_v1 = vor.u32 %v7423_v36, %v5847_v34  ;;  %3903 = vmatpush.bf16.msrb.mxu2 %v6808_v38  ;;  %v5212_v41 = vor.u32 %v7259_v29, %v5209_v30  ;;  %v6457_v29 = vld [vmem:[#allocation7 + $0xb28] sm:$0xf0] }
 0x143   : > { %v7487_v42 = vld [vmem:[#allocation7 + $0x864] sm:$0xf0]  ;;  %v7395_v30 = vld [vmem:[#allocation7 + $0x58c] sm:$0xf] }
 0x144   : > { %3897 = vmatmul.bf16.vlgmr.msrb.gmra.mxu1 %v8425_v23  ;;  %v6775_v44 = vld [vmem:[#allocation7 + $0xd88] sm:$0xf]  ;;  %v6104_v50 = vor.u32 %v7487_v42, %v6103_v39  ;;  %3867 = vmatpush.bf16.msra.mxu3 %v5848_v1  ;;  %v7251_v42 = vld [vmem:[#allocation7 + $0x10c] sm:$0xf] }
 0x145   : > { %3945 = vmatpush.bf16.msra.mxu1 %v5532_v63  ;;  %v7655_v45 = vld [vmem:[#allocation7 + $0xda4] sm:$0xf0] }
 0x146   : > { %v5815_v47 = vld [vmem:[#allocation7 + $0x608] sm:$0xf]  ;;  %v6776_v17 = vor.u32 %v7655_v45, %v6775_v44  ;;  %3881 = vmatpush.bf16.msrb.mxu0 %v6104_v50  ;;  %v7283_v44 = vld [vmem:[#allocation7 + $0x20c] sm:$0xf] }
 0x147   : > { %v7415_v48 = vld [vmem:[#allocation7 + $0x624] sm:$0xf0]  ;;  %v5305_v45 = vld [vmem:[#allocation7 + $0x228] sm:$0xf0] }
 0x148   : > { %v6071_v49 = vld [vmem:[#allocation7 + $0x808] sm:$0xf]  ;;  %v5816_v63 = vor.u32 %v7415_v48, %v5815_v47  ;;  %3904 = vmatpush.bf16.msrb.mxu2 %v6776_v17  ;;  %v5308_v1 = vor.u32 %v7283_v44, %v5305_v45  ;;  %v7595_v47 = vld [vmem:[#allocation7 + $0xbcc] sm:$0xf] }
 0x149   : > { %3946 = vmatpush.bf16.msra.mxu1 %v5500_v13  ;;  %v7479_v18 = vld [vmem:[#allocation7 + $0x824] sm:$0xf0]  ;;  %v5241_v13 = vld [vmem:[#allocation7 + $0x1a8] sm:$0xf0] }
 0x14a   : > { %v6743_v56 = vld [vmem:[#allocation7 + $0xd48] sm:$0xf]  ;;  %v6072_v2 = vor.u32 %v7479_v18, %v6071_v49  ;;  %3868 = vmatpush.bf16.msra.mxu3 %v5816_v63  ;;  %v5244_v26 = vor.u32 %v7267_v12, %v5241_v13  ;;  %v6553_v48 = vld [vmem:[#allocation7 + $0xbe8] sm:$0xf0] }
 0x14b   : > { %v7647_v57 = vld [vmem:[#allocation7 + $0xd64] sm:$0xf0]  ;;  %v6556_v49 = vor.u32 %v7595_v47, %v6553_v48  ;;  %v7403_v12 = vld [vmem:[#allocation7 + $0x5cc] sm:$0xf]  ;;  %v8504_v47 = vpop.f32.mrf.mxu1 }
 0x14c   : > { %v7063_v58 = vld [vmem:[#allocation7 + $0xfc8] sm:$0xf]  ;;  %v6744_v3 = vor.u32 %v7647_v57, %v6743_v56  ;;  %3882 = vmatpush.bf16.msrb.mxu0 %v6072_v2  ;;  %v5785_v13 = vld [vmem:[#allocation7 + $0x5e8] sm:$0xf0] }
 0x14d   : > { %3947 = vmatpush.bf16.msra.mxu1 %v5468_v31  ;;  %v7727_v60 = vld [vmem:[#allocation7 + $0xfe4] sm:$0xf0]  ;;  %3869 = vmatmul.bf16.vlgmr.msra.gmra.mxu3 %v8470_v52  ;;  %v7291_v31 = vld [vmem:[#allocation7 + $0x24c] sm:$0xf] }
 0x14e   : > { %v6711_v4 = vld [vmem:[#allocation7 + $0xd08] sm:$0xf]  ;;  %v7064_v7 = vor.u32 %v7727_v60, %v7063_v58  ;;  %3905 = vmatpush.bf16.msrb.mxu2 %v6744_v3  ;;  %v5340_v34 = vor.u32 %v7291_v31, %v5337_v32  ;;  %v7243_v58 = vld [vmem:[#allocation7 + $0xcc] sm:$0xf] }
 0x14f   : > { %v7639_v5 = vld [vmem:[#allocation7 + $0xd24] sm:$0xf0]  ;;  %3883 = vmatmul.bf16.vlgmr.msrb.gmra.mxu0 %v8472_v53  ;;  %v7587_v60 = vld [vmem:[#allocation7 + $0xb8c] sm:$0xf] }
 0x150   : > { %v7031_v9 = vld [vmem:[#allocation7 + $0xf88] sm:$0xf]  ;;  %v6712_v19 = vor.u32 %v7639_v5, %v6711_v4  ;;  %3917 = vmatpush.bf16.msrb.mxu3 %v7064_v7  ;;  %3931 = vmatpush.bf16.msra.mxu0 %v5276_v6  ;;  %v6524_v62 = vor.u32 %v7587_v60, %v6521_v61  ;;  %v5753_v31 = vld [vmem:[#allocation7 + $0x5a8] sm:$0xf0] }
 0x151   : > { %3948 = vmatpush.bf16.msra.mxu1 %v5436_v0  ;;  %v7719_v11 = vld [vmem:[#allocation7 + $0xfa4] sm:$0xf0]  ;;  %v5177_v0 = vld [vmem:[#allocation7 + $0x128] sm:$0xf0] }
 0x152   : > { %v6679_v20 = vld [vmem:[#allocation7 + $0xcc8] sm:$0xf]  ;;  %v7032_v25 = vor.u32 %v7719_v11, %v7031_v9  ;;  %3906 = vmatpush.bf16.msrb.mxu2 %v6712_v19  ;;  %v5180_v55 = vor.u32 %v7251_v42, %v5177_v0  ;;  %v7235_v9 = vld [vmem:[#allocation7 + $0x8c] sm:$0xf] }
 0x153   : > { %v7631_v22 = vld [vmem:[#allocation7 + $0xce4] sm:$0xf0]  ;;  %v6489_v11 = vld [vmem:[#allocation7 + $0xb68] sm:$0xf0]  ;;  %v5116_v19 = vor.u32 %v7235_v9, %v5113_v10 }
 0x154   : > { %v6999_v27 = vld [vmem:[#allocation7 + $0xf48] sm:$0xf]  ;;  %v6680_v36 = vor.u32 %v7631_v22, %v6679_v20  ;;  %3918 = vmatpush.bf16.msrb.mxu3 %v7032_v25  ;;  %3932 = vmatpush.bf16.msra.mxu0 %v5244_v26  ;;  %v7227_v25 = vld [vmem:[#allocation7 + $0x4c] sm:$0xf]  ;;  %v5788_v26 = vor.u32 %v7403_v12, %v5785_v13  ;;  %v8508_v12 = vpop.f32.mrf.mxu1 }
 0x155   : > { %3949 = vmatpush.bf16.msra.mxu1 %v5404_v59  ;;  %v7711_v28 = vld [vmem:[#allocation7 + $0xf64] sm:$0xf0]  ;;  %v5145_v59 = vld [vmem:[#allocation7 + $0xe8] sm:$0xf0] }
 0x156   : > { %v6647_v33 = vld [vmem:[#allocation7 + $0xc88] sm:$0xf]  ;;  %v7000_v40 = vor.u32 %v7711_v28, %v6999_v27  ;;  %3907 = vmatpush.bf16.msrb.mxu2 %v6680_v36  ;;  %v5148_v5 = vor.u32 %v7243_v58, %v5145_v59  ;;  %v5081_v27 = vld [vmem:[#allocation7 + $0x68] sm:$0xf0] }
 0x157   : > { %v7623_v37 = vld [vmem:[#allocation7 + $0xca4] sm:$0xf0]  ;;  %v7571_v28 = vld [vmem:[#allocation7 + $0xb0c] sm:$0xf]  ;;  %v5084_v36 = vor.u32 %v7227_v25, %v5081_v27 }
 0x158   : > { %v6967_v38 = vld [vmem:[#allocation7 + $0xf08] sm:$0xf]  ;;  %v6648_v50 = vor.u32 %v7623_v37, %v6647_v33  ;;  %3919 = vmatpush.bf16.msrb.mxu3 %v7000_v40  ;;  %3933 = vmatpush.bf16.msra.mxu0 %v5212_v41  ;;  %v6460_v32 = vor.u32 %v7571_v28, %v6457_v29  ;;  %v5756_v40 = vor.u32 %v7395_v30, %v5753_v31  ;;  %v7387_v41 = vld [vmem:[#allocation7 + $0x54c] sm:$0xf]  ;;  %v3632_v25 = vpop.f32.mrf.mxu2 }
 0x159   : > { %3950 = vmatpush.bf16.msra.mxu1 %v5372_v14  ;;  %v7703_v39 = vld [vmem:[#allocation7 + $0xf24] sm:$0xf0]  ;;  %v6492_v14 = vor.u32 %v7579_v8, %v6489_v11  ;;  %v7563_v42 = vld [vmem:[#allocation7 + $0xacc] sm:$0xf]  ;;  %v3633_v31 = vadd.f32 %v3632_v25, %v8498_v24 }
 0x15a   : > { %v6615_v17 = vld [vmem:[#allocation7 + $0xc48] sm:$0xf]  ;;  %v6968_v54 = vor.u32 %v7703_v39, %v6967_v38  ;;  %3908 = vmatpush.bf16.msrb.mxu2 %v6648_v50  ;;  %v7219_v38 = vld [vmem:[#allocation7 + $0xc] sm:$0xf] }
 0x15b   : > { %v7615_v18 = vld [vmem:[#allocation7 + $0xc64] sm:$0xf0]  ;;  %v5049_v39 = vld [vmem:[#allocation7 + $0x28] sm:$0xf0] }
 0x15c   : > { %v6935_v56 = vld [vmem:[#allocation7 + $0xec8] sm:$0xf]  ;;  %v6616_v63 = vor.u32 %v7615_v18, %v6615_v17  ;;  %3920 = vmatpush.bf16.msrb.mxu3 %v6968_v54  ;;  %3934 = vmatpush.bf16.msra.mxu0 %v5180_v55  ;;  %v6425_v44 = vld [vmem:[#allocation7 + $0xae8] sm:$0xf0]  ;;  %v5052_v18 = vor.u32 %v7219_v38, %v5049_v39 }
 0x15d   : > { %3951 = vmatpush.bf16.msra.mxu1 %v5340_v34  ;;  %v7695_v57 = vld [vmem:[#allocation7 + $0xee4] sm:$0xf0]  ;;  %v5721_v45 = vld [vmem:[#allocation7 + $0x568] sm:$0xf0]  ;;  %v6428_v48 = vor.u32 %v7563_v42, %v6425_v44 }
 0x15e   : > { %v6583_v2 = vld [vmem:[#allocation7 + $0xc08] sm:$0xf]  ;;  %v6936_v4 = vor.u32 %v7695_v57, %v6935_v56  ;;  %3909 = vmatpush.bf16.msrb.mxu2 %v6616_v63  ;;  %v7467_v0 = vld [vmem:[#allocation7 + $0x7cc] sm:$0xf]  ;;  %v5724_v54 = vor.u32 %v7387_v41, %v5721_v45  ;;  %v8506_v56 = vpop.f32.mrf.mxu0 }
 0x15f   : > { %v7607_v3 = vld [vmem:[#allocation7 + $0xc24] sm:$0xf0]  ;;  %v6297_v50 = vld [vmem:[#allocation7 + $0x9e8] sm:$0xf0] }
 0x160   : > { %v6903_v7 = vld [vmem:[#allocation7 + $0xe88] sm:$0xf]  ;;  %v6584_v15 = vor.u32 %v7607_v3, %v6583_v2  ;;  %3921 = vmatpush.bf16.msrb.mxu3 %v6936_v4  ;;  %3935 = vmatpush.bf16.msra.mxu0 %v5148_v5  ;;  %v7379_v57 = vld [vmem:[#allocation7 + $0x50c] sm:$0xf] }
 0x161   : > { %3952 = vmatpush.bf16.msra.mxu1 %v5308_v1  ;;  %v7687_v6 = vld [vmem:[#allocation7 + $0xea4] sm:$0xf0]  ;;  %v6041_v1 = vld [vmem:[#allocation7 + $0x7e8] sm:$0xf0] }
 0x162   : > { %v6904_v16 = vor.u32 %v7687_v6, %v6903_v7  ;;  %v6871_v20 = vld [vmem:[#allocation7 + $0xe48] sm:$0xf]  ;;  %3910 = vmatpush.bf16.msrb.mxu2 %v6584_v15  ;;  %v6044_v55 = vor.u32 %v7467_v0, %v6041_v1  ;;  %v5689_v58 = vld [vmem:[#allocation7 + $0x528] sm:$0xf0] }
 0x163   : > { %v7679_v22 = vld [vmem:[#allocation7 + $0xe64] sm:$0xf0]  ;;  %v7459_v59 = vld [vmem:[#allocation7 + $0x78c] sm:$0xf]  ;;  %v5692_v5 = vor.u32 %v7379_v57, %v5689_v58  ;;  %v8513_v57 = vpop.f32.mrf.mxu1  ;;  %v8515_v58 = vpop.f32.mrf.mxu2 }
 0x164   : > { %3953 = vmatmul.bf16.vlgmr.msra.gmra.mxu1 %v8453_v43  ;;  %v6839_v33 = vld [vmem:[#allocation7 + $0xe08] sm:$0xf]  ;;  %3922 = vmatpush.bf16.msrb.mxu3 %v6904_v16  ;;  %v6872_v34 = vor.u32 %v7679_v22, %v6871_v20  ;;  %v6009_v61 = vld [vmem:[#allocation7 + $0x7a8] sm:$0xf0] }
 0x165   : > { %4001 = vmatpush.bf16.msrb.mxu1 %v6556_v49  ;;  %3936 = vmatpush.bf16.msra.mxu0 %v5116_v19  ;;  %v7671_v37 = vld [vmem:[#allocation7 + $0xe24] sm:$0xf0]  ;;  %v7531_v49 = vld [vmem:[#allocation7 + $0x9cc] sm:$0xf]  ;;  %v6012_v7 = vor.u32 %v7459_v59, %v6009_v61  ;;  %v3646_v59 = vpop.f32.mrf.mxu3 }
 0x166   : > { %3959 = vmatpush.bf16.msra.mxu2 %v5788_v26  ;;  %v6840_v17 = vor.u32 %v7671_v37, %v6839_v33  ;;  %v6300_v60 = vor.u32 %v7531_v49, %v6297_v50  ;;  %v6393_v63 = vld [vmem:[#allocation7 + $0xaa8] sm:$0xf0]  ;;  %v7344_v37 = vld [vmem:[#allocation7 + $0x3ec] sm:$0xf0]  ;;  %v3660_v38 = vpop.f32.mrf.mxu0 }
 0x167   : > { %3911 = vmatmul.bf16.vlgmr.msrb.gmra.mxu2 %v8441_v46  ;;  %v7523_v2 = vld [vmem:[#allocation7 + $0x98c] sm:$0xf]  ;;  %v5503_v49 = vld [vmem:[#allocation7 + $0x390] sm:$0xf] }
 0x168   : > { %3923 = vmatpush.bf16.msrb.mxu3 %v6872_v34  ;;  %v6265_v3 = vld [vmem:[#allocation7 + $0x9a8] sm:$0xf0]  ;;  %v7336_v50 = vld [vmem:[#allocation7 + $0x3ac] sm:$0xf0] }
 0x169   : > { %4002 = vmatpush.bf16.msrb.mxu1 %v6524_v62  ;;  %3937 = vmatpush.bf16.msra.mxu0 %v5084_v36  ;;  %v7555_v62 = vld [vmem:[#allocation7 + $0xa8c] sm:$0xf]  ;;  %v6268_v8 = vor.u32 %v7523_v2, %v6265_v3  ;;  %v5535_v36 = vld [vmem:[#allocation7 + $0x3d0] sm:$0xf]  ;;  %v3647_v3 = vadd.f32 %v3646_v59, %v3633_v31 }
 0x16a   : > { %3960 = vmatpush.bf16.msra.mxu2 %v5756_v40  ;;  %v6396_v4 = vor.u32 %v7555_v62, %v6393_v63  ;;  %v7371_v6 = vld [vmem:[#allocation7 + $0x4cc] sm:$0xf]  ;;  %v5536_v41 = vor.u32 %v7344_v37, %v5535_v36 }
 0x16b   : > { %v5657_v9 = vld [vmem:[#allocation7 + $0x4e8] sm:$0xf0]  ;;  %v3688_v36 = vpop.f32.mrf.mxu2 }
 0x16c   : > { %3924 = vmatpush.bf16.msrb.mxu3 %v6840_v17  ;;  %v7451_v10 = vld [vmem:[#allocation7 + $0x74c] sm:$0xf]  ;;  %v5660_v26 = vor.u32 %v7371_v6, %v5657_v9  ;;  %v7328_v6 = vld [vmem:[#allocation7 + $0x36c] sm:$0xf0] }
 0x16d   : > { %4003 = vmatpush.bf16.msrb.mxu1 %v6492_v14  ;;  %3938 = vmatpush.bf16.msra.mxu0 %v5052_v18  ;;  %v5977_v11 = vld [vmem:[#allocation7 + $0x768] sm:$0xf0] }
 0x16e   : > { %3961 = vmatpush.bf16.msra.mxu2 %v5724_v54  ;;  %v7547_v13 = vld [vmem:[#allocation7 + $0xa4c] sm:$0xf]  ;;  %v5980_v27 = vor.u32 %v7451_v10, %v5977_v11  ;;  %v5504_v54 = vor.u32 %v7336_v50, %v5503_v49  ;;  %v8518_v9 = vpop.f32.mrf.mxu0  ;;  %v3730_v50 = vpop.f32.mrf.mxu1 }
 0x16f   : > { %v6361_v14 = vld [vmem:[#allocation7 + $0xa68] sm:$0xf0]  ;;  %3925 = vmatmul.bf16.vlgmr.msrb.gmra.mxu3 %v8484_v51 }
 0x170   : > { %3973 = vmatpush.bf16.msra.mxu3 %v6044_v55  ;;  %v7515_v15 = vld [vmem:[#allocation7 + $0x94c] sm:$0xf]  ;;  %3939 = vmatmul.bf16.vlgmr.msra.gmra.mxu0 %v8449_v35  ;;  %v6364_v19 = vor.u32 %v7547_v13, %v6361_v14  ;;  %v3661_v14 = vadd.f32 %v3660_v38, %v3647_v3 }
 0x171   : > { %4004 = vmatpush.bf16.msrb.mxu1 %v6460_v32  ;;  %3987 = vmatpush.bf16.msrb.mxu0 %v6300_v60  ;;  %v6233_v16 = vld [vmem:[#allocation7 + $0x968] sm:$0xf0] }
 0x172   : > { %v7363_v20 = vld [vmem:[#allocation7 + $0x48c] sm:$0xf]  ;;  %3962 = vmatpush.bf16.msra.mxu2 %v5692_v5  ;;  %v6236_v32 = vor.u32 %v7515_v15, %v6233_v16 }
 0x173   : > { %v5625_v22 = vld [vmem:[#allocation7 + $0x4a8] sm:$0xf0] }
 0x174   : > { %3974 = vmatpush.bf16.msra.mxu3 %v6012_v7  ;;  %v7443_v28 = vld [vmem:[#allocation7 + $0x70c] sm:$0xf]  ;;  %v5628_v42 = vor.u32 %v7363_v20, %v5625_v22  ;;  %v5471_v7 = vld [vmem:[#allocation7 + $0x350] sm:$0xf]  ;;  %v3675_v22 = vadd.f32 %v8508_v12, %v3661_v14  ;;  %v8526_v14 = vpop.f32.mrf.mxu2 }
 0x175   : > { %4005 = vmatpush.bf16.msrb.mxu1 %v6428_v48  ;;  %v7539_v29 = vld [vmem:[#allocation7 + $0xa0c] sm:$0xf]  ;;  %3988 = vmatpush.bf16.msrb.mxu0 %v6268_v8  ;;  %v5472_v13 = vor.u32 %v7328_v6, %v5471_v7  ;;  %v5375_v7 = vld [vmem:[#allocation7 + $0x290] sm:$0xf] }
 0x176   : > { %v6329_v30 = vld [vmem:[#allocation7 + $0xa28] sm:$0xf0]  ;;  %3963 = vmatpush.bf16.msra.mxu2 %v5660_v26  ;;  %v3689_v12 = vadd.f32 %v3688_v36, %v3675_v22  ;;  %v7304_v6 = vld [vmem:[#allocation7 + $0x2ac] sm:$0xf0] }
 0x177   : > { %v5945_v33 = vld [vmem:[#allocation7 + $0x728] sm:$0xf0]  ;;  %v6332_v34 = vor.u32 %v7539_v29, %v6329_v30  ;;  %v5439_v29 = vld [vmem:[#allocation7 + $0x310] sm:$0xf] }
 0x178   : > { %v7507_v39 = vld [vmem:[#allocation7 + $0x90c] sm:$0xf]  ;;  %3975 = vmatpush.bf16.msra.mxu3 %v5980_v27  ;;  %v5948_v44 = vor.u32 %v7443_v28, %v5945_v33 }
 0x179   : > { %4006 = vmatpush.bf16.msrb.mxu1 %v6396_v4  ;;  %v6201_v40 = vld [vmem:[#allocation7 + $0x928] sm:$0xf0]  ;;  %3989 = vmatpush.bf16.msrb.mxu0 %v6236_v32  ;;  %v7320_v32 = vld [vmem:[#allocation7 + $0x32c] sm:$0xf0] }
 0x17a   : > { %v7355_v45 = vld [vmem:[#allocation7 + $0x44c] sm:$0xf]  ;;  %v6204_v48 = vor.u32 %v7507_v39, %v6201_v40  ;;  %3964 = vmatpush.bf16.msra.mxu2 %v5628_v42  ;;  %v5440_v33 = vor.u32 %v7320_v32, %v5439_v29  ;;  %v5215_v29 = vld [vmem:[#allocation7 + $0x150] sm:$0xf] }
 0x17b   : > { %v5593_v0 = vld [vmem:[#allocation7 + $0x468] sm:$0xf0]  ;;  %v7296_v32 = vld [vmem:[#allocation7 + $0x26c] sm:$0xf0] }
 0x17c   : > { %v7435_v1 = vld [vmem:[#allocation7 + $0x6cc] sm:$0xf]  ;;  %3976 = vmatpush.bf16.msra.mxu3 %v5948_v44  ;;  %v5596_v60 = vor.u32 %v7355_v45, %v5593_v0  ;;  %v5407_v45 = vld [vmem:[#allocation7 + $0x2d0] sm:$0xf] }
 0x17d   : > { %4007 = vmatpush.bf16.msrb.mxu1 %v6364_v19  ;;  %v5913_v24 = vld [vmem:[#allocation7 + $0x6e8] sm:$0xf0]  ;;  %3990 = vmatpush.bf16.msrb.mxu0 %v6204_v48  ;;  %v7312_v0 = vld [vmem:[#allocation7 + $0x2ec] sm:$0xf0] }
 0x17e   : > { %v7499_v17 = vld [vmem:[#allocation7 + $0x8cc] sm:$0xf]  ;;  %v5916_v61 = vor.u32 %v7435_v1, %v5913_v24  ;;  %3965 = vmatpush.bf16.msra.mxu2 %v5596_v60  ;;  %v3716_v1 = vpop.f32.mrf.mxu0 }
 0x17f   : > { %v6169_v18 = vld [vmem:[#allocation7 + $0x8e8] sm:$0xf0]  ;;  %v8524_v59 = vadd.f32 %v3730_v50, %v3716_v1  ;;  %v7256_v1 = vld [vmem:[#allocation7 + $0x12c] sm:$0xf0] }
 0x180   : > { %v7347_v55 = vld [vmem:[#allocation7 + $0x40c] sm:$0xf]  ;;  %v6172_v4 = vor.u32 %v7499_v17, %v6169_v18  ;;  %3977 = vmatpush.bf16.msra.mxu3 %v5916_v61  ;;  %v5408_v17 = vor.u32 %v7312_v0, %v5407_v45  ;;  %v7288_v45 = vld [vmem:[#allocation7 + $0x22c] sm:$0xf0] }
 0x181   : > { %4008 = vmatpush.bf16.msrb.mxu1 %v6332_v34  ;;  %v5561_v62 = vld [vmem:[#allocation7 + $0x428] sm:$0xf0]  ;;  %v8521_v34 = vpop.f32.mrf.mxu3  ;;  %v7600_v50 = vld [vmem:[#allocation7 + $0xbec] sm:$0xf0] }
 0x182   : > { %v7427_v63 = vld [vmem:[#allocation7 + $0x68c] sm:$0xf]  ;;  %v5564_v15 = vor.u32 %v7347_v55, %v5561_v62  ;;  %3991 = vmatpush.bf16.msrb.mxu0 %v6172_v4  ;;  %v7280_v55 = vld [vmem:[#allocation7 + $0x1ec] sm:$0xf0] }
 0x183   : > { %v5881_v2 = vld [vmem:[#allocation7 + $0x6a8] sm:$0xf0] }
 0x184   : > { %v7491_v5 = vld [vmem:[#allocation7 + $0x88c] sm:$0xf]  ;;  %4009 = vmatmul.bf16.vlgmr.msrb.gmra.mxu1 %v8425_v23  ;;  %v5884_v16 = vor.u32 %v7427_v63, %v5881_v2  ;;  %3966 = vmatpush.bf16.msra.mxu2 %v5564_v15 }
 0x185   : > { %4057 = vmatpush.bf16.msra.mxu1 %v5536_v41  ;;  %v6137_v10 = vld [vmem:[#allocation7 + $0x8a8] sm:$0xf0] }
 0x186   : > { %v7659_v8 = vld [vmem:[#allocation7 + $0xdcc] sm:$0xf]  ;;  %v6140_v25 = vor.u32 %v7491_v5, %v6137_v10  ;;  %3978 = vmatpush.bf16.msra.mxu3 %v5884_v16  ;;  %v8532_v0 = vpop.f32.mrf.mxu0 }
 0x187   : > { %v6809_v11 = vld [vmem:[#allocation7 + $0xde8] sm:$0xf0]  ;;  %3967 = vmatmul.bf16.vlgmr.msra.gmra.mxu2 %v8463_v21 }
 0x188   : > { %v7419_v19 = vld [vmem:[#allocation7 + $0x64c] sm:$0xf]  ;;  %v6812_v26 = vor.u32 %v7659_v8, %v6809_v11  ;;  %3992 = vmatpush.bf16.msrb.mxu0 %v6140_v25  ;;  %v5247_v8 = vld [vmem:[#allocation7 + $0x190] sm:$0xf] }
 0x189   : > { %4058 = vmatpush.bf16.msra.mxu1 %v5504_v54  ;;  %v5849_v20 = vld [vmem:[#allocation7 + $0x668] sm:$0xf0]  ;;  %v5279_v54 = vld [vmem:[#allocation7 + $0x1d0] sm:$0xf]  ;;  %v3702_v15 = vpop.f32.mrf.mxu3 }
 0x18a   : > { %v7483_v27 = vld [vmem:[#allocation7 + $0x84c] sm:$0xf]  ;;  %v5852_v37 = vor.u32 %v7419_v19, %v5849_v20  ;;  %4015 = vmatpush.bf16.msrb.mxu2 %v6812_v26  ;;  %v5280_v4 = vor.u32 %v7280_v55, %v5279_v54  ;;  %v7272_v11 = vld [vmem:[#allocation7 + $0x1ac] sm:$0xf0]  ;;  %v8528_v16 = vadd.f32 %v3702_v15, %v3689_v12 }
 0x18b   : > { %v6105_v28 = vld [vmem:[#allocation7 + $0x868] sm:$0xf0]  ;;  %v5248_v26 = vor.u32 %v7272_v11, %v5247_v8 }
 0x18c   : > { %v7651_v30 = vld [vmem:[#allocation7 + $0xd8c] sm:$0xf]  ;;  %v6108_v41 = vor.u32 %v7483_v27, %v6105_v28  ;;  %3979 = vmatpush.bf16.msra.mxu3 %v5852_v37 }
 0x18d   : > { %v6777_v31 = vld [vmem:[#allocation7 + $0xda8] sm:$0xf0]  ;;  %4059 = vmatpush.bf16.msra.mxu1 %v5472_v13  ;;  %v5376_v13 = vor.u32 %v7304_v6, %v5375_v7  ;;  %v7248_v7 = vld [vmem:[#allocation7 + $0xec] sm:$0xf0] }
 0x18e   : > { %v7411_v38 = vld [vmem:[#allocation7 + $0x60c] sm:$0xf]  ;;  %v6780_v42 = vor.u32 %v7651_v30, %v6777_v31  ;;  %3993 = vmatpush.bf16.msrb.mxu0 %v6108_v41  ;;  %v7264_v30 = vld [vmem:[#allocation7 + $0x16c] sm:$0xf0] }
 0x18f   : > { %v5817_v39 = vld [vmem:[#allocation7 + $0x628] sm:$0xf0]  ;;  %v5343_v31 = vld [vmem:[#allocation7 + $0x250] sm:$0xf]  ;;  %v5216_v41 = vor.u32 %v7264_v30, %v5215_v29 }
 0x190   : > { %v7475_v40 = vld [vmem:[#allocation7 + $0x80c] sm:$0xf]  ;;  %v5820_v60 = vor.u32 %v7411_v38, %v5817_v39  ;;  %4016 = vmatpush.bf16.msrb.mxu2 %v6780_v42  ;;  %v5344_v36 = vor.u32 %v7296_v32, %v5343_v31  ;;  %v5183_v42 = vld [vmem:[#allocation7 + $0x110] sm:$0xf] }
 0x191   : > { %v6073_v44 = vld [vmem:[#allocation7 + $0x828] sm:$0xf0]  ;;  %4060 = vmatpush.bf16.msra.mxu1 %v5440_v33  ;;  %v6527_v6 = vld [vmem:[#allocation7 + $0xb90] sm:$0xf] }
 0x192   : > { %v7643_v48 = vld [vmem:[#allocation7 + $0xd4c] sm:$0xf]  ;;  %v6076_v61 = vor.u32 %v7475_v40, %v6073_v44  ;;  %3980 = vmatpush.bf16.msra.mxu3 %v5820_v60  ;;  %v5311_v44 = vld [vmem:[#allocation7 + $0x210] sm:$0xf] }
 0x193   : > { %v6745_v24 = vld [vmem:[#allocation7 + $0xd68] sm:$0xf0]  ;;  %v5791_v30 = vld [vmem:[#allocation7 + $0x5d0] sm:$0xf] }
 0x194   : > { %v7723_v49 = vld [vmem:[#allocation7 + $0xfcc] sm:$0xf]  ;;  %v6748_v62 = vor.u32 %v7643_v48, %v6745_v24  ;;  %3994 = vmatpush.bf16.msrb.mxu0 %v6076_v61  ;;  %v8534_v48 = vpop.f32.mrf.mxu1  ;;  %v5312_v24 = vor.u32 %v7288_v45, %v5311_v44  ;;  %v7408_v31 = vld [vmem:[#allocation7 + $0x5ec] sm:$0xf0] }
 0x195   : > { %v7065_v18 = vld [vmem:[#allocation7 + $0xfe8] sm:$0xf0]  ;;  %4061 = vmatpush.bf16.msra.mxu1 %v5408_v17  ;;  %3981 = vmatmul.bf16.vlgmr.msra.gmra.mxu3 %v8470_v52  ;;  %v8536_v17 = vpop.f32.mrf.mxu3  ;;  %v5087_v45 = vld [vmem:[#allocation7 + $0x50] sm:$0xf] }
 0x196   : > { %v7635_v63 = vld [vmem:[#allocation7 + $0xd0c] sm:$0xf]  ;;  %v7068_v3 = vor.u32 %v7723_v49, %v7065_v18  ;;  %4017 = vmatpush.bf16.msrb.mxu2 %v6748_v62  ;;  %v6559_v49 = vld [vmem:[#allocation7 + $0xbd0] sm:$0xf]  ;;  %v3744_v18 = vpop.f32.mrf.mxu2 }
 0x197   : > { %v6713_v2 = vld [vmem:[#allocation7 + $0xd28] sm:$0xf0]  ;;  %3995 = vmatmul.bf16.vlgmr.msrb.gmra.mxu0 %v8472_v53  ;;  %v6560_v54 = vor.u32 %v7600_v50, %v6559_v49  ;;  %v3745_v55 = vadd.f32 %v3744_v18, %v8524_v59  ;;  %v5759_v49 = vld [vmem:[#allocation7 + $0x590] sm:$0xf] }
 0x198   : > { %v7715_v5 = vld [vmem:[#allocation7 + $0xf8c] sm:$0xf]  ;;  %v6716_v19 = vor.u32 %v7635_v63, %v6713_v2  ;;  %4029 = vmatpush.bf16.msrb.mxu3 %v7068_v3  ;;  %4043 = vmatpush.bf16.msra.mxu0 %v5280_v4  ;;  %v5184_v2 = vor.u32 %v7256_v1, %v5183_v42  ;;  %v5792_v42 = vor.u32 %v7408_v31, %v5791_v30  ;;  %v7232_v1 = vld [vmem:[#allocation7 + $0x6c] sm:$0xf0] }
 0x199   : > { %v7033_v10 = vld [vmem:[#allocation7 + $0xfa8] sm:$0xf0]  ;;  %4062 = vmatpush.bf16.msra.mxu1 %v5376_v13  ;;  %v7400_v50 = vld [vmem:[#allocation7 + $0x5ac] sm:$0xf0] }
 0x19a   : > { %v7627_v20 = vld [vmem:[#allocation7 + $0xccc] sm:$0xf]  ;;  %v7036_v25 = vor.u32 %v7715_v5, %v7033_v10  ;;  %4018 = vmatpush.bf16.msrb.mxu2 %v6716_v19  ;;  %v5151_v5 = vld [vmem:[#allocation7 + $0xd0] sm:$0xf] }
 0x19b   : > { %v6681_v22 = vld [vmem:[#allocation7 + $0xce8] sm:$0xf0]  ;;  %v7592_v10 = vld [vmem:[#allocation7 + $0xbac] sm:$0xf0]  ;;  %v5152_v19 = vor.u32 %v7248_v7, %v5151_v5 }
 0x19c   : > { %v7707_v27 = vld [vmem:[#allocation7 + $0xf4c] sm:$0xf]  ;;  %v6684_v37 = vor.u32 %v7627_v20, %v6681_v22  ;;  %4030 = vmatpush.bf16.msrb.mxu3 %v7036_v25  ;;  %4044 = vmatpush.bf16.msra.mxu0 %v5248_v26  ;;  %v6528_v8 = vor.u32 %v7592_v10, %v6527_v6  ;;  %v5119_v25 = vld [vmem:[#allocation7 + $0x90] sm:$0xf] }
 0x19d   : > { %v7001_v28 = vld [vmem:[#allocation7 + $0xf68] sm:$0xf0]  ;;  %4063 = vmatpush.bf16.msra.mxu1 %v5344_v36  ;;  %v7240_v26 = vld [vmem:[#allocation7 + $0xac] sm:$0xf0]  ;;  %v3758_v29 = vpop.f32.mrf.mxu3 }
 0x19e   : > { %v7619_v33 = vld [vmem:[#allocation7 + $0xc8c] sm:$0xf]  ;;  %v7004_v12 = vor.u32 %v7707_v27, %v7001_v28  ;;  %4019 = vmatpush.bf16.msrb.mxu2 %v6684_v37  ;;  %v6495_v27 = vld [vmem:[#allocation7 + $0xb50] sm:$0xf]  ;;  %v3772_v37 = vpop.f32.mrf.mxu0 }
 0x19f   : > { %v6649_v38 = vld [vmem:[#allocation7 + $0xca8] sm:$0xf0]  ;;  %v7584_v28 = vld [vmem:[#allocation7 + $0xb6c] sm:$0xf0] }
 0x1a0   : > { %v7699_v39 = vld [vmem:[#allocation7 + $0xf0c] sm:$0xf]  ;;  %v6652_v60 = vor.u32 %v7619_v33, %v6649_v38  ;;  %4031 = vmatpush.bf16.msrb.mxu3 %v7004_v12  ;;  %4045 = vmatpush.bf16.msra.mxu0 %v5216_v41  ;;  %v6496_v32 = vor.u32 %v7584_v28, %v6495_v27  ;;  %v3759_v33 = vadd.f32 %v3758_v29, %v3745_v55  ;;  %v7576_v18 = vld [vmem:[#allocation7 + $0xb2c] sm:$0xf0] }
 0x1a1   : > { %v6969_v40 = vld [vmem:[#allocation7 + $0xf28] sm:$0xf0]  ;;  %4064 = vmatpush.bf16.msra.mxu1 %v5312_v24  ;;  %v6463_v24 = vld [vmem:[#allocation7 + $0xb10] sm:$0xf] }
 0x1a2   : > { %v7611_v61 = vld [vmem:[#allocation7 + $0xc4c] sm:$0xf]  ;;  %v6972_v63 = vor.u32 %v7699_v39, %v6969_v40  ;;  %4020 = vmatpush.bf16.msrb.mxu2 %v6652_v60  ;;  %v5120_v39 = vor.u32 %v7240_v26, %v5119_v25  ;;  %v3786_v40 = vpop.f32.mrf.mxu1  ;;  %v3773_v44 = vadd.f32 %v3772_v37, %v3759_v33  ;;  %v6464_v60 = vor.u32 %v7576_v18, %v6463_v24  ;;  %v5727_v5 = vld [vmem:[#allocation7 + $0x550] sm:$0xf]  ;;  %v8543_v33 = vpop.f32.mrf.mxu2 }
 0x1a3   : > { %v6617_v62 = vld [vmem:[#allocation7 + $0xc68] sm:$0xf0]  ;;  %v6431_v7 = vld [vmem:[#allocation7 + $0xad0] sm:$0xf] }
 0x1a4   : > { %v7691_v3 = vld [vmem:[#allocation7 + $0xecc] sm:$0xf]  ;;  %v6620_v11 = vor.u32 %v7611_v61, %v6617_v62  ;;  %4032 = vmatpush.bf16.msrb.mxu3 %v6972_v63  ;;  %4046 = vmatpush.bf16.msra.mxu0 %v5184_v2  ;;  %v5088_v62 = vor.u32 %v7232_v1, %v5087_v45  ;;  %v5055_v2 = vld [vmem:[#allocation7 + $0x10] sm:$0xf] }
 0x1a5   : > { %v6937_v4 = vld [vmem:[#allocation7 + $0xee8] sm:$0xf0]  ;;  %4113 = vmatpush.bf16.msrb.mxu1 %v6560_v54  ;;  %v8540_v54 = vadd.f32 %v3786_v40, %v3773_v44  ;;  %v7568_v6 = vld [vmem:[#allocation7 + $0xaec] sm:$0xf0] }
 0x1a6   : > { %v7603_v13 = vld [vmem:[#allocation7 + $0xc0c] sm:$0xf]  ;;  %v6940_v15 = vor.u32 %v7691_v3, %v6937_v4  ;;  %4065 = vmatmul.bf16.vlgmr.msra.gmra.mxu1 %v8453_v43  ;;  %4021 = vmatpush.bf16.msrb.mxu2 %v6620_v11  ;;  %v7224_v3 = vld [vmem:[#allocation7 + $0x2c] sm:$0xf0]  ;;  %v5760_v4 = vor.u32 %v7400_v50, %v5759_v49  ;;  %v8545_v44 = vpop.f32.mrf.mxu0 }
 0x1a7   : > { %v6585_v59 = vld [vmem:[#allocation7 + $0xc28] sm:$0xf0]  ;;  %v7392_v10 = vld [vmem:[#allocation7 + $0x56c] sm:$0xf0] }
 0x1a8   : > { %v7683_v20 = vld [vmem:[#allocation7 + $0xe8c] sm:$0xf]  ;;  %v6588_v36 = vor.u32 %v7603_v13, %v6585_v59  ;;  %4033 = vmatpush.bf16.msrb.mxu3 %v6940_v15  ;;  %4047 = vmatpush.bf16.msra.mxu0 %v5152_v19  ;;  %v7472_v11 = vld [vmem:[#allocation7 + $0x7ec] sm:$0xf0]  ;;  %v6432_v13 = vor.u32 %v7568_v6, %v6431_v7 }
 0x1a9   : > { %v6905_v22 = vld [vmem:[#allocation7 + $0xea8] sm:$0xf0]  ;;  %4114 = vmatpush.bf16.msrb.mxu1 %v6528_v8  ;;  %v6047_v8 = vld [vmem:[#allocation7 + $0x7d0] sm:$0xf] }
 0x1aa   : > { %v6908_v38 = vor.u32 %v7683_v20, %v6905_v22  ;;  %v7675_v12 = vld [vmem:[#allocation7 + $0xe4c] sm:$0xf]  ;;  %4022 = vmatpush.bf16.msrb.mxu2 %v6588_v36  ;;  %v6303_v59 = vld [vmem:[#allocation7 + $0x9d0] sm:$0xf]  ;;  %v5056_v20 = vor.u32 %v7224_v3, %v5055_v2  ;;  %v5728_v22 = vor.u32 %v7392_v10, %v5727_v5  ;;  %v6048_v25 = vor.u32 %v7472_v11, %v6047_v8  ;;  %v8547_v45 = vpop.f32.mrf.mxu1  ;;  %v7340_v8 = vld [vmem:[#allocation7 + $0x3d4] sm:$0xf] }
 0x1ab   : > { %v6873_v41 = vld [vmem:[#allocation7 + $0xe68] sm:$0xf0]  ;;  %v7536_v15 = vld [vmem:[#allocation7 + $0x9ec] sm:$0xf0]  ;;  %v5537_v11 = vld [vmem:[#allocation7 + $0x3f0] sm:$0xf0] }
 0x1ac   : > { %v7667_v55 = vld [vmem:[#allocation7 + $0xe0c] sm:$0xf]  ;;  %4034 = vmatpush.bf16.msrb.mxu3 %v6908_v38  ;;  %4048 = vmatpush.bf16.msra.mxu0 %v5120_v39  ;;  %v6876_v61 = vor.u32 %v7675_v12, %v6873_v41  ;;  %v5695_v26 = vld [vmem:[#allocation7 + $0x510] sm:$0xf]  ;;  %v6304_v29 = vor.u32 %v7536_v15, %v6303_v59 }
 0x1ad   : > { %4115 = vmatpush.bf16.msrb.mxu1 %v6496_v32  ;;  %v6841_v63 = vld [vmem:[#allocation7 + $0xe28] sm:$0xf0]  ;;  %4023 = vmatmul.bf16.vlgmr.msrb.gmra.mxu2 %v8441_v46  ;;  %v7384_v27 = vld [vmem:[#allocation7 + $0x52c] sm:$0xf0] }
 0x1ae   : > { %4071 = vmatpush.bf16.msra.mxu2 %v5792_v42  ;;  %v6844_v19 = vor.u32 %v7667_v55, %v6841_v63  ;;  %v6015_v28 = vld [vmem:[#allocation7 + $0x790] sm:$0xf]  ;;  %v5696_v39 = vor.u32 %v7384_v27, %v5695_v26 }
 0x1af   : > { %v7464_v30 = vld [vmem:[#allocation7 + $0x7ac] sm:$0xf0] }
 0x1b0   : > { %4035 = vmatpush.bf16.msrb.mxu3 %v6876_v61  ;;  %4049 = vmatpush.bf16.msra.mxu0 %v5088_v62  ;;  %v6399_v31 = vld [vmem:[#allocation7 + $0xa90] sm:$0xf]  ;;  %v6016_v40 = vor.u32 %v7464_v30, %v6015_v28 }
 0x1b1   : > { %4116 = vmatpush.bf16.msrb.mxu1 %v6464_v60  ;;  %v7560_v32 = vld [vmem:[#allocation7 + $0xaac] sm:$0xf0] }
 0x1b2   : > { %4072 = vmatpush.bf16.msra.mxu2 %v5760_v4  ;;  %v6271_v36 = vld [vmem:[#allocation7 + $0x990] sm:$0xf]  ;;  %v6400_v38 = vor.u32 %v7560_v32, %v6399_v31  ;;  %v3828_v32 = vpop.f32.mrf.mxu0 }
 0x1b3   : > { %v7528_v37 = vld [vmem:[#allocation7 + $0x9ac] sm:$0xf0] }
 0x1b4   : > { %4036 = vmatpush.bf16.msrb.mxu3 %v6844_v19  ;;  %4050 = vmatpush.bf16.msra.mxu0 %v5056_v20  ;;  %v5663_v12 = vld [vmem:[#allocation7 + $0x4d0] sm:$0xf]  ;;  %v6272_v1 = vor.u32 %v7528_v37, %v6271_v36  ;;  %v5540_v19 = vor.u32 %v7340_v8, %v5537_v11  ;;  %v8551_v20 = vpop.f32.mrf.mxu3  ;;  %v3842_v36 = vpop.f32.mrf.mxu1  ;;  %v7332_v37 = vld [vmem:[#allocation7 + $0x394] sm:$0xf] }
 0x1b5   : > { %4117 = vmatpush.bf16.msrb.mxu1 %v6432_v13  ;;  %v7376_v41 = vld [vmem:[#allocation7 + $0x4ec] sm:$0xf0]  ;;  %v3800_v13 = vpop.f32.mrf.mxu2 }
 0x1b6   : > { %4073 = vmatpush.bf16.msra.mxu2 %v5728_v22  ;;  %v5983_v42 = vld [vmem:[#allocation7 + $0x750] sm:$0xf]  ;;  %v5664_v63 = vor.u32 %v7376_v41, %v5663_v12  ;;  %v3801_v22 = vadd.f32 %v3800_v13, %v8540_v54  ;;  %v8554_v12 = vadd.f32 %v3842_v36, %v3828_v32 }
 0x1b7   : > { %v7456_v24 = vld [vmem:[#allocation7 + $0x76c] sm:$0xf0]  ;;  %4037 = vmatmul.bf16.vlgmr.msrb.gmra.mxu3 %v8484_v51  ;;  %4051 = vmatmul.bf16.vlgmr.msra.gmra.mxu0 %v8449_v35 }
 0x1b8   : > { %4085 = vmatpush.bf16.msra.mxu3 %v6048_v25  ;;  %4099 = vmatpush.bf16.msrb.mxu0 %v6304_v29  ;;  %v6367_v49 = vld [vmem:[#allocation7 + $0xa50] sm:$0xf]  ;;  %v5984_v2 = vor.u32 %v7456_v24, %v5983_v42 }
 0x1b9   : > { %4118 = vmatpush.bf16.msrb.mxu1 %v6400_v38  ;;  %v7552_v50 = vld [vmem:[#allocation7 + $0xa6c] sm:$0xf0]  ;;  %v5505_v38 = vld [vmem:[#allocation7 + $0x3b0] sm:$0xf0] }
 0x1ba   : > { %v6239_v18 = vld [vmem:[#allocation7 + $0x950] sm:$0xf]  ;;  %v6368_v60 = vor.u32 %v7552_v50, %v6367_v49  ;;  %4074 = vmatpush.bf16.msra.mxu2 %v5696_v39  ;;  %v5508_v54 = vor.u32 %v7332_v37, %v5505_v38  ;;  %v7308_v38 = vld [vmem:[#allocation7 + $0x2d4] sm:$0xf] }
 0x1bb   : > { %v7520_v55 = vld [vmem:[#allocation7 + $0x96c] sm:$0xf0] }
 0x1bc   : > { %v5631_v61 = vld [vmem:[#allocation7 + $0x490] sm:$0xf]  ;;  %4086 = vmatpush.bf16.msra.mxu3 %v6016_v40  ;;  %4100 = vmatpush.bf16.msrb.mxu0 %v6272_v1  ;;  %v6240_v7 = vor.u32 %v7520_v55, %v6239_v18 }
 0x1bd   : > { %v7368_v62 = vld [vmem:[#allocation7 + $0x4ac] sm:$0xf0]  ;;  %4119 = vmatpush.bf16.msrb.mxu1 %v6368_v60  ;;  %v7324_v60 = vld [vmem:[#allocation7 + $0x354] sm:$0xf] }
 0x1be   : > { %v5951_v3 = vld [vmem:[#allocation7 + $0x710] sm:$0xf]  ;;  %4075 = vmatpush.bf16.msra.mxu2 %v5664_v63  ;;  %v5632_v25 = vor.u32 %v7368_v62, %v5631_v61  ;;  %v5473_v61 = vld [vmem:[#allocation7 + $0x370] sm:$0xf0] }
 0x1bf   : > { %v6335_v4 = vld [vmem:[#allocation7 + $0xa10] sm:$0xf] }
 0x1c0   : > { %v7544_v5 = vld [vmem:[#allocation7 + $0xa2c] sm:$0xf0]  ;;  %4087 = vmatpush.bf16.msra.mxu3 %v5984_v2  ;;  %4101 = vmatpush.bf16.msrb.mxu0 %v6240_v7 }
 0x1c1   : > { %v7448_v6 = vld [vmem:[#allocation7 + $0x72c] sm:$0xf0]  ;;  %v6336_v10 = vor.u32 %v7544_v5, %v6335_v4  ;;  %v3814_v4 = vpop.f32.mrf.mxu3 }
 0x1c2   : > { %v6207_v59 = vld [vmem:[#allocation7 + $0x910] sm:$0xf]  ;;  %v5952_v26 = vor.u32 %v7448_v6, %v5951_v3  ;;  %4076 = vmatpush.bf16.msra.mxu2 %v5632_v25  ;;  %v5476_v3 = vor.u32 %v7324_v60, %v5473_v61  ;;  %v8557_v5 = vadd.f32 %v3814_v4, %v3801_v22  ;;  %v5377_v4 = vld [vmem:[#allocation7 + $0x2b0] sm:$0xf0] }
 0x1c3   : > { %v7512_v15 = vld [vmem:[#allocation7 + $0x92c] sm:$0xf0]  ;;  %4120 = vmatpush.bf16.msrb.mxu1 %v6336_v10 }
 0x1c4   : > { %v5599_v27 = vld [vmem:[#allocation7 + $0x450] sm:$0xf]  ;;  %v6208_v30 = vor.u32 %v7512_v15, %v6207_v59  ;;  %4088 = vmatpush.bf16.msra.mxu3 %v5952_v26 }
 0x1c5   : > { %v7360_v28 = vld [vmem:[#allocation7 + $0x46c] sm:$0xf0] }
 0x1c6   : > { %v5919_v29 = vld [vmem:[#allocation7 + $0x6d0] sm:$0xf]  ;;  %v5600_v42 = vor.u32 %v7360_v28, %v5599_v27  ;;  %4102 = vmatpush.bf16.msrb.mxu0 %v6208_v30  ;;  %4121 = vmatmul.bf16.vlgmr.msrb.gmra.mxu1 %v8425_v23  ;;  %v5441_v27 = vld [vmem:[#allocation7 + $0x330] sm:$0xf0] }
 0x1c7   : > { %v7440_v31 = vld [vmem:[#allocation7 + $0x6ec] sm:$0xf0]  ;;  %4169 = vmatpush.bf16.msra.mxu1 %v5540_v19  ;;  %v7316_v19 = vld [vmem:[#allocation7 + $0x314] sm:$0xf] }
 0x1c8   : > { %v6175_v39 = vld [vmem:[#allocation7 + $0x8d0] sm:$0xf]  ;;  %v5920_v1 = vor.u32 %v7440_v31, %v5919_v29  ;;  %4077 = vmatpush.bf16.msra.mxu2 %v5600_v42  ;;  %v5444_v28 = vor.u32 %v7316_v19, %v5441_v27 }
 0x1c9   : > { %v7504_v40 = vld [vmem:[#allocation7 + $0x8ec] sm:$0xf0] }
 0x1ca   : > { %v5567_v41 = vld [vmem:[#allocation7 + $0x410] sm:$0xf]  ;;  %v6176_v18 = vor.u32 %v7504_v40, %v6175_v39  ;;  %4089 = vmatpush.bf16.msra.mxu3 %v5920_v1  ;;  %v5409_v39 = vld [vmem:[#allocation7 + $0x2f0] sm:$0xf0] }
 0x1cb   : > { %v7352_v24 = vld [vmem:[#allocation7 + $0x42c] sm:$0xf0]  ;;  %4170 = vmatpush.bf16.msra.mxu1 %v5508_v54  ;;  %v5412_v42 = vor.u32 %v7308_v38, %v5409_v39 }
 0x1cc   : > { %v5887_v49 = vld [vmem:[#allocation7 + $0x690] sm:$0xf]  ;;  %v5568_v7 = vor.u32 %v7352_v24, %v5567_v41  ;;  %4103 = vmatpush.bf16.msrb.mxu0 %v6176_v18  ;;  %v7276_v24 = vld [vmem:[#allocation7 + $0x1d4] sm:$0xf] }
 0x1cd   : > { %v7432_v50 = vld [vmem:[#allocation7 + $0x6ac] sm:$0xf0] }
 0x1ce   : > { %v6143_v55 = vld [vmem:[#allocation7 + $0x890] sm:$0xf]  ;;  %v5888_v6 = vor.u32 %v7432_v50, %v5887_v49  ;;  %4078 = vmatpush.bf16.msra.mxu2 %v5568_v7  ;;  %v5281_v49 = vld [vmem:[#allocation7 + $0x1f0] sm:$0xf0] }
 0x1cf   : > { %v7496_v62 = vld [vmem:[#allocation7 + $0x8ac] sm:$0xf0]  ;;  %4171 = vmatpush.bf16.msra.mxu1 %v5476_v3  ;;  %v7300_v3 = vld [vmem:[#allocation7 + $0x294] sm:$0xf] }
 0x1d0   : > { %v6815_v63 = vld [vmem:[#allocation7 + $0xdd0] sm:$0xf]  ;;  %v6144_v11 = vor.u32 %v7496_v62, %v6143_v55  ;;  %4090 = vmatpush.bf16.msra.mxu3 %v5888_v6  ;;  %v7268_v6 = vld [vmem:[#allocation7 + $0x194] sm:$0xf] }
 0x1d1   : > { %v7664_v2 = vld [vmem:[#allocation7 + $0xdec] sm:$0xf0]  ;;  %4079 = vmatmul.bf16.vlgmr.msra.gmra.mxu2 %v8463_v21 }
 0x1d2   : > { %v5855_v10 = vld [vmem:[#allocation7 + $0x650] sm:$0xf]  ;;  %v6816_v13 = vor.u32 %v7664_v2, %v6815_v63  ;;  %4104 = vmatpush.bf16.msrb.mxu0 %v6144_v11  ;;  %v5284_v63 = vor.u32 %v7276_v24, %v5281_v49  ;;  %v8560_v11 = vpop.f32.mrf.mxu2  ;;  %v7284_v24 = vld [vmem:[#allocation7 + $0x214] sm:$0xf] }
 0x1d3   : > { %v7424_v8 = vld [vmem:[#allocation7 + $0x66c] sm:$0xf0]  ;;  %4172 = vmatpush.bf16.msra.mxu1 %v5444_v28  ;;  %v7260_v28 = vld [vmem:[#allocation7 + $0x154] sm:$0xf] }
 0x1d4   : > { %v6111_v59 = vld [vmem:[#allocation7 + $0x850] sm:$0xf]  ;;  %v5856_v29 = vor.u32 %v7424_v8, %v5855_v10  ;;  %4127 = vmatpush.bf16.msrb.mxu2 %v6816_v13  ;;  %v5249_v10 = vld [vmem:[#allocation7 + $0x1b0] sm:$0xf0]  ;;  %v5380_v8 = vor.u32 %v7300_v3, %v5377_v4 }
 0x1d5   : > { %v7488_v15 = vld [vmem:[#allocation7 + $0x86c] sm:$0xf0]  ;;  %v5313_v49 = vld [vmem:[#allocation7 + $0x230] sm:$0xf0] }
 0x1d6   : > { %v6783_v25 = vld [vmem:[#allocation7 + $0xd90] sm:$0xf]  ;;  %v6112_v32 = vor.u32 %v7488_v15, %v6111_v59  ;;  %4091 = vmatpush.bf16.msra.mxu3 %v5856_v29  ;;  %v5217_v29 = vld [vmem:[#allocation7 + $0x170] sm:$0xf0] }
 0x1d7   : > { %v7656_v26 = vld [vmem:[#allocation7 + $0xdac] sm:$0xf0]  ;;  %4173 = vmatpush.bf16.msra.mxu1 %v5412_v42  ;;  %v5220_v42 = vor.u32 %v7260_v28, %v5217_v29 }
 0x1d8   : > { %v5823_v22 = vld [vmem:[#allocation7 + $0x610] sm:$0xf]  ;;  %v6784_v36 = vor.u32 %v7656_v26, %v6783_v25  ;;  %4105 = vmatpush.bf16.msrb.mxu0 %v6112_v32  ;;  %v5252_v25 = vor.u32 %v7268_v6, %v5249_v10 }
 0x1d9   : > { %v7416_v30 = vld [vmem:[#allocation7 + $0x62c] sm:$0xf0] }
 0x1da   : > { %v6079_v31 = vld [vmem:[#allocation7 + $0x810] sm:$0xf]  ;;  %v5824_v50 = vor.u32 %v7416_v30, %v5823_v22  ;;  %4128 = vmatpush.bf16.msrb.mxu2 %v6784_v36  ;;  %v7292_v22 = vld [vmem:[#allocation7 + $0x254] sm:$0xf] }
 0x1db   : > { %v7480_v37 = vld [vmem:[#allocation7 + $0x82c] sm:$0xf0]  ;;  %4174 = vmatpush.bf16.msra.mxu1 %v5380_v8  ;;  %v5345_v30 = vld [vmem:[#allocation7 + $0x270] sm:$0xf0] }
 0x1dc   : > { %v6751_v40 = vld [vmem:[#allocation7 + $0xd50] sm:$0xf]  ;;  %v6080_v18 = vor.u32 %v7480_v37, %v6079_v31  ;;  %4092 = vmatpush.bf16.msra.mxu3 %v5824_v50  ;;  %v5348_v32 = vor.u32 %v7292_v22, %v5345_v30  ;;  %v5185_v50 = vld [vmem:[#allocation7 + $0x130] sm:$0xf0] }
 0x1dd   : > { %v7648_v54 = vld [vmem:[#allocation7 + $0xd6c] sm:$0xf0] }
 0x1de   : > { %v7071_v41 = vld [vmem:[#allocation7 + $0xfd0] sm:$0xf]  ;;  %v6752_v55 = vor.u32 %v7648_v54, %v6751_v40  ;;  %4106 = vmatpush.bf16.msrb.mxu0 %v6080_v18  ;;  %v8564_v40 = vpop.f32.mrf.mxu1  ;;  %v8566_v54 = vpop.f32.mrf.mxu0  ;;  %v5316_v18 = vor.u32 %v7284_v24, %v5313_v49  ;;  %v5793_v24 = vld [vmem:[#allocation7 + $0x5f0] sm:$0xf0] }
 0x1df   : > { %v7728_v1 = vld [vmem:[#allocation7 + $0xfec] sm:$0xf0]  ;;  %4093 = vmatmul.bf16.vlgmr.msra.gmra.mxu3 %v8470_v52  ;;  %4175 = vmatpush.bf16.msra.mxu1 %v5348_v32  ;;  %v7236_v32 = vld [vmem:[#allocation7 + $0x94] sm:$0xf] }
 0x1e0   : > { %v6719_v60 = vld [vmem:[#allocation7 + $0xd10] sm:$0xf]  ;;  %v7072_v62 = vor.u32 %v7728_v1, %v7071_v41  ;;  %4129 = vmatpush.bf16.msrb.mxu2 %v6752_v55  ;;  %v7252_v1 = vld [vmem:[#allocation7 + $0x114] sm:$0xf] }
 0x1e1   : > { %v7640_v61 = vld [vmem:[#allocation7 + $0xd2c] sm:$0xf0]  ;;  %4107 = vmatmul.bf16.vlgmr.msrb.gmra.mxu0 %v8472_v53  ;;  %v7596_v55 = vld [vmem:[#allocation7 + $0xbd4] sm:$0xf]  ;;  %v5188_v10 = vor.u32 %v7252_v1, %v5185_v50 }
 0x1e2   : > { %v7039_v2 = vld [vmem:[#allocation7 + $0xf90] sm:$0xf]  ;;  %v6720_v13 = vor.u32 %v7640_v61, %v6719_v60  ;;  %4141 = vmatpush.bf16.msrb.mxu3 %v7072_v62  ;;  %4155 = vmatpush.bf16.msra.mxu0 %v5284_v63  ;;  %v6561_v60 = vld [vmem:[#allocation7 + $0xbf0] sm:$0xf0]  ;;  %v8568_v61 = vpop.f32.mrf.mxu3  ;;  %v3856_v62 = vpop.f32.mrf.mxu2 }
 0x1e3   : > { %v7720_v7 = vld [vmem:[#allocation7 + $0xfac] sm:$0xf0]  ;;  %v6564_v63 = vor.u32 %v7596_v55, %v6561_v60  ;;  %4176 = vmatpush.bf16.msra.mxu1 %v5316_v18  ;;  %v7404_v1 = vld [vmem:[#allocation7 + $0x5d4] sm:$0xf] }
 0x1e4   : > { %v6687_v59 = vld [vmem:[#allocation7 + $0xcd0] sm:$0xf]  ;;  %v7040_v19 = vor.u32 %v7720_v7, %v7039_v2  ;;  %4130 = vmatpush.bf16.msrb.mxu2 %v6720_v13  ;;  %v3857_v2 = vadd.f32 %v3856_v62, %v8554_v12 }
 0x1e5   : > { %v7632_v15 = vld [vmem:[#allocation7 + $0xcec] sm:$0xf0] }
 0x1e6   : > { %v7007_v26 = vld [vmem:[#allocation7 + $0xf50] sm:$0xf]  ;;  %v6688_v36 = vor.u32 %v7632_v15, %v6687_v59  ;;  %4142 = vmatpush.bf16.msrb.mxu3 %v7040_v19  ;;  %4156 = vmatpush.bf16.msra.mxu0 %v5252_v25  ;;  %v7244_v59 = vld [vmem:[#allocation7 + $0xd4] sm:$0xf] }
 0x1e7   : > { %v7712_v27 = vld [vmem:[#allocation7 + $0xf6c] sm:$0xf0]  ;;  %v5153_v15 = vld [vmem:[#allocation7 + $0xf0] sm:$0xf0]  ;;  %4225 = vmatpush.bf16.msrb.mxu1 %v6564_v63 }
 0x1e8   : > { %v6655_v31 = vld [vmem:[#allocation7 + $0xc90] sm:$0xf]  ;;  %v7008_v41 = vor.u32 %v7712_v27, %v7007_v26  ;;  %4131 = vmatpush.bf16.msrb.mxu2 %v6688_v36  ;;  %v7588_v19 = vld [vmem:[#allocation7 + $0xb94] sm:$0xf]  ;;  %v5156_v22 = vor.u32 %v7244_v59, %v5153_v15  ;;  %4177 = vmatmul.bf16.vlgmr.msra.gmra.mxu1 %v8453_v43 }
 0x1e9   : > { %v7624_v37 = vld [vmem:[#allocation7 + $0xcac] sm:$0xf0]  ;;  %v6529_v25 = vld [vmem:[#allocation7 + $0xbb0] sm:$0xf0] }
 0x1ea   : > { %v6975_v38 = vld [vmem:[#allocation7 + $0xf10] sm:$0xf]  ;;  %v6656_v3 = vor.u32 %v7624_v37, %v6655_v31  ;;  %4143 = vmatpush.bf16.msrb.mxu3 %v7008_v41  ;;  %4157 = vmatpush.bf16.msra.mxu0 %v5220_v42  ;;  %v6532_v26 = vor.u32 %v7588_v19, %v6529_v25  ;;  %v5121_v36 = vld [vmem:[#allocation7 + $0xb0] sm:$0xf0]  ;;  %v3898_v37 = vpop.f32.mrf.mxu1  ;;  %v3884_v41 = vpop.f32.mrf.mxu0 }
 0x1eb   : > { %v7704_v39 = vld [vmem:[#allocation7 + $0xf2c] sm:$0xf0]  ;;  %v3870_v42 = vpop.f32.mrf.mxu3  ;;  %v5124_v60 = vor.u32 %v7236_v32, %v5121_v36  ;;  %v7396_v59 = vld [vmem:[#allocation7 + $0x594] sm:$0xf] }
 0x1ec   : > { %v6623_v4 = vld [vmem:[#allocation7 + $0xc50] sm:$0xf]  ;;  %v6976_v6 = vor.u32 %v7704_v39, %v6975_v38  ;;  %4132 = vmatpush.bf16.msrb.mxu2 %v6656_v3  ;;  %v7580_v38 = vld [vmem:[#allocation7 + $0xb54] sm:$0xf]  ;;  %4226 = vmatpush.bf16.msrb.mxu1 %v6532_v26  ;;  %v3871_v50 = vadd.f32 %v3870_v42, %v3857_v2  ;;  %v3845_v3 = vadd.f32 %v8564_v40, %v8566_v54 }
 0x1ed   : > { %v7616_v7 = vld [vmem:[#allocation7 + $0xc6c] sm:$0xf0]  ;;  %v6497_v39 = vld [vmem:[#allocation7 + $0xb70] sm:$0xf0] }
 0x1ee   : > { %v6943_v8 = vld [vmem:[#allocation7 + $0xed0] sm:$0xf]  ;;  %v6624_v27 = vor.u32 %v7616_v7, %v6623_v4  ;;  %4144 = vmatpush.bf16.msrb.mxu3 %v6976_v6  ;;  %4158 = vmatpush.bf16.msra.mxu0 %v5188_v10  ;;  %v6500_v49 = vor.u32 %v7580_v38, %v6497_v39  ;;  %v3885_v4 = vadd.f32 %v3884_v41, %v3871_v50  ;;  %v7228_v6 = vld [vmem:[#allocation7 + $0x54] sm:$0xf] }
 0x1ef   : > { %v7696_v13 = vld [vmem:[#allocation7 + $0xeec] sm:$0xf0]  ;;  %v5796_v7 = vor.u32 %v7404_v1, %v5793_v24  ;;  %v5089_v10 = vld [vmem:[#allocation7 + $0x70] sm:$0xf0] }
 0x1f0   : > { %v6591_v28 = vld [vmem:[#allocation7 + $0xc10] sm:$0xf]  ;;  %v6944_v29 = vor.u32 %v7696_v13, %v6943_v8  ;;  %4133 = vmatpush.bf16.msrb.mxu2 %v6624_v27  ;;  %v7572_v8 = vld [vmem:[#allocation7 + $0xb14] sm:$0xf]  ;;  %v3858_v13 = vpop.f32.mrf.mxu2  ;;  %4227 = vmatpush.bf16.msrb.mxu1 %v6500_v49  ;;  %v8574_v19 = vadd.f32 %v3898_v37, %v3885_v4 }
 0x1f1   : > { %v7608_v12 = vld [vmem:[#allocation7 + $0xc2c] sm:$0xf0]  ;;  %v5761_v15 = vld [vmem:[#allocation7 + $0x5b0] sm:$0xf0] }
 0x1f2   : > { %v6911_v30 = vld [vmem:[#allocation7 + $0xe90] sm:$0xf]  ;;  %v6592_v18 = vor.u32 %v7608_v12, %v6591_v28  ;;  %4145 = vmatpush.bf16.msrb.mxu3 %v6944_v29  ;;  %4159 = vmatpush.bf16.msra.mxu0 %v5156_v22  ;;  %v6465_v2 = vld [vmem:[#allocation7 + $0xb30] sm:$0xf0]  ;;  %v5092_v28 = vor.u32 %v7228_v6, %v5089_v10  ;;  %v3859_v29 = vadd.f32 %v3858_v13, %v3845_v3  ;;  %v3886_v49 = vpop.f32.mrf.mxu0 }
 0x1f3   : > { %v7688_v31 = vld [vmem:[#allocation7 + $0xeac] sm:$0xf0]  ;;  %v6468_v26 = vor.u32 %v7572_v8, %v6465_v2  ;;  %v7220_v54 = vld [vmem:[#allocation7 + $0x14] sm:$0xf]  ;;  %v5764_v22 = vor.u32 %v7396_v59, %v5761_v15  ;;  %v3872_v36 = vpop.f32.mrf.mxu3 }
 0x1f4   : > { %v6912_v55 = vor.u32 %v7688_v31, %v6911_v30  ;;  %v6879_v62 = vld [vmem:[#allocation7 + $0xe50] sm:$0xf]  ;;  %4134 = vmatpush.bf16.msrb.mxu2 %v6592_v18  ;;  %v5057_v12 = vld [vmem:[#allocation7 + $0x30] sm:$0xf0]  ;;  %v3873_v42 = vadd.f32 %v3872_v36, %v3859_v29 }
 0x1f5   : > { %v7680_v63 = vld [vmem:[#allocation7 + $0xe6c] sm:$0xf0]  ;;  %v7388_v30 = vld [vmem:[#allocation7 + $0x554] sm:$0xf]  ;;  %4228 = vmatpush.bf16.msrb.mxu1 %v6468_v26  ;;  %v5060_v18 = vor.u32 %v7220_v54, %v5057_v12 }
 0x1f6   : > { %v6847_v25 = vld [vmem:[#allocation7 + $0xe10] sm:$0xf]  ;;  %4146 = vmatpush.bf16.msrb.mxu3 %v6912_v55  ;;  %4160 = vmatpush.bf16.msra.mxu0 %v5124_v60  ;;  %v6880_v27 = vor.u32 %v7680_v63, %v6879_v62  ;;  %v7564_v31 = vld [vmem:[#allocation7 + $0xad4] sm:$0xf]  ;;  %v3900_v55 = vpop.f32.mrf.mxu1  ;;  %v3887_v60 = vadd.f32 %v3886_v49, %v3873_v42 }
 0x1f7   : > { %v7672_v40 = vld [vmem:[#allocation7 + $0xe2c] sm:$0xf0]  ;;  %v6433_v32 = vld [vmem:[#allocation7 + $0xaf0] sm:$0xf0]  ;;  %4135 = vmatmul.bf16.vlgmr.msrb.gmra.mxu2 %v8441_v46 }
 0x1f8   : > { %4183 = vmatpush.bf16.msra.mxu2 %v5796_v7  ;;  %v5729_v37 = vld [vmem:[#allocation7 + $0x570] sm:$0xf0]  ;;  %v6436_v41 = vor.u32 %v7564_v31, %v6433_v32  ;;  %v6848_v50 = vor.u32 %v7672_v40, %v6847_v25  ;;  %v8577_v59 = vadd.f32 %v3900_v55, %v3887_v60  ;;  %v5543_v55 = vld [vmem:[#allocation7 + $0x3d8] sm:$0xf] }
 0x1f9   : > { %v7468_v38 = vld [vmem:[#allocation7 + $0x7d4] sm:$0xf]  ;;  %v5732_v62 = vor.u32 %v7388_v30, %v5729_v37  ;;  %v7345_v60 = vld [vmem:[#allocation7 + $0x3f4] sm:$0xf0] }
 0x1fa   : > { %v6049_v39 = vld [vmem:[#allocation7 + $0x7f0] sm:$0xf0]  ;;  %4147 = vmatpush.bf16.msrb.mxu3 %v6880_v27  ;;  %4161 = vmatpush.bf16.msra.mxu0 %v5092_v28 }
 0x1fb   : > { %v7532_v1 = vld [vmem:[#allocation7 + $0x9d4] sm:$0xf]  ;;  %v6052_v63 = vor.u32 %v7468_v38, %v6049_v39  ;;  %4229 = vmatpush.bf16.msrb.mxu1 %v6436_v41 }
 0x1fc   : > { %v6305_v24 = vld [vmem:[#allocation7 + $0x9f0] sm:$0xf0]  ;;  %4184 = vmatpush.bf16.msra.mxu2 %v5764_v22 }
 0x1fd   : > { %v7380_v3 = vld [vmem:[#allocation7 + $0x514] sm:$0xf]  ;;  %v6308_v6 = vor.u32 %v7532_v1, %v6305_v24 }
 0x1fe   : > { %v5697_v4 = vld [vmem:[#allocation7 + $0x530] sm:$0xf0]  ;;  %4148 = vmatpush.bf16.msrb.mxu3 %v6848_v50  ;;  %4162 = vmatpush.bf16.msra.mxu0 %v5060_v18 }
 0x1ff   : > { %v7460_v7 = vld [vmem:[#allocation7 + $0x794] sm:$0xf]  ;;  %v5700_v25 = vor.u32 %v7380_v3, %v5697_v4  ;;  %v5544_v4 = vor.u32 %v7345_v60, %v5543_v55  ;;  %v3926_v60 = vpop.f32.mrf.mxu3 }
 0x200   : > { %v6017_v10 = vld [vmem:[#allocation7 + $0x7b0] sm:$0xf0]  ;;  %4185 = vmatpush.bf16.msra.mxu2 %v5732_v62  ;;  %v3912_v62 = vpop.f32.mrf.mxu2 }
 0x201   : > { %v7556_v8 = vld [vmem:[#allocation7 + $0xa94] sm:$0xf]  ;;  %v6020_v27 = vor.u32 %v7460_v7, %v6017_v10  ;;  %4149 = vmatmul.bf16.vlgmr.msrb.gmra.mxu3 %v8484_v51  ;;  %4163 = vmatmul.bf16.vlgmr.msra.gmra.mxu0 %v8449_v35  ;;  %v3913_v7 = vadd.f32 %v3912_v62, %v8574_v19 }
 0x202   : > { %v6401_v13 = vld [vmem:[#allocation7 + $0xab0] sm:$0xf0]  ;;  %4197 = vmatpush.bf16.msra.mxu3 %v6052_v63  ;;  %4211 = vmatpush.bf16.msrb.mxu0 %v6308_v6  ;;  %v3954_v6 = vpop.f32.mrf.mxu1 }
 0x203   : > { %v7524_v15 = vld [vmem:[#allocation7 + $0x994] sm:$0xf]  ;;  %v6404_v26 = vor.u32 %v7556_v8, %v6401_v13  ;;  %v8586_v62 = vadd.f32 %v3926_v60, %v3913_v7 }
 0x204   : > { %v6273_v2 = vld [vmem:[#allocation7 + $0x9b0] sm:$0xf0]  ;;  %4186 = vmatpush.bf16.msra.mxu2 %v5700_v25 }
 0x205   : > { %v7372_v28 = vld [vmem:[#allocation7 + $0x4d4] sm:$0xf]  ;;  %v6276_v12 = vor.u32 %v7524_v15, %v6273_v2  ;;  %4230 = vmatpush.bf16.msrb.mxu1 %v6404_v26 }
 0x206   : > { %v5665_v40 = vld [vmem:[#allocation7 + $0x4f0] sm:$0xf0]  ;;  %4198 = vmatpush.bf16.msra.mxu3 %v6020_v27  ;;  %v3940_v27 = vpop.f32.mrf.mxu0 }
 0x207   : > { %v7452_v54 = vld [vmem:[#allocation7 + $0x754] sm:$0xf]  ;;  %v5668_v39 = vor.u32 %v7372_v28, %v5665_v40  ;;  %4212 = vmatpush.bf16.msrb.mxu0 %v6276_v12  ;;  %v5511_v28 = vld [vmem:[#allocation7 + $0x398] sm:$0xf] }
 0x208   : > { %v5985_v29 = vld [vmem:[#allocation7 + $0x770] sm:$0xf0]  ;;  %v7337_v40 = vld [vmem:[#allocation7 + $0x3b4] sm:$0xf0] }
 0x209   : > { %v7548_v22 = vld [vmem:[#allocation7 + $0xa54] sm:$0xf]  ;;  %v5988_v41 = vor.u32 %v7452_v54, %v5985_v29  ;;  %4187 = vmatpush.bf16.msra.mxu2 %v5668_v39  ;;  %v8582_v29 = vadd.f32 %v3954_v6, %v3940_v27  ;;  %v5512_v19 = vor.u32 %v7337_v40, %v5511_v28  ;;  %v7321_v40 = vld [vmem:[#allocation7 + $0x334] sm:$0xf0] }
 0x20a   : > { %v6369_v30 = vld [vmem:[#allocation7 + $0xa70] sm:$0xf0] }
 0x20b   : > { %v7516_v31 = vld [vmem:[#allocation7 + $0x954] sm:$0xf]  ;;  %v6372_v36 = vor.u32 %v7548_v22, %v6369_v30  ;;  %4199 = vmatpush.bf16.msra.mxu3 %v5988_v41  ;;  %v5479_v41 = vld [vmem:[#allocation7 + $0x358] sm:$0xf] }
 0x20c   : > { %v6241_v32 = vld [vmem:[#allocation7 + $0x970] sm:$0xf0] }
 0x20d   : > { %v7364_v37 = vld [vmem:[#allocation7 + $0x494] sm:$0xf]  ;;  %v6244_v49 = vor.u32 %v7516_v31, %v6241_v32  ;;  %4231 = vmatpush.bf16.msrb.mxu1 %v6372_v36 }
 0x20e   : > { %v5633_v38 = vld [vmem:[#allocation7 + $0x4b0] sm:$0xf0] }
 0x20f   : > { %v7444_v42 = vld [vmem:[#allocation7 + $0x714] sm:$0xf]  ;;  %v5636_v10 = vor.u32 %v7364_v37, %v5633_v38  ;;  %4213 = vmatpush.bf16.msrb.mxu0 %v6244_v49 }
 0x210   : > { %v7540_v1 = vld [vmem:[#allocation7 + $0xa14] sm:$0xf] }
 0x211   : > { %v6337_v24 = vld [vmem:[#allocation7 + $0xa30] sm:$0xf0]  ;;  %4188 = vmatpush.bf16.msra.mxu2 %v5636_v10 }
 0x212   : > { %v5953_v50 = vld [vmem:[#allocation7 + $0x730] sm:$0xf0]  ;;  %v6340_v18 = vor.u32 %v7540_v1, %v6337_v24  ;;  %v3914_v1 = vpop.f32.mrf.mxu2 }
 0x213   : > { %v7508_v63 = vld [vmem:[#allocation7 + $0x914] sm:$0xf]  ;;  %v5956_v8 = vor.u32 %v7444_v42, %v5953_v50  ;;  %v7329_v42 = vld [vmem:[#allocation7 + $0x374] sm:$0xf0]  ;;  %v3915_v55 = vadd.f32 %v3914_v1, %v8577_v59  ;;  %v3928_v1 = vpop.f32.mrf.mxu3 }
 0x214   : > { %v6209_v3 = vld [vmem:[#allocation7 + $0x930] sm:$0xf0]  ;;  %4232 = vmatpush.bf16.msrb.mxu1 %v6340_v18  ;;  %v5480_v18 = vor.u32 %v7329_v42, %v5479_v41 }
 0x215   : > { %v7356_v13 = vld [vmem:[#allocation7 + $0x454] sm:$0xf]  ;;  %v6212_v26 = vor.u32 %v7508_v63, %v6209_v3  ;;  %4200 = vmatpush.bf16.msra.mxu3 %v5956_v8 }
 0x216   : > { %v5601_v15 = vld [vmem:[#allocation7 + $0x470] sm:$0xf0] }
 0x217   : > { %v7436_v2 = vld [vmem:[#allocation7 + $0x6d4] sm:$0xf]  ;;  %v5604_v30 = vor.u32 %v7356_v13, %v5601_v15  ;;  %4214 = vmatpush.bf16.msrb.mxu0 %v6212_v26  ;;  %4233 = vmatmul.bf16.vlgmr.msrb.gmra.mxu1 %v8425_v23  ;;  %v3956_v26 = vpop.f32.mrf.mxu1 }
 0x218   : > { %v5921_v25 = vld [vmem:[#allocation7 + $0x6f0] sm:$0xf0]  ;;  %4281 = vmatpush.bf16.msra.mxu1 %v5544_v4 }
 0x219   : > { %v7500_v54 = vld [vmem:[#allocation7 + $0x8d4] sm:$0xf]  ;;  %v5924_v31 = vor.u32 %v7436_v2, %v5921_v25  ;;  %4189 = vmatpush.bf16.msra.mxu2 %v5604_v30  ;;  %v3942_v2 = vpop.f32.mrf.mxu0  ;;  %v5447_v25 = vld [vmem:[#allocation7 + $0x318] sm:$0xf] }
 0x21a   : > { %v6177_v12 = vld [vmem:[#allocation7 + $0x8f0] sm:$0xf0]  ;;  %v8588_v59 = vadd.f32 %v3956_v26, %v3942_v2  ;;  %v5448_v7 = vor.u32 %v7321_v40, %v5447_v25  ;;  %v7305_v2 = vld [vmem:[#allocation7 + $0x2b4] sm:$0xf0] }
 0x21b   : > { %v7348_v22 = vld [vmem:[#allocation7 + $0x414] sm:$0xf]  ;;  %v6180_v38 = vor.u32 %v7500_v54, %v6177_v12  ;;  %4201 = vmatpush.bf16.msra.mxu3 %v5924_v31  ;;  %v5255_v25 = vld [vmem:[#allocation7 + $0x198] sm:$0xf] }
 0x21c   : > { %v5569_v32 = vld [vmem:[#allocation7 + $0x430] sm:$0xf0]  ;;  %4282 = vmatpush.bf16.msra.mxu1 %v5512_v19 }
 0x21d   : > { %v7428_v36 = vld [vmem:[#allocation7 + $0x694] sm:$0xf]  ;;  %v5572_v63 = vor.u32 %v7348_v22, %v5569_v32  ;;  %4215 = vmatpush.bf16.msrb.mxu0 %v6180_v38 }
 0x21e   : > { %v5889_v37 = vld [vmem:[#allocation7 + $0x6b0] sm:$0xf0] }
 0x21f   : > { %v7492_v39 = vld [vmem:[#allocation7 + $0x894] sm:$0xf]  ;;  %v5892_v3 = vor.u32 %v7428_v36, %v5889_v37  ;;  %4190 = vmatpush.bf16.msra.mxu2 %v5572_v63  ;;  %v5415_v36 = vld [vmem:[#allocation7 + $0x2d8] sm:$0xf] }
 0x220   : > { %v6145_v24 = vld [vmem:[#allocation7 + $0x8b0] sm:$0xf0]  ;;  %4283 = vmatpush.bf16.msra.mxu1 %v5480_v18  ;;  %v7313_v37 = vld [vmem:[#allocation7 + $0x2f4] sm:$0xf0]  ;;  %v8591_v18 = vadd.f32 %v3928_v1, %v3915_v55 }
 0x221   : > { %v7660_v49 = vld [vmem:[#allocation7 + $0xdd4] sm:$0xf]  ;;  %v6148_v10 = vor.u32 %v7492_v39, %v6145_v24  ;;  %4202 = vmatpush.bf16.msra.mxu3 %v5892_v3  ;;  %v5416_v42 = vor.u32 %v7313_v37, %v5415_v36  ;;  %v7297_v36 = vld [vmem:[#allocation7 + $0x274] sm:$0xf0] }
 0x222   : > { %v6817_v50 = vld [vmem:[#allocation7 + $0xdf0] sm:$0xf0]  ;;  %4191 = vmatmul.bf16.vlgmr.msra.gmra.mxu2 %v8463_v21 }
 0x223   : > { %v7420_v4 = vld [vmem:[#allocation7 + $0x654] sm:$0xf]  ;;  %v6820_v8 = vor.u32 %v7660_v49, %v6817_v50  ;;  %4216 = vmatpush.bf16.msrb.mxu0 %v6148_v10  ;;  %v5287_v49 = vld [vmem:[#allocation7 + $0x1d8] sm:$0xf] }
 0x224   : > { %v5857_v6 = vld [vmem:[#allocation7 + $0x670] sm:$0xf0]  ;;  %4284 = vmatpush.bf16.msra.mxu1 %v5448_v7  ;;  %v7281_v50 = vld [vmem:[#allocation7 + $0x1f4] sm:$0xf0] }
 0x225   : > { %v7484_v13 = vld [vmem:[#allocation7 + $0x854] sm:$0xf]  ;;  %v5860_v54 = vor.u32 %v7420_v4, %v5857_v6  ;;  %4239 = vmatpush.bf16.msrb.mxu2 %v6820_v8  ;;  %v5288_v8 = vor.u32 %v7281_v50, %v5287_v49  ;;  %v5191_v50 = vld [vmem:[#allocation7 + $0x118] sm:$0xf] }
 0x226   : > { %v6113_v15 = vld [vmem:[#allocation7 + $0x870] sm:$0xf0] }
 0x227   : > { %v7652_v27 = vld [vmem:[#allocation7 + $0xd94] sm:$0xf]  ;;  %v6116_v30 = vor.u32 %v7484_v13, %v6113_v15  ;;  %4203 = vmatpush.bf16.msra.mxu3 %v5860_v54  ;;  %v5383_v15 = vld [vmem:[#allocation7 + $0x298] sm:$0xf] }
 0x228   : > { %v6785_v28 = vld [vmem:[#allocation7 + $0xdb0] sm:$0xf0]  ;;  %4285 = vmatpush.bf16.msra.mxu1 %v5416_v42 }
 0x229   : > { %v7412_v12 = vld [vmem:[#allocation7 + $0x614] sm:$0xf]  ;;  %v6788_v31 = vor.u32 %v7652_v27, %v6785_v28  ;;  %4217 = vmatpush.bf16.msrb.mxu0 %v6116_v30  ;;  %v7273_v27 = vld [vmem:[#allocation7 + $0x1b4] sm:$0xf0]  ;;  %v5384_v28 = vor.u32 %v7305_v2, %v5383_v15 }
 0x22a   : > { %v5825_v19 = vld [vmem:[#allocation7 + $0x630] sm:$0xf0]  ;;  %v5223_v30 = vld [vmem:[#allocation7 + $0x158] sm:$0xf] }
 0x22b   : > { %v7476_v22 = vld [vmem:[#allocation7 + $0x814] sm:$0xf]  ;;  %v5828_v60 = vor.u32 %v7412_v12, %v5825_v19  ;;  %4240 = vmatpush.bf16.msrb.mxu2 %v6788_v31  ;;  %v5256_v12 = vor.u32 %v7273_v27, %v5255_v25  ;;  %v7265_v31 = vld [vmem:[#allocation7 + $0x174] sm:$0xf0] }
 0x22c   : > { %v6081_v32 = vld [vmem:[#allocation7 + $0x830] sm:$0xf0]  ;;  %4286 = vmatpush.bf16.msra.mxu1 %v5384_v28  ;;  %v5224_v49 = vor.u32 %v7265_v31, %v5223_v30 }
 0x22d   : > { %v7644_v38 = vld [vmem:[#allocation7 + $0xd54] sm:$0xf]  ;;  %v6084_v63 = vor.u32 %v7476_v22, %v6081_v32  ;;  %4204 = vmatpush.bf16.msra.mxu3 %v5828_v60  ;;  %v5351_v32 = vld [vmem:[#allocation7 + $0x258] sm:$0xf] }
 0x22e   : > { %v6753_v39 = vld [vmem:[#allocation7 + $0xd70] sm:$0xf0]  ;;  %v5319_v60 = vld [vmem:[#allocation7 + $0x218] sm:$0xf] }
 0x22f   : > { %v7724_v41 = vld [vmem:[#allocation7 + $0xfd4] sm:$0xf]  ;;  %v6756_v3 = vor.u32 %v7644_v38, %v6753_v39  ;;  %4218 = vmatpush.bf16.msrb.mxu0 %v6084_v63  ;;  %v5352_v38 = vor.u32 %v7297_v36, %v5351_v32  ;;  %v7289_v63 = vld [vmem:[#allocation7 + $0x234] sm:$0xf0] }
 0x230   : > { %v7073_v24 = vld [vmem:[#allocation7 + $0xff0] sm:$0xf0]  ;;  %4205 = vmatmul.bf16.vlgmr.msra.gmra.mxu3 %v8470_v52 }
 0x231   : > { %v7636_v4 = vld [vmem:[#allocation7 + $0xd14] sm:$0xf]  ;;  %v7076_v10 = vor.u32 %v7724_v41, %v7073_v24  ;;  %4241 = vmatpush.bf16.msrb.mxu2 %v6756_v3  ;;  %v7257_v3 = vld [vmem:[#allocation7 + $0x134] sm:$0xf0]  ;;  %4287 = vmatpush.bf16.msra.mxu1 %v5352_v38 }
 0x232   : > { %v6721_v6 = vld [vmem:[#allocation7 + $0xd30] sm:$0xf0]  ;;  %4219 = vmatmul.bf16.vlgmr.msrb.gmra.mxu0 %v8472_v53  ;;  %v5192_v28 = vor.u32 %v7257_v3, %v5191_v50  ;;  %v7409_v3 = vld [vmem:[#allocation7 + $0x5f4] sm:$0xf0] }
 0x233   : > { %v7716_v13 = vld [vmem:[#allocation7 + $0xf94] sm:$0xf]  ;;  %v6724_v55 = vor.u32 %v7636_v4, %v6721_v6  ;;  %4253 = vmatpush.bf16.msrb.mxu3 %v7076_v10  ;;  %4267 = vmatpush.bf16.msra.mxu0 %v5288_v8  ;;  %v5320_v4 = vor.u32 %v7289_v63, %v5319_v60  ;;  %v6567_v6 = vld [vmem:[#allocation7 + $0xbd8] sm:$0xf]  ;;  %v3968_v8 = vpop.f32.mrf.mxu2  ;;  %v3982_v60 = vpop.f32.mrf.mxu3 }
 0x234   : > { %v7041_v26 = vld [vmem:[#allocation7 + $0xfb0] sm:$0xf0]  ;;  %v7601_v10 = vld [vmem:[#allocation7 + $0xbf4] sm:$0xf0]  ;;  %v3969_v15 = vadd.f32 %v3968_v8, %v8582_v29 }
 0x235   : > { %v7628_v40 = vld [vmem:[#allocation7 + $0xcd4] sm:$0xf]  ;;  %v7044_v54 = vor.u32 %v7716_v13, %v7041_v26  ;;  %4242 = vmatpush.bf16.msrb.mxu2 %v6724_v55  ;;  %v6568_v13 = vor.u32 %v7601_v10, %v6567_v6  ;;  %4288 = vmatpush.bf16.msra.mxu1 %v5320_v4  ;;  %v5799_v63 = vld [vmem:[#allocation7 + $0x5d8] sm:$0xf] }
 0x236   : > { %v6689_v7 = vld [vmem:[#allocation7 + $0xcf0] sm:$0xf0]  ;;  %v3983_v10 = vadd.f32 %v3982_v60, %v3969_v15 }
 0x237   : > { %v7708_v19 = vld [vmem:[#allocation7 + $0xf54] sm:$0xf]  ;;  %v6692_v39 = vor.u32 %v7628_v40, %v6689_v7  ;;  %4254 = vmatpush.bf16.msrb.mxu3 %v7044_v54  ;;  %4268 = vmatpush.bf16.msra.mxu0 %v5256_v12  ;;  %v5159_v7 = vld [vmem:[#allocation7 + $0xd8] sm:$0xf] }
 0x238   : > { %v7009_v22 = vld [vmem:[#allocation7 + $0xf70] sm:$0xf0]  ;;  %v7249_v54 = vld [vmem:[#allocation7 + $0xf4] sm:$0xf0]  ;;  %4289 = vmatmul.bf16.vlgmr.msra.gmra.mxu1 %v8453_v43 }
 0x239   : > { %v7620_v37 = vld [vmem:[#allocation7 + $0xc94] sm:$0xf]  ;;  %v7012_v24 = vor.u32 %v7708_v19, %v7009_v22  ;;  %4243 = vmatpush.bf16.msrb.mxu2 %v6692_v39  ;;  %v6535_v12 = vld [vmem:[#allocation7 + $0xb98] sm:$0xf]  ;;  %4337 = vmatpush.bf16.msrb.mxu1 %v6568_v13  ;;  %v5160_v36 = vor.u32 %v7249_v54, %v5159_v7 }
 0x23a   : > { %v6657_v41 = vld [vmem:[#allocation7 + $0xcb0] sm:$0xf0]  ;;  %v7593_v19 = vld [vmem:[#allocation7 + $0xbb4] sm:$0xf0] }
 0x23b   : > { %v7700_v42 = vld [vmem:[#allocation7 + $0xf14] sm:$0xf]  ;;  %v6660_v2 = vor.u32 %v7620_v37, %v6657_v41  ;;  %4255 = vmatpush.bf16.msrb.mxu3 %v7012_v24  ;;  %4269 = vmatpush.bf16.msra.mxu0 %v5224_v49  ;;  %v6536_v22 = vor.u32 %v7593_v19, %v6535_v12  ;;  %v5127_v39 = vld [vmem:[#allocation7 + $0x98] sm:$0xf]  ;;  %v3996_v41 = vpop.f32.mrf.mxu0  ;;  %v3970_v50 = vpop.f32.mrf.mxu2 }
 0x23c   : > { %v6977_v1 = vld [vmem:[#allocation7 + $0xf30] sm:$0xf0]  ;;  %v6503_v24 = vld [vmem:[#allocation7 + $0xb58] sm:$0xf]  ;;  %v3971_v6 = vadd.f32 %v3970_v50, %v8588_v59 }
 0x23d   : > { %v7612_v26 = vld [vmem:[#allocation7 + $0xc54] sm:$0xf]  ;;  %v6980_v27 = vor.u32 %v7700_v42, %v6977_v1  ;;  %4244 = vmatpush.bf16.msrb.mxu2 %v6660_v2  ;;  %v7241_v42 = vld [vmem:[#allocation7 + $0xb4] sm:$0xf0]  ;;  %v4010_v1 = vpop.f32.mrf.mxu1  ;;  %4338 = vmatpush.bf16.msrb.mxu1 %v6536_v22 }
 0x23e   : > { %v6625_v25 = vld [vmem:[#allocation7 + $0xc70] sm:$0xf0]  ;;  %v7585_v49 = vld [vmem:[#allocation7 + $0xb74] sm:$0xf0]  ;;  %v5128_v2 = vor.u32 %v7241_v42, %v5127_v39  ;;  %v3984_v42 = vpop.f32.mrf.mxu3 }
 0x23f   : > { %v7692_v55 = vld [vmem:[#allocation7 + $0xed4] sm:$0xf]  ;;  %v6628_v30 = vor.u32 %v7612_v26, %v6625_v25  ;;  %4256 = vmatpush.bf16.msrb.mxu3 %v6980_v27  ;;  %4270 = vmatpush.bf16.msra.mxu0 %v5192_v28  ;;  %v6504_v4 = vor.u32 %v7585_v49, %v6503_v24  ;;  %v3997_v27 = vadd.f32 %v3996_v41, %v3983_v10  ;;  %v6471_v7 = vld [vmem:[#allocation7 + $0xb18] sm:$0xf] }
 0x240   : > { %v6945_v40 = vld [vmem:[#allocation7 + $0xef0] sm:$0xf0]  ;;  %v5800_v28 = vor.u32 %v7409_v3, %v5799_v63  ;;  %v5767_v54 = vld [vmem:[#allocation7 + $0x598] sm:$0xf]  ;;  %v3985_v60 = vadd.f32 %v3984_v42, %v3971_v6 }
 0x241   : > { %v7604_v31 = vld [vmem:[#allocation7 + $0xc14] sm:$0xf]  ;;  %v6948_v32 = vor.u32 %v7692_v55, %v6945_v40  ;;  %4245 = vmatpush.bf16.msrb.mxu2 %v6628_v30  ;;  %v5095_v55 = vld [vmem:[#allocation7 + $0x58] sm:$0xf]  ;;  %4339 = vmatpush.bf16.msrb.mxu1 %v6504_v4  ;;  %v8598_v22 = vadd.f32 %v4010_v1, %v3997_v27 }
 0x242   : > { %v6593_v29 = vld [vmem:[#allocation7 + $0xc30] sm:$0xf0]  ;;  %v7233_v40 = vld [vmem:[#allocation7 + $0x74] sm:$0xf0] }
 0x243   : > { %v7684_v37 = vld [vmem:[#allocation7 + $0xe94] sm:$0xf]  ;;  %v6596_v8 = vor.u32 %v7604_v31, %v6593_v29  ;;  %4257 = vmatpush.bf16.msrb.mxu3 %v6948_v32  ;;  %4271 = vmatpush.bf16.msra.mxu0 %v5160_v36  ;;  %v7401_v12 = vld [vmem:[#allocation7 + $0x5b4] sm:$0xf0]  ;;  %v5096_v31 = vor.u32 %v7233_v40, %v5095_v55  ;;  %v3998_v4 = vpop.f32.mrf.mxu0 }
 0x244   : > { %v6913_v38 = vld [vmem:[#allocation7 + $0xeb0] sm:$0xf0]  ;;  %v7577_v19 = vld [vmem:[#allocation7 + $0xb34] sm:$0xf0] }
 0x245   : > { %v6916_v13 = vor.u32 %v7684_v37, %v6913_v38  ;;  %v7676_v26 = vld [vmem:[#allocation7 + $0xe54] sm:$0xf]  ;;  %4246 = vmatpush.bf16.msrb.mxu2 %v6596_v8  ;;  %v6472_v15 = vor.u32 %v7577_v19, %v6471_v7  ;;  %v5063_v32 = vld [vmem:[#allocation7 + $0x18] sm:$0xf]  ;;  %v5768_v37 = vor.u32 %v7401_v12, %v5767_v54 }
 0x246   : > { %v6881_v25 = vld [vmem:[#allocation7 + $0xe70] sm:$0xf0]  ;;  %v7225_v36 = vld [vmem:[#allocation7 + $0x34] sm:$0xf0] }
 0x247   : > { %v7668_v59 = vld [vmem:[#allocation7 + $0xe14] sm:$0xf]  ;;  %4258 = vmatpush.bf16.msrb.mxu3 %v6916_v13  ;;  %4272 = vmatpush.bf16.msra.mxu0 %v5128_v2  ;;  %v6884_v30 = vor.u32 %v7676_v26, %v6881_v25  ;;  %v5735_v38 = vld [vmem:[#allocation7 + $0x558] sm:$0xf]  ;;  %v5064_v8 = vor.u32 %v7225_v36, %v5063_v32  ;;  %v4012_v13 = vpop.f32.mrf.mxu1  ;;  %v3999_v2 = vadd.f32 %v3998_v4, %v3985_v60 }
 0x248   : > { %v6849_v29 = vld [vmem:[#allocation7 + $0xe30] sm:$0xf0]  ;;  %v6439_v39 = vld [vmem:[#allocation7 + $0xad8] sm:$0xf]  ;;  %4247 = vmatmul.bf16.vlgmr.msrb.gmra.mxu2 %v8441_v46  ;;  %4340 = vmatpush.bf16.msrb.mxu1 %v6472_v15 }
 0x249   : > { %4295 = vmatpush.bf16.msra.mxu2 %v5800_v28  ;;  %v7569_v41 = vld [vmem:[#allocation7 + $0xaf4] sm:$0xf0]  ;;  %v6852_v10 = vor.u32 %v7668_v59, %v6849_v29  ;;  %v8601_v12 = vadd.f32 %v4012_v13, %v3999_v2 }
 0x24a   : > { %v7393_v24 = vld [vmem:[#allocation7 + $0x574] sm:$0xf0]  ;;  %v6440_v50 = vor.u32 %v7569_v41, %v6439_v39 }
 0x24b   : > { %v6055_v1 = vld [vmem:[#allocation7 + $0x7d8] sm:$0xf]  ;;  %4259 = vmatpush.bf16.msrb.mxu3 %v6884_v30  ;;  %4273 = vmatpush.bf16.msra.mxu0 %v5096_v31  ;;  %v5736_v26 = vor.u32 %v7393_v24, %v5735_v38 }
 0x24c   : > { %v7473_v49 = vld [vmem:[#allocation7 + $0x7f4] sm:$0xf0]  ;;  %4341 = vmatpush.bf16.msrb.mxu1 %v6440_v50 }
 0x24d   : > { %v6311_v63 = vld [vmem:[#allocation7 + $0x9d8] sm:$0xf]  ;;  %4296 = vmatpush.bf16.msra.mxu2 %v5768_v37  ;;  %v6056_v25 = vor.u32 %v7473_v49, %v6055_v1 }
 0x24e   : > { %v7537_v3 = vld [vmem:[#allocation7 + $0x9f4] sm:$0xf0] }
 0x24f   : > { %v5703_v27 = vld [vmem:[#allocation7 + $0x518] sm:$0xf]  ;;  %v6312_v40 = vor.u32 %v7537_v3, %v6311_v63  ;;  %4260 = vmatpush.bf16.msrb.mxu3 %v6852_v10  ;;  %4274 = vmatpush.bf16.msra.mxu0 %v5064_v8 }
 0x250   : > { %v7385_v28 = vld [vmem:[#allocation7 + $0x534] sm:$0xf0] }
 0x251   : > { %v6023_v55 = vld [vmem:[#allocation7 + $0x798] sm:$0xf]  ;;  %4297 = vmatpush.bf16.msra.mxu2 %v5736_v26  ;;  %v5704_v59 = vor.u32 %v7385_v28, %v5703_v27  ;;  %v7341_v26 = vld [vmem:[#allocation7 + $0x3dc] sm:$0xf]  ;;  %v4024_v27 = vpop.f32.mrf.mxu2 }
 0x252   : > { %v7465_v7 = vld [vmem:[#allocation7 + $0x7b4] sm:$0xf0]  ;;  %4261 = vmatmul.bf16.vlgmr.msrb.gmra.mxu3 %v8484_v51  ;;  %4275 = vmatmul.bf16.vlgmr.msra.gmra.mxu0 %v8449_v35 }
 0x253   : > { %v6407_v54 = vld [vmem:[#allocation7 + $0xa98] sm:$0xf]  ;;  %4309 = vmatpush.bf16.msra.mxu3 %v6056_v25  ;;  %v6024_v31 = vor.u32 %v7465_v7, %v6023_v55  ;;  %4323 = vmatpush.bf16.msrb.mxu0 %v6312_v40  ;;  %v5545_v25 = vld [vmem:[#allocation7 + $0x3f8] sm:$0xf0]  ;;  %v4025_v7 = vadd.f32 %v4024_v27, %v8598_v22 }
 0x254   : > { %v7561_v6 = vld [vmem:[#allocation7 + $0xab4] sm:$0xf0]  ;;  %v5548_v40 = vor.u32 %v7341_v26, %v5545_v25  ;;  %v4038_v26 = vpop.f32.mrf.mxu3 }
 0x255   : > { %v6279_v19 = vld [vmem:[#allocation7 + $0x998] sm:$0xf]  ;;  %v6408_v30 = vor.u32 %v7561_v6, %v6407_v54  ;;  %4298 = vmatpush.bf16.msra.mxu2 %v5704_v59  ;;  %v8608_v25 = vadd.f32 %v4038_v26, %v4025_v7 }
 0x256   : > { %v7529_v15 = vld [vmem:[#allocation7 + $0x9b4] sm:$0xf0] }
 0x257   : > { %v5671_v29 = vld [vmem:[#allocation7 + $0x4d8] sm:$0xf]  ;;  %v6280_v37 = vor.u32 %v7529_v15, %v6279_v19  ;;  %4342 = vmatpush.bf16.msrb.mxu1 %v6408_v30  ;;  %4310 = vmatpush.bf16.msra.mxu3 %v6024_v31 }
 0x258   : > { %v7377_v32 = vld [vmem:[#allocation7 + $0x4f4] sm:$0xf0] }
 0x259   : > { %v5991_v36 = vld [vmem:[#allocation7 + $0x758] sm:$0xf]  ;;  %v5672_v60 = vor.u32 %v7377_v32, %v5671_v29  ;;  %4324 = vmatpush.bf16.msrb.mxu0 %v6280_v37  ;;  %v7333_v29 = vld [vmem:[#allocation7 + $0x39c] sm:$0xf] }
 0x25a   : > { %v7457_v38 = vld [vmem:[#allocation7 + $0x774] sm:$0xf0]  ;;  %v5513_v32 = vld [vmem:[#allocation7 + $0x3b8] sm:$0xf0] }
 0x25b   : > { %v6375_v39 = vld [vmem:[#allocation7 + $0xa58] sm:$0xf]  ;;  %v5992_v63 = vor.u32 %v7457_v38, %v5991_v36  ;;  %4299 = vmatpush.bf16.msra.mxu2 %v5672_v60  ;;  %v5516_v38 = vor.u32 %v7333_v29, %v5513_v32  ;;  %v7325_v60 = vld [vmem:[#allocation7 + $0x35c] sm:$0xf] }
 0x25c   : > { %v7553_v41 = vld [vmem:[#allocation7 + $0xa74] sm:$0xf0]  ;;  %v5449_v29 = vld [vmem:[#allocation7 + $0x338] sm:$0xf0] }
 0x25d   : > { %v6247_v42 = vld [vmem:[#allocation7 + $0x958] sm:$0xf]  ;;  %v6376_v1 = vor.u32 %v7553_v41, %v6375_v39  ;;  %4311 = vmatpush.bf16.msra.mxu3 %v5992_v63  ;;  %v5481_v63 = vld [vmem:[#allocation7 + $0x378] sm:$0xf0] }
 0x25e   : > { %v7521_v24 = vld [vmem:[#allocation7 + $0x974] sm:$0xf0] }
 0x25f   : > { %v5639_v49 = vld [vmem:[#allocation7 + $0x498] sm:$0xf]  ;;  %v6248_v8 = vor.u32 %v7521_v24, %v6247_v42  ;;  %4343 = vmatpush.bf16.msrb.mxu1 %v6376_v1 }
 0x260   : > { %v7369_v50 = vld [vmem:[#allocation7 + $0x4b4] sm:$0xf0] }
 0x261   : > { %v5959_v3 = vld [vmem:[#allocation7 + $0x718] sm:$0xf]  ;;  %v5640_v54 = vor.u32 %v7369_v50, %v5639_v49  ;;  %4325 = vmatpush.bf16.msrb.mxu0 %v6248_v8 }
 0x262   : > { %v6343_v4 = vld [vmem:[#allocation7 + $0xa18] sm:$0xf] }
 0x263   : > { %v7545_v10 = vld [vmem:[#allocation7 + $0xa34] sm:$0xf0]  ;;  %4300 = vmatpush.bf16.msra.mxu2 %v5640_v54 }
 0x264   : > { %v7449_v13 = vld [vmem:[#allocation7 + $0x734] sm:$0xf0]  ;;  %v6344_v2 = vor.u32 %v7545_v10, %v6343_v4 }
 0x265   : > { %v6215_v28 = vld [vmem:[#allocation7 + $0x918] sm:$0xf]  ;;  %v5960_v6 = vor.u32 %v7449_v13, %v5959_v3  ;;  %v4026_v3 = vpop.f32.mrf.mxu2  ;;  %v5484_v13 = vor.u32 %v7325_v60, %v5481_v63  ;;  %v4040_v60 = vpop.f32.mrf.mxu3 }
 0x266   : > { %v7513_v55 = vld [vmem:[#allocation7 + $0x934] sm:$0xf0]  ;;  %4344 = vmatpush.bf16.msrb.mxu1 %v6344_v2  ;;  %v4027_v2 = vadd.f32 %v4026_v3, %v8601_v12  ;;  %v7277_v3 = vld [vmem:[#allocation7 + $0x1dc] sm:$0xf] }
 0x267   : > { %v5607_v19 = vld [vmem:[#allocation7 + $0x458] sm:$0xf]  ;;  %v6216_v59 = vor.u32 %v7513_v55, %v6215_v28  ;;  %4312 = vmatpush.bf16.msra.mxu3 %v5960_v6 }
 0x268   : > { %v7361_v15 = vld [vmem:[#allocation7 + $0x474] sm:$0xf0] }
 0x269   : > { %v5927_v30 = vld [vmem:[#allocation7 + $0x6d8] sm:$0xf]  ;;  %v5608_v22 = vor.u32 %v7361_v15, %v5607_v19  ;;  %4326 = vmatpush.bf16.msrb.mxu0 %v6216_v59  ;;  %4345 = vmatmul.bf16.vlgmr.msrb.gmra.mxu1 %v8425_v23 }
 0x26a   : > { %v7441_v31 = vld [vmem:[#allocation7 + $0x6f4] sm:$0xf0]  ;;  %4393 = vmatpush.bf16.msra.mxu1 %v5548_v40 }
 0x26b   : > { %v6183_v36 = vld [vmem:[#allocation7 + $0x8d8] sm:$0xf]  ;;  %v5928_v41 = vor.u32 %v7441_v31, %v5927_v30  ;;  %4301 = vmatpush.bf16.msra.mxu2 %v5608_v22  ;;  %v7317_v30 = vld [vmem:[#allocation7 + $0x31c] sm:$0xf] }
 0x26c   : > { %v7505_v37 = vld [vmem:[#allocation7 + $0x8f4] sm:$0xf0]  ;;  %v5452_v12 = vor.u32 %v7317_v30, %v5449_v29  ;;  %v7269_v30 = vld [vmem:[#allocation7 + $0x19c] sm:$0xf] }
 0x26d   : > { %v5575_v39 = vld [vmem:[#allocation7 + $0x418] sm:$0xf]  ;;  %v6184_v49 = vor.u32 %v7505_v37, %v6183_v36  ;;  %4313 = vmatpush.bf16.msra.mxu3 %v5928_v41  ;;  %v7309_v41 = vld [vmem:[#allocation7 + $0x2dc] sm:$0xf] }
 0x26e   : > { %v7353_v42 = vld [vmem:[#allocation7 + $0x434] sm:$0xf0]  ;;  %4394 = vmatpush.bf16.msra.mxu1 %v5516_v38 }
 0x26f   : > { %v5895_v24 = vld [vmem:[#allocation7 + $0x698] sm:$0xf]  ;;  %v5576_v27 = vor.u32 %v7353_v42, %v5575_v39  ;;  %4327 = vmatpush.bf16.msrb.mxu0 %v6184_v49  ;;  %v5417_v42 = vld [vmem:[#allocation7 + $0x2f8] sm:$0xf0] }
 0x270   : > { %v7433_v1 = vld [vmem:[#allocation7 + $0x6b4] sm:$0xf0] }
 0x271   : > { %v6151_v50 = vld [vmem:[#allocation7 + $0x898] sm:$0xf]  ;;  %v5896_v28 = vor.u32 %v7433_v1, %v5895_v24  ;;  %4302 = vmatpush.bf16.msra.mxu2 %v5576_v27 }
 0x272   : > { %v7497_v4 = vld [vmem:[#allocation7 + $0x8b4] sm:$0xf0]  ;;  %4395 = vmatpush.bf16.msra.mxu1 %v5484_v13 }
 0x273   : > { %v6823_v10 = vld [vmem:[#allocation7 + $0xdd8] sm:$0xf]  ;;  %v6152_v54 = vor.u32 %v7497_v4, %v6151_v50  ;;  %4314 = vmatpush.bf16.msra.mxu3 %v5896_v28  ;;  %v5420_v50 = vor.u32 %v7309_v41, %v5417_v42  ;;  %v5289_v4 = vld [vmem:[#allocation7 + $0x1f8] sm:$0xf0] }
 0x274   : > { %v7665_v8 = vld [vmem:[#allocation7 + $0xdf4] sm:$0xf0]  ;;  %4303 = vmatmul.bf16.vlgmr.msra.gmra.mxu2 %v8463_v21  ;;  %v5353_v41 = vld [vmem:[#allocation7 + $0x278] sm:$0xf0] }
 0x275   : > { %v5863_v55 = vld [vmem:[#allocation7 + $0x658] sm:$0xf]  ;;  %v6824_v6 = vor.u32 %v7665_v8, %v6823_v10  ;;  %4328 = vmatpush.bf16.msrb.mxu0 %v6152_v54  ;;  %v8611_v10 = vadd.f32 %v4040_v60, %v4027_v2 }
 0x276   : > { %v7425_v40 = vld [vmem:[#allocation7 + $0x674] sm:$0xf0]  ;;  %4396 = vmatpush.bf16.msra.mxu1 %v5452_v12 }
 0x277   : > { %v6119_v19 = vld [vmem:[#allocation7 + $0x858] sm:$0xf]  ;;  %v5864_v32 = vor.u32 %v7425_v40, %v5863_v55  ;;  %4351 = vmatpush.bf16.msrb.mxu2 %v6824_v6  ;;  %v5292_v40 = vor.u32 %v7277_v3, %v5289_v4  ;;  %v7301_v6 = vld [vmem:[#allocation7 + $0x29c] sm:$0xf] }
 0x278   : > { %v7489_v15 = vld [vmem:[#allocation7 + $0x874] sm:$0xf0]  ;;  %v7253_v4 = vld [vmem:[#allocation7 + $0x11c] sm:$0xf] }
 0x279   : > { %v6791_v59 = vld [vmem:[#allocation7 + $0xd98] sm:$0xf]  ;;  %v6120_v38 = vor.u32 %v7489_v15, %v6119_v19  ;;  %4315 = vmatpush.bf16.msra.mxu3 %v5864_v32  ;;  %v5385_v19 = vld [vmem:[#allocation7 + $0x2b8] sm:$0xf0] }
 0x27a   : > { %v7657_v31 = vld [vmem:[#allocation7 + $0xdb4] sm:$0xf0]  ;;  %4397 = vmatpush.bf16.msra.mxu1 %v5420_v50 }
 0x27b   : > { %v5831_v7 = vld [vmem:[#allocation7 + $0x618] sm:$0xf]  ;;  %v6792_v39 = vor.u32 %v7657_v31, %v6791_v59  ;;  %4329 = vmatpush.bf16.msrb.mxu0 %v6120_v38  ;;  %v5257_v59 = vld [vmem:[#allocation7 + $0x1b8] sm:$0xf0]  ;;  %v5388_v31 = vor.u32 %v7301_v6, %v5385_v19 }
 0x27c   : > { %v7417_v36 = vld [vmem:[#allocation7 + $0x634] sm:$0xf0]  ;;  %v7261_v38 = vld [vmem:[#allocation7 + $0x15c] sm:$0xf] }
 0x27d   : > { %v6087_v37 = vld [vmem:[#allocation7 + $0x818] sm:$0xf]  ;;  %v5832_v8 = vor.u32 %v7417_v36, %v5831_v7  ;;  %4352 = vmatpush.bf16.msrb.mxu2 %v6792_v39  ;;  %v5260_v7 = vor.u32 %v7269_v30, %v5257_v59  ;;  %v5225_v39 = vld [vmem:[#allocation7 + $0x178] sm:$0xf0] }
 0x27e   : > { %v7481_v22 = vld [vmem:[#allocation7 + $0x834] sm:$0xf0]  ;;  %4398 = vmatpush.bf16.msra.mxu1 %v5388_v31  ;;  %v5228_v3 = vor.u32 %v7261_v38, %v5225_v39 }
 0x27f   : > { %v6759_v24 = vld [vmem:[#allocation7 + $0xd58] sm:$0xf]  ;;  %v6088_v13 = vor.u32 %v7481_v22, %v6087_v37  ;;  %4316 = vmatpush.bf16.msra.mxu3 %v5832_v8  ;;  %v7293_v22 = vld [vmem:[#allocation7 + $0x25c] sm:$0xf] }
 0x280   : > { %v7649_v1 = vld [vmem:[#allocation7 + $0xd74] sm:$0xf0]  ;;  %v7285_v8 = vld [vmem:[#allocation7 + $0x21c] sm:$0xf] }
 0x281   : > { %v7079_v49 = vld [vmem:[#allocation7 + $0xfd8] sm:$0xf]  ;;  %v6760_v26 = vor.u32 %v7649_v1, %v6759_v24  ;;  %4330 = vmatpush.bf16.msrb.mxu0 %v6088_v13  ;;  %v5356_v24 = vor.u32 %v7293_v22, %v5353_v41  ;;  %v5321_v13 = vld [vmem:[#allocation7 + $0x238] sm:$0xf0] }
 0x282   : > { %v7729_v63 = vld [vmem:[#allocation7 + $0xff4] sm:$0xf0]  ;;  %4317 = vmatmul.bf16.vlgmr.msra.gmra.mxu3 %v8470_v52 }
 0x283   : > { %v6727_v27 = vld [vmem:[#allocation7 + $0xd18] sm:$0xf]  ;;  %v7080_v55 = vor.u32 %v7729_v63, %v7079_v49  ;;  %4353 = vmatpush.bf16.msrb.mxu2 %v6760_v26  ;;  %v5193_v26 = vld [vmem:[#allocation7 + $0x138] sm:$0xf0]  ;;  %4399 = vmatpush.bf16.msra.mxu1 %v5356_v24 }
 0x284   : > { %v7641_v28 = vld [vmem:[#allocation7 + $0xd34] sm:$0xf0]  ;;  %4331 = vmatmul.bf16.vlgmr.msrb.gmra.mxu0 %v8472_v53  ;;  %v5196_v30 = vor.u32 %v7253_v4, %v5193_v26  ;;  %v7237_v24 = vld [vmem:[#allocation7 + $0x9c] sm:$0xf] }
 0x285   : > { %v7047_v54 = vld [vmem:[#allocation7 + $0xf98] sm:$0xf]  ;;  %v6728_v2 = vor.u32 %v7641_v28, %v6727_v27  ;;  %4365 = vmatpush.bf16.msrb.mxu3 %v7080_v55  ;;  %4379 = vmatpush.bf16.msra.mxu0 %v5292_v40  ;;  %v5324_v27 = vor.u32 %v7285_v8, %v5321_v13  ;;  %v7597_v28 = vld [vmem:[#allocation7 + $0xbdc] sm:$0xf] }
 0x286   : > { %v7721_v15 = vld [vmem:[#allocation7 + $0xfb4] sm:$0xf0]  ;;  %v6569_v55 = vld [vmem:[#allocation7 + $0xbf8] sm:$0xf0] }
 0x287   : > { %v6695_v29 = vld [vmem:[#allocation7 + $0xcd8] sm:$0xf]  ;;  %v7048_v32 = vor.u32 %v7721_v15, %v7047_v54  ;;  %4354 = vmatpush.bf16.msrb.mxu2 %v6728_v2  ;;  %v6572_v40 = vor.u32 %v7597_v28, %v6569_v55  ;;  %v7245_v2 = vld [vmem:[#allocation7 + $0xdc] sm:$0xf]  ;;  %4400 = vmatpush.bf16.msra.mxu1 %v5324_v27 }
 0x288   : > { %v7633_v12 = vld [vmem:[#allocation7 + $0xcf4] sm:$0xf0]  ;;  %v7229_v55 = vld [vmem:[#allocation7 + $0x5c] sm:$0xf] }
 0x289   : > { %v7015_v36 = vld [vmem:[#allocation7 + $0xf58] sm:$0xf]  ;;  %v6696_v1 = vor.u32 %v7633_v12, %v6695_v29  ;;  %4366 = vmatpush.bf16.msrb.mxu3 %v7048_v32  ;;  %4380 = vmatpush.bf16.msra.mxu0 %v5260_v7  ;;  %v5161_v29 = vld [vmem:[#allocation7 + $0xf8] sm:$0xf0] }
 0x28a   : > { %v7713_v37 = vld [vmem:[#allocation7 + $0xf74] sm:$0xf0]  ;;  %v7589_v12 = vld [vmem:[#allocation7 + $0xb9c] sm:$0xf]  ;;  %v5164_v22 = vor.u32 %v7245_v2, %v5161_v29  ;;  %4401 = vmatmul.bf16.vlgmr.msra.gmra.mxu1 %v8453_v43 }
 0x28b   : > { %v6663_v42 = vld [vmem:[#allocation7 + $0xc98] sm:$0xf]  ;;  %v7016_v63 = vor.u32 %v7713_v37, %v7015_v36  ;;  %4355 = vmatpush.bf16.msrb.mxu2 %v6696_v1  ;;  %v6537_v32 = vld [vmem:[#allocation7 + $0xbb8] sm:$0xf0]  ;;  %4449 = vmatpush.bf16.msrb.mxu1 %v6572_v40 }
 0x28c   : > { %v7625_v49 = vld [vmem:[#allocation7 + $0xcb4] sm:$0xf0]  ;;  %v6540_v7 = vor.u32 %v7589_v12, %v6537_v32  ;;  %v5129_v1 = vld [vmem:[#allocation7 + $0xb8] sm:$0xf0] }
 0x28d   : > { %v6983_v50 = vld [vmem:[#allocation7 + $0xf18] sm:$0xf]  ;;  %v6664_v54 = vor.u32 %v7625_v49, %v6663_v42  ;;  %4367 = vmatpush.bf16.msrb.mxu3 %v7016_v63  ;;  %4381 = vmatpush.bf16.msra.mxu0 %v5228_v3  ;;  %v7581_v49 = vld [vmem:[#allocation7 + $0xb5c] sm:$0xf]  ;;  %v5132_v13 = vor.u32 %v7237_v24, %v5129_v1 }
 0x28e   : > { %v7705_v60 = vld [vmem:[#allocation7 + $0xf34] sm:$0xf0]  ;;  %v5801_v63 = vld [vmem:[#allocation7 + $0x5f8] sm:$0xf0] }
 0x28f   : > { %v6631_v6 = vld [vmem:[#allocation7 + $0xc58] sm:$0xf]  ;;  %v6984_v15 = vor.u32 %v7705_v60, %v6983_v50  ;;  %4356 = vmatpush.bf16.msrb.mxu2 %v6664_v54  ;;  %v6505_v50 = vld [vmem:[#allocation7 + $0xb78] sm:$0xf0]  ;;  %4450 = vmatpush.bf16.msrb.mxu1 %v6540_v7 }
 0x290   : > { %v7617_v19 = vld [vmem:[#allocation7 + $0xc74] sm:$0xf0]  ;;  %v7405_v60 = vld [vmem:[#allocation7 + $0x5dc] sm:$0xf]  ;;  %v6508_v3 = vor.u32 %v7581_v49, %v6505_v50 }
 0x291   : > { %v6951_v59 = vld [vmem:[#allocation7 + $0xed8] sm:$0xf]  ;;  %v6632_v36 = vor.u32 %v7617_v19, %v6631_v6  ;;  %4368 = vmatpush.bf16.msrb.mxu3 %v6984_v15  ;;  %4382 = vmatpush.bf16.msra.mxu0 %v5196_v30  ;;  %v5804_v28 = vor.u32 %v7405_v60, %v5801_v63  ;;  %v5097_v40 = vld [vmem:[#allocation7 + $0x78] sm:$0xf0] }
 0x292   : > { %v7697_v31 = vld [vmem:[#allocation7 + $0xef4] sm:$0xf0]  ;;  %v7573_v54 = vld [vmem:[#allocation7 + $0xb1c] sm:$0xf] }
 0x293   : > { %v6599_v37 = vld [vmem:[#allocation7 + $0xc18] sm:$0xf]  ;;  %v6952_v39 = vor.u32 %v7697_v31, %v6951_v59  ;;  %4357 = vmatpush.bf16.msrb.mxu2 %v6632_v36  ;;  %v7397_v6 = vld [vmem:[#allocation7 + $0x59c] sm:$0xf]  ;;  %4451 = vmatpush.bf16.msrb.mxu1 %v6508_v3  ;;  %v5100_v31 = vor.u32 %v7229_v55, %v5097_v40 }
 0x294   : > { %v7609_v38 = vld [vmem:[#allocation7 + $0xc34] sm:$0xf0]  ;;  %v5769_v19 = vld [vmem:[#allocation7 + $0x5b8] sm:$0xf0] }
 0x295   : > { %v6919_v41 = vld [vmem:[#allocation7 + $0xe98] sm:$0xf]  ;;  %v6600_v4 = vor.u32 %v7609_v38, %v6599_v37  ;;  %4369 = vmatpush.bf16.msrb.mxu3 %v6952_v39  ;;  %4383 = vmatpush.bf16.msra.mxu0 %v5164_v22  ;;  %v6473_v43 = vld [vmem:[#allocation7 + $0xb38] sm:$0xf0]  ;;  %v5772_v32 = vor.u32 %v7397_v6, %v5769_v19 }
 0x296   : > { %v7689_v42 = vld [vmem:[#allocation7 + $0xeb4] sm:$0xf0]  ;;  %v6476_v30 = vor.u32 %v7573_v54, %v6473_v43  ;;  %v7221_v29 = vld [vmem:[#allocation7 + $0x1c] sm:$0xf] }
 0x297   : > { %v6920_v8 = vor.u32 %v7689_v42, %v6919_v41  ;;  %v6887_v26 = vld [vmem:[#allocation7 + $0xe58] sm:$0xf]  ;;  %4358 = vmatpush.bf16.msrb.mxu2 %v6600_v4  ;;  %v5065_v12 = vld [vmem:[#allocation7 + $0x38] sm:$0xf0] }
 0x298   : > { %v7681_v27 = vld [vmem:[#allocation7 + $0xe74] sm:$0xf0]  ;;  %v7389_v7 = vld [vmem:[#allocation7 + $0x55c] sm:$0xf]  ;;  %4452 = vmatpush.bf16.msrb.mxu1 %v6476_v30  ;;  %v5068_v49 = vor.u32 %v7221_v29, %v5065_v12 }
 0x299   : > { %v6855_v15 = vld [vmem:[#allocation7 + $0xe18] sm:$0xf]  ;;  %4370 = vmatpush.bf16.msrb.mxu3 %v6920_v8  ;;  %4384 = vmatpush.bf16.msra.mxu0 %v5132_v13  ;;  %v6888_v59 = vor.u32 %v7681_v27, %v6887_v26  ;;  %v7565_v36 = vld [vmem:[#allocation7 + $0xadc] sm:$0xf] }
 0x29a   : > { %v7673_v2 = vld [vmem:[#allocation7 + $0xe34] sm:$0xf0]  ;;  %v6441_v37 = vld [vmem:[#allocation7 + $0xaf8] sm:$0xf0]  ;;  %4359 = vmatmul.bf16.vlgmr.msrb.gmra.mxu2 %v8441_v46 }
 0x29b   : > { %4407 = vmatpush.bf16.msra.mxu2 %v5804_v28  ;;  %v5737_v38 = vld [vmem:[#allocation7 + $0x578] sm:$0xf0]  ;;  %v6444_v41 = vor.u32 %v7565_v36, %v6441_v37  ;;  %v6856_v1 = vor.u32 %v7673_v2, %v6855_v15 }
 0x29c   : > { %v7469_v39 = vld [vmem:[#allocation7 + $0x7dc] sm:$0xf]  ;;  %v5740_v50 = vor.u32 %v7389_v7, %v5737_v38 }
 0x29d   : > { %v6057_v22 = vld [vmem:[#allocation7 + $0x7f8] sm:$0xf0]  ;;  %4371 = vmatpush.bf16.msrb.mxu3 %v6888_v59  ;;  %4385 = vmatpush.bf16.msra.mxu0 %v5100_v31 }
 0x29e   : > { %v7533_v42 = vld [vmem:[#allocation7 + $0x9dc] sm:$0xf]  ;;  %v6060_v60 = vor.u32 %v7469_v39, %v6057_v22  ;;  %4453 = vmatpush.bf16.msrb.mxu1 %v6444_v41 }
 0x29f   : > { %v6313_v24 = vld [vmem:[#allocation7 + $0x9f8] sm:$0xf0]  ;;  %4408 = vmatpush.bf16.msra.mxu2 %v5772_v32 }
 0x2a0   : > { %v7381_v63 = vld [vmem:[#allocation7 + $0x51c] sm:$0xf]  ;;  %v6316_v8 = vor.u32 %v7533_v42, %v6313_v24 }
 0x2a1   : > { %v5705_v3 = vld [vmem:[#allocation7 + $0x538] sm:$0xf0]  ;;  %4372 = vmatpush.bf16.msrb.mxu3 %v6856_v1  ;;  %4386 = vmatpush.bf16.msra.mxu0 %v5068_v49  ;;  %v8619_v49 = vpop.f32.mrf.mxu0 }
 0x2a2   : > { %v7461_v4 = vld [vmem:[#allocation7 + $0x79c] sm:$0xf]  ;;  %v5708_v54 = vor.u32 %v7381_v63, %v5705_v3 }
 0x2a3   : > { %v6025_v13 = vld [vmem:[#allocation7 + $0x7b8] sm:$0xf0]  ;;  %4409 = vmatpush.bf16.msra.mxu2 %v5740_v50 }
 0x2a4   : > { %v7557_v26 = vld [vmem:[#allocation7 + $0xa9c] sm:$0xf]  ;;  %v6028_v6 = vor.u32 %v7461_v4, %v6025_v13  ;;  %4373 = vmatmul.bf16.vlgmr.msrb.gmra.mxu3 %v8484_v51  ;;  %4387 = vmatmul.bf16.vlgmr.msra.gmra.mxu0 %v8449_v35  ;;  %v8621_v35 = vpop.f32.mrf.mxu1 }
 0x2a5   : > { %v6409_v27 = vld [vmem:[#allocation7 + $0xab8] sm:$0xf0]  ;;  %4421 = vmatpush.bf16.msra.mxu3 %v6060_v60  ;;  %4435 = vmatpush.bf16.msrb.mxu0 %v6316_v8 }
 0x2a6   : > { %v7525_v28 = vld [vmem:[#allocation7 + $0x99c] sm:$0xf]  ;;  %v6412_v40 = vor.u32 %v7557_v26, %v6409_v27 }
 0x2a7   : > { %v6281_v55 = vld [vmem:[#allocation7 + $0x9b8] sm:$0xf0]  ;;  %4410 = vmatpush.bf16.msra.mxu2 %v5708_v54 }
 0x2a8   : > { %v7373_v19 = vld [vmem:[#allocation7 + $0x4dc] sm:$0xf]  ;;  %v6284_v30 = vor.u32 %v7525_v28, %v6281_v55  ;;  %4454 = vmatpush.bf16.msrb.mxu1 %v6412_v40 }
 0x2a9   : > { %v5673_v43 = vld [vmem:[#allocation7 + $0x4f8] sm:$0xf0]  ;;  %4422 = vmatpush.bf16.msra.mxu3 %v6028_v6 }
 0x2aa   : > { %v7549_v15 = vld [vmem:[#allocation7 + $0xa5c] sm:$0xf]  ;;  %v5676_v7 = vor.u32 %v7373_v19, %v5673_v43  ;;  %4436 = vmatpush.bf16.msrb.mxu0 %v6284_v30 }
 0x2ab   : > { %v7453_v59 = vld [vmem:[#allocation7 + $0x75c] sm:$0xf] }
 0x2ac   : > { %v5993_v31 = vld [vmem:[#allocation7 + $0x778] sm:$0xf0]  ;;  %4411 = vmatpush.bf16.msra.mxu2 %v5676_v7  ;;  %v8626_v7 = vpop.f32.mrf.mxu3 }
 0x2ad   : > { %v6377_v2 = vld [vmem:[#allocation7 + $0xa78] sm:$0xf0]  ;;  %v5996_v36 = vor.u32 %v7453_v59, %v5993_v31  ;;  %v8624_v31 = vpop.f32.mrf.mxu2 }
 0x2ae   : > { %v7517_v29 = vld [vmem:[#allocation7 + $0x95c] sm:$0xf]  ;;  %v6380_v32 = vor.u32 %v7549_v15, %v6377_v2 }
 0x2af   : > { %v6249_v12 = vld [vmem:[#allocation7 + $0x978] sm:$0xf0]  ;;  %4423 = vmatpush.bf16.msra.mxu3 %v5996_v36 }
 0x2b0   : > { %v7365_v37 = vld [vmem:[#allocation7 + $0x49c] sm:$0xf]  ;;  %v6252_v22 = vor.u32 %v7517_v29, %v6249_v12  ;;  %4455 = vmatpush.bf16.msrb.mxu1 %v6380_v32  ;;  %v4054_v32 = vpop.f32.mrf.mxu0 }
 0x2b1   : > { %v7541_v38 = vld [vmem:[#allocation7 + $0xa1c] sm:$0xf] }
 0x2b2   : > { %v6345_v39 = vld [vmem:[#allocation7 + $0xa38] sm:$0xf0]  ;;  %4437 = vmatpush.bf16.msrb.mxu0 %v6252_v22 }
 0x2b3   : > { %v5641_v41 = vld [vmem:[#allocation7 + $0x4b8] sm:$0xf0]  ;;  %v6348_v1 = vor.u32 %v7541_v38, %v6345_v39 }
 0x2b4   : > { %v7445_v42 = vld [vmem:[#allocation7 + $0x71c] sm:$0xf]  ;;  %v5644_v63 = vor.u32 %v7365_v37, %v5641_v41 }
 0x2b5   : > { %v5961_v24 = vld [vmem:[#allocation7 + $0x738] sm:$0xf0]  ;;  %4456 = vmatpush.bf16.msrb.mxu1 %v6348_v1 }
 0x2b6   : > { %v7509_v50 = vld [vmem:[#allocation7 + $0x91c] sm:$0xf]  ;;  %v5964_v3 = vor.u32 %v7445_v42, %v5961_v24  ;;  %4412 = vmatpush.bf16.msra.mxu2 %v5644_v63  ;;  %v4068_v24 = vpop.f32.mrf.mxu1 }
 0x2b7   : > { %v6217_v60 = vld [vmem:[#allocation7 + $0x938] sm:$0xf0] }
 0x2b8   : > { %v7357_v4 = vld [vmem:[#allocation7 + $0x45c] sm:$0xf]  ;;  %v6220_v8 = vor.u32 %v7509_v50, %v6217_v60  ;;  %4424 = vmatpush.bf16.msra.mxu3 %v5964_v3  ;;  %4457 = vmatmul.bf16.vlgmr.msrb.gmra.mxu1 %v8425_v23 }
 0x2b9   : > { %v5609_v13 = vld [vmem:[#allocation7 + $0x478] sm:$0xf0] }
 0x2ba   : > { %v7437_v26 = vld [vmem:[#allocation7 + $0x6dc] sm:$0xf]  ;;  %v5612_v40 = vor.u32 %v7357_v4, %v5609_v13  ;;  %4438 = vmatpush.bf16.msrb.mxu0 %v6220_v8 }
 0x2bb   : > { %v5929_v27 = vld [vmem:[#allocation7 + $0x6f8] sm:$0xf0] }
 0x2bc   : > { %v7501_v28 = vld [vmem:[#allocation7 + $0x8dc] sm:$0xf]  ;;  %v5932_v54 = vor.u32 %v7437_v26, %v5929_v27  ;;  %4413 = vmatpush.bf16.msra.mxu2 %v5612_v40 }
 0x2bd   : > { %v6185_v55 = vld [vmem:[#allocation7 + $0x8f8] sm:$0xf0] }
 0x2be   : > { %v7349_v6 = vld [vmem:[#allocation7 + $0x41c] sm:$0xf]  ;;  %v6188_v43 = vor.u32 %v7501_v28, %v6185_v55  ;;  %4425 = vmatpush.bf16.msra.mxu3 %v5932_v54  ;;  %v4082_v54 = vpop.f32.mrf.mxu2 }
 0x2bf   : > { %v5577_v19 = vld [vmem:[#allocation7 + $0x438] sm:$0xf0] }
 0x2c0   : > { %v7429_v15 = vld [vmem:[#allocation7 + $0x69c] sm:$0xf]  ;;  %v5580_v36 = vor.u32 %v7349_v6, %v5577_v19  ;;  %4439 = vmatpush.bf16.msrb.mxu0 %v6188_v43 }
 0x2c1   : > { %v5897_v30 = vld [vmem:[#allocation7 + $0x6b8] sm:$0xf0] }
 0x2c2   : > { %v7493_v59 = vld [vmem:[#allocation7 + $0x89c] sm:$0xf]  ;;  %v5900_v37 = vor.u32 %v7429_v15, %v5897_v30  ;;  %4414 = vmatpush.bf16.msra.mxu2 %v5580_v36  ;;  %v8629_v15 = vpop.f32.mrf.mxu0  ;;  %v4096_v30 = vpop.f32.mrf.mxu3 }
 0x2c3   : > { %v6153_v2 = vld [vmem:[#allocation7 + $0x8b8] sm:$0xf0] }
 0x2c4   : > { %v7661_v29 = vld [vmem:[#allocation7 + $0xddc] sm:$0xf]  ;;  %v6156_v38 = vor.u32 %v7493_v59, %v6153_v2  ;;  %4426 = vmatpush.bf16.msra.mxu3 %v5900_v37 }
 0x2c5   : > { %v6825_v12 = vld [vmem:[#allocation7 + $0xdf8] sm:$0xf0]  ;;  %4415 = vmatmul.bf16.vlgmr.msra.gmra.mxu2 %v8463_v21 }
 0x2c6   : > { %v6828_v39 = vor.u32 %v7661_v29, %v6825_v12  ;;  %v7421_v22 = vld [vmem:[#allocation7 + $0x65c] sm:$0xf]  ;;  %4440 = vmatpush.bf16.msrb.mxu0 %v6156_v38  ;;  %v8631_v38 = vpop.f32.mrf.mxu1 }
 0x2c7   : > { %v5865_v41 = vld [vmem:[#allocation7 + $0x678] sm:$0xf0] }
 0x2c8   : > { %v7485_v42 = vld [vmem:[#allocation7 + $0x85c] sm:$0xf]  ;;  %v5868_v60 = vor.u32 %v7421_v22, %v5865_v41  ;;  %4463 = vmatpush.bf16.msrb.mxu2 %v6828_v39  ;;  %v4069_v39 = vadd.f32 %v4068_v24, %v4054_v32  ;;  %v3621_v32 = vadd.f32 %v8504_v47, %v8506_v56  ;;  %v7743_v47 = vld [vmem:[#allocation8 + $0x68] sm:$0xff] }
 0x2c9   : > { %v6121_v23 = vld [vmem:[#allocation7 + $0x878] sm:$0xf0] }
 0x2ca   : > { %v7653_v1 = vld [vmem:[#allocation7 + $0xd9c] sm:$0xf]  ;;  %v6124_v63 = vor.u32 %v7485_v42, %v6121_v23  ;;  %4427 = vmatpush.bf16.msra.mxu3 %v5868_v60  ;;  %v7736_v42 = vld [vmem:[#allocation8 + $0x30] sm:$0xff]  ;;  %v4083_v24 = vadd.f32 %v4082_v54, %v4069_v39  ;;  %v4110_v56 = vpop.f32.mrf.mxu0 }
 0x2cb   : > { %v6793_v50 = vld [vmem:[#allocation7 + $0xdb8] sm:$0xf0] }
 0x2cc   : > { %v6796_v3 = vor.u32 %v7653_v1, %v6793_v50  ;;  %v7413_v4 = vld [vmem:[#allocation7 + $0x61c] sm:$0xf]  ;;  %4441 = vmatpush.bf16.msrb.mxu0 %v6124_v63  ;;  %v4067_v50 = vadd.f32 %v8621_v35, %v8619_v49 }
 0x2cd   : > { %v5833_v8 = vld [vmem:[#allocation7 + $0x638] sm:$0xf0] }
 0x2ce   : > { %v7477_v13 = vld [vmem:[#allocation7 + $0x81c] sm:$0xf]  ;;  %v5836_v6 = vor.u32 %v7413_v4, %v5833_v8  ;;  %4464 = vmatpush.bf16.msrb.mxu2 %v6796_v3  ;;  %v7744_v3 = vld [vmem:[#allocation8 + $0x70] sm:$0xff]  ;;  %v8636_v4 = vpop.f32.mrf.mxu2 }
 0x2cf   : > { %v6089_v26 = vld [vmem:[#allocation7 + $0x838] sm:$0xf0] }
 0x2d0   : > { %v7645_v27 = vld [vmem:[#allocation7 + $0xd5c] sm:$0xf]  ;;  %v6092_v19 = vor.u32 %v7477_v13, %v6089_v26  ;;  %4428 = vmatpush.bf16.msra.mxu3 %v5836_v6  ;;  %v8641_v13 = vpop.f32.mrf.mxu3 }
 0x2d1   : > { %v6761_v28 = vld [vmem:[#allocation7 + $0xd78] sm:$0xf0] }
 0x2d2   : > { %v7725_v55 = vld [vmem:[#allocation7 + $0xfdc] sm:$0xf]  ;;  %v6764_v43 = vor.u32 %v7645_v27, %v6761_v28  ;;  %4442 = vmatpush.bf16.msrb.mxu0 %v6092_v19  ;;  %v3635_v27 = vadd.f32 %v8515_v58, %v3621_v32  ;;  %v4081_v28 = vadd.f32 %v8624_v31, %v4067_v50 }
 0x2d3   : > { %v7081_v40 = vld [vmem:[#allocation7 + $0xff8] sm:$0xf0]  ;;  %4429 = vmatmul.bf16.vlgmr.msra.gmra.mxu3 %v8470_v52  ;;  %v7735_v52 = vld [vmem:[#allocation8 + $0x28] sm:$0xff] }
 0x2d4   : > { %v7084_v59 = vor.u32 %v7725_v55, %v7081_v40  ;;  %v7737_v2 = vld [vmem:[#allocation8 + $0x38] sm:$0xff]  ;;  %4465 = vmatpush.bf16.msrb.mxu2 %v6764_v43  ;;  %v4097_v55 = vadd.f32 %v4096_v30, %v4083_v24  ;;  %v3649_v54 = vadd.f32 %v8521_v34, %v3635_v27  ;;  %v4095_v6 = vadd.f32 %v8626_v7, %v4081_v28  ;;  %v4124_v43 = vpop.f32.mrf.mxu1 }
 0x2d5   : > { %v7637_v29 = vld [vmem:[#allocation7 + $0xd1c] sm:$0xf]  ;;  %4443 = vmatmul.bf16.vlgmr.msrb.gmra.mxu0 %v8472_v53 }
 0x2d6   : > { %v6729_v12 = vld [vmem:[#allocation7 + $0xd38] sm:$0xf0]  ;;  %4477 = vmatpush.bf16.msrb.mxu3 %v7084_v59  ;;  %4775 = vmatpush.bf16.msra.mxu0 %v7737_v2  ;;  %v7734_v2 = vld [vmem:[#allocation8 + $0x20] sm:$0xff]  ;;  %v4111_v31 = vadd.f32 %v4110_v56, %v4097_v55  ;;  %v4109_v34 = vadd.f32 %v8629_v15, %v4095_v6  ;;  %v7731_v56 = vld [vmem:[#allocation8 + $0x8] sm:$0xff] }
 0x2d7   : > { %v7717_v36 = vld [vmem:[#allocation7 + $0xf9c] sm:$0xf]  ;;  %v6732_v22 = vor.u32 %v7637_v29, %v6729_v12 }
 0x2d8   : > { %v7049_v37 = vld [vmem:[#allocation7 + $0xfb8] sm:$0xf0]  ;;  %v4123_v15 = vadd.f32 %v8631_v38, %v4109_v34  ;;  %v3733_v34 = vadd.f32 %v8534_v48, %v8532_v0 }
 0x2d9   : > { %v7745_v21 = vld [vmem:[#allocation8 + $0x78] sm:$0xff]  ;;  %v7052_v41 = vor.u32 %v7717_v36, %v7049_v37  ;;  %4466 = vmatpush.bf16.msrb.mxu2 %v6732_v22  ;;  %v7742_v36 = vld [vmem:[#allocation8 + $0x60] sm:$0xff]  ;;  %v3663_v37 = vadd.f32 %v8518_v9, %v3649_v54 }
 0x2da   : > { %v7629_v23 = vld [vmem:[#allocation7 + $0xcdc] sm:$0xf]  ;;  %4789 = vmatpush.bf16.msra.mxu1 %v7745_v21  ;;  %4776 = vmatpush.bf16.msra.mxu0 %v7736_v42  ;;  %v4138_v21 = vpop.f32.mrf.mxu2 }
 0x2db   : > { %v6697_v1 = vld [vmem:[#allocation7 + $0xcf8] sm:$0xf0]  ;;  %4478 = vmatpush.bf16.msrb.mxu3 %v7052_v41  ;;  %v3677_v9 = vadd.f32 %v8513_v57, %v3663_v37 }
 0x2dc   : > { %v7709_v60 = vld [vmem:[#allocation7 + $0xf5c] sm:$0xf]  ;;  %v6700_v8 = vor.u32 %v7629_v23, %v6697_v1  ;;  %v4125_v23 = vadd.f32 %v4124_v43, %v4111_v31 }
 0x2dd   : > { %v7017_v63 = vld [vmem:[#allocation7 + $0xf78] sm:$0xf0] }
 0x2de   : > { %v7020_v49 = vor.u32 %v7709_v60, %v7017_v63  ;;  %v7621_v35 = vld [vmem:[#allocation7 + $0xc9c] sm:$0xf]  ;;  %4790 = vmatpush.bf16.msra.mxu1 %v7744_v3  ;;  %4467 = vmatpush.bf16.msrb.mxu2 %v6700_v8  ;;  %v4164_v60 = vpop.f32.mrf.mxu0  ;;  %v4152_v63 = vpop.f32.mrf.mxu3  ;;  %v4139_v32 = vadd.f32 %v4138_v21, %v4125_v23 }
 0x2df   : > { %v6665_v26 = vld [vmem:[#allocation7 + $0xcb8] sm:$0xf0]  ;;  %4777 = vmatpush.bf16.msra.mxu0 %v7735_v52  ;;  %v4178_v8 = vpop.f32.mrf.mxu1  ;;  %v7732_v52 = vld [vmem:[#allocation8 + $0x10] sm:$0xff] }
 0x2e0   : > { %v7701_v53 = vld [vmem:[#allocation7 + $0xf1c] sm:$0xf]  ;;  %v6668_v19 = vor.u32 %v7621_v35, %v6665_v26  ;;  %4479 = vmatpush.bf16.msrb.mxu3 %v7020_v49  ;;  %v3691_v35 = vadd.f32 %v8526_v14, %v3677_v9  ;;  %v4137_v26 = vadd.f32 %v8636_v4, %v4123_v15  ;;  %v4153_v27 = vadd.f32 %v4152_v63, %v4139_v32  ;;  %v7739_v4 = vld [vmem:[#allocation8 + $0x48] sm:$0xff] }
 0x2e1   : > { %v6985_v40 = vld [vmem:[#allocation7 + $0xf38] sm:$0xf0]  ;;  %v4179_v37 = vadd.f32 %v4178_v8, %v4164_v60 }
 0x2e2   : > { %v6988_v59 = vor.u32 %v7701_v53, %v6985_v40  ;;  %v7613_v58 = vld [vmem:[#allocation7 + $0xc5c] sm:$0xf]  ;;  %4791 = vmatpush.bf16.msra.mxu1 %v7743_v47  ;;  %4468 = vmatpush.bf16.msrb.mxu2 %v6668_v19  ;;  %v7740_v53 = vld [vmem:[#allocation8 + $0x50] sm:$0xff]  ;;  %v3705_v57 = vadd.f32 %v8536_v17, %v3691_v35  ;;  %v4151_v38 = vadd.f32 %v8641_v13, %v4137_v26  ;;  %v4192_v40 = vpop.f32.mrf.mxu2  ;;  %v7730_v13 = vld [vmem:[#allocation8] sm:$0xff] }
 0x2e3   : > { %v6633_v29 = vld [vmem:[#allocation7 + $0xc78] sm:$0xf0]  ;;  %4778 = vmatpush.bf16.msra.mxu0 %v7734_v2  ;;  %v4503_v54 = vmul.f32 %v4153_v27, %v4153_v27  ;;  %v4491_v2 = vmul.f32 %v8528_v16, %v8528_v16  ;;  %v4193_v16 = vadd.f32 %v4192_v40, %v4179_v37 }
 0x2e4   : > { %v7693_v30 = vld [vmem:[#allocation7 + $0xedc] sm:$0xf]  ;;  %v6636_v7 = vor.u32 %v7613_v58, %v6633_v29  ;;  %4480 = vmatpush.bf16.msrb.mxu3 %v6988_v59  ;;  %v4495_v19 = vmul.f32 %v3705_v57, %v3705_v57  ;;  %v4499_v43 = vmul.f32 %v4151_v38, %v4151_v38 }
 0x2e5   : > { %v6953_v12 = vld [vmem:[#allocation7 + $0xef8] sm:$0xf0] }
 0x2e6   : > { %v6956_v39 = vor.u32 %v7693_v30, %v6953_v12  ;;  %v7733_v22 = vld [vmem:[#allocation8 + $0x18] sm:$0xff]  ;;  %4792 = vmatpush.bf16.msra.mxu1 %v7742_v36  ;;  %4469 = vmatpush.bf16.msrb.mxu2 %v6636_v7  ;;  %v4166_v59 = vpop.f32.mrf.mxu0  ;;  %v4511_v58 = vadd.f32 %v4503_v54, %v4495_v19  ;;  %v4206_v31 = vpop.f32.mrf.mxu3  ;;  %v7738_v30 = vld [vmem:[#allocation8 + $0x40] sm:$0xff]  ;;  %v4507_v12 = vadd.f32 %v4499_v43, %v4491_v2 }
 0x2e7   : > { %v7605_v41 = vld [vmem:[#allocation7 + $0xc1c] sm:$0xf]  ;;  %4779 = vmatpush.bf16.msra.mxu0 %v7733_v22  ;;  %v4180_v29 = vpop.f32.mrf.mxu1  ;;  %v7746_v43 = vld [vmem:[#allocation8 + $0x80] sm:$0xff] }
 0x2e8   : > { %v6601_v42 = vld [vmem:[#allocation7 + $0xc38] sm:$0xf0]  ;;  %4481 = vmatpush.bf16.msrb.mxu3 %v6956_v39  ;;  %v4181_v21 = vadd.f32 %v4180_v29, %v4166_v59 }
 0x2e9   : > { %v7685_v1 = vld [vmem:[#allocation7 + $0xe9c] sm:$0xf]  ;;  %v6604_v24 = vor.u32 %v7605_v41, %v6601_v42  ;;  %v3747_v41 = vadd.f32 %v8543_v33, %v3733_v34  ;;  %v4207_v42 = vadd.f32 %v4206_v31, %v4193_v16 }
 0x2ea   : > { %v6921_v50 = vld [vmem:[#allocation7 + $0xeb8] sm:$0xf0]  ;;  %v4194_v36 = vpop.f32.mrf.mxu2 }
 0x2eb   : > { %v7741_v3 = vld [vmem:[#allocation8 + $0x58] sm:$0xff]  ;;  %v6924_v49 = vor.u32 %v7685_v1, %v6921_v50  ;;  %4470 = vmatpush.bf16.msrb.mxu2 %v6604_v24  ;;  %4780 = vmatpush.bf16.msra.mxu0 %v7732_v52  ;;  %v3761_v1 = vadd.f32 %v8551_v20, %v3747_v41  ;;  %v4195_v50 = vadd.f32 %v4194_v36, %v4181_v21 }
 0x2ec   : > { %v7677_v28 = vld [vmem:[#allocation7 + $0xe5c] sm:$0xf]  ;;  %4793 = vmatpush.bf16.msra.mxu1 %v7741_v3 }
 0x2ed   : > { %v6889_v55 = vld [vmem:[#allocation7 + $0xe78] sm:$0xf0]  ;;  %4482 = vmatpush.bf16.msrb.mxu3 %v6924_v49 }
 0x2ee   : > { %v6892_v47 = vor.u32 %v7677_v28, %v6889_v55  ;;  %v7669_v6 = vld [vmem:[#allocation7 + $0xe1c] sm:$0xf]  ;;  %4471 = vmatmul.bf16.vlgmr.msrb.gmra.mxu2 %v8441_v46  ;;  %v4515_v46 = vpack.c.bf16 %v4511_v58, %v4507_v12  ;;  %v4220_v7 = vpop.f32.mrf.mxu0  ;;  %v4208_v22 = vpop.f32.mrf.mxu3  ;;  %v4492_v55 = vmul.f32 %v8557_v5, %v8557_v5 }
 0x2ef   : > { %v6857_v14 = vld [vmem:[#allocation7 + $0xe38] sm:$0xf0]  ;;  %4781 = vmatpush.bf16.msra.mxu0 %v7731_v56  ;;  %v4234_v39 = vpop.f32.mrf.mxu1  ;;  %v4221_v63 = vadd.f32 %v4220_v7, %v4207_v42  ;;  %v4209_v60 = vadd.f32 %v4208_v22, %v4195_v50 }
 0x2f0   : > { %4794 = vmatpush.bf16.msra.mxu1 %v7740_v53  ;;  %v6860_v17 = vor.u32 %v7669_v6, %v6857_v14  ;;  %v7749_v56 = vld [vmem:[#allocation8 + $0x98] sm:$0xff]  ;;  %v7748_v14 = vld [vmem:[#allocation8 + $0x90] sm:$0xff] }
 0x2f1   : > { %4483 = vmatpush.bf16.msrb.mxu3 %v6892_v47  ;;  %v4235_v15 = vadd.f32 %v4234_v39, %v4221_v63 }
 0x2f2   : > { %v4248_v23 = vpop.f32.mrf.mxu2 }
 0x2f3   : > { %4782 = vmatpush.bf16.msra.mxu0 %v7730_v13  ;;  %v4249_v24 = vadd.f32 %v4248_v23, %v4235_v15  ;;  %v4493_v15 = vmul.f32 %v8586_v62, %v8586_v62  ;;  %v7756_v62 = vld [vmem:[#allocation8 + $0xd0] sm:$0xff] }
 0x2f4   : > { %4795 = vmatpush.bf16.msra.mxu1 %v7739_v4  ;;  %v7747_v4 = vld [vmem:[#allocation8 + $0x88] sm:$0xff] }
 0x2f5   : > { %4484 = vmatpush.bf16.msrb.mxu3 %v6860_v17 }
 0x2f6   : > { %4783 = vmatmul.bf16.vlgmr.msra.gmra.mxu0 %v4515_v46  ;;  %v4222_v3 = vpop.f32.mrf.mxu0  ;;  %v4262_v9 = vpop.f32.mrf.mxu3 }
 0x2f7   : > { %v4223_v0 = vadd.f32 %v4222_v3, %v4209_v60  ;;  %v4236_v48 = vpop.f32.mrf.mxu1  ;;  %v4263_v52 = vadd.f32 %v4262_v9, %v4249_v24  ;;  %v7761_v9 = vld [vmem:[#allocation8 + $0xf8] sm:$0xff] }
 0x2f8   : > { %4796 = vmatpush.bf16.msra.mxu1 %v7738_v30  ;;  %4485 = vmatmul.bf16.vlgmr.msrb.gmra.mxu3 %v8484_v51  ;;  %v3775_v51 = vadd.f32 %v8545_v44, %v3761_v1  ;;  %v7753_v44 = vld [vmem:[#allocation8 + $0xb8] sm:$0xff] }
 0x2f9   : > { %v4237_v49 = vadd.f32 %v4236_v48, %v4223_v0  ;;  %v4500_v27 = vmul.f32 %v4263_v52, %v4263_v52  ;;  %4803 = vmatpush.bf16.msra.mxu2 %v7753_v44  ;;  %v4497_v0 = vmul.f32 %v8591_v18, %v8591_v18  ;;  %4817 = vmatpush.bf16.msra.mxu3 %v7761_v9  ;;  %v7758_v52 = vld [vmem:[#allocation8 + $0xe0] sm:$0xff]  ;;  %v7755_v18 = vld [vmem:[#allocation8 + $0xc8] sm:$0xff] }
 0x2fa   : > { %v3789_v32 = vadd.f32 %v8547_v45, %v3775_v51  ;;  %v4250_v8 = vpop.f32.mrf.mxu2  ;;  %v7752_v45 = vld [vmem:[#allocation8 + $0xb0] sm:$0xff]  ;;  %v7754_v44 = vld [vmem:[#allocation8 + $0xc0] sm:$0xff] }
 0x2fb   : > { %v4251_v35 = vadd.f32 %v4250_v8, %v4237_v49  ;;  %v4508_v38 = vadd.f32 %v4500_v27, %v4492_v55  ;;  %v7759_v49 = vld [vmem:[#allocation8 + $0xe8] sm:$0xff] }
 0x2fc   : > { %v3803_v33 = vadd.f32 %v8560_v11, %v3789_v32  ;;  %v7751_v11 = vld [vmem:[#allocation8 + $0xa8] sm:$0xff]  ;;  %v7760_v32 = vld [vmem:[#allocation8 + $0xf0] sm:$0xff] }
 0x2fd   : > { %4804 = vmatpush.bf16.msra.mxu2 %v7752_v45  ;;  %4818 = vmatpush.bf16.msra.mxu3 %v7760_v32 }
 0x2fe   : > { %v3817_v20 = vadd.f32 %v8568_v61, %v3803_v33  ;;  %v4264_v26 = vpop.f32.mrf.mxu3  ;;  %v7750_v61 = vld [vmem:[#allocation8 + $0xa0] sm:$0xff]  ;;  %v4276_v54 = vpop.f32.mrf.mxu0 }
 0x2ff   : > { %v4265_v28 = vadd.f32 %v4264_v26, %v4251_v35  ;;  %v4290_v6 = vpop.f32.mrf.mxu1 }
 0x300   : > { %v4496_v53 = vmul.f32 %v3817_v20, %v3817_v20  ;;  %v4291_v2 = vadd.f32 %v4290_v6, %v4276_v54  ;;  %v7757_v20 = vld [vmem:[#allocation8 + $0xd8] sm:$0xff] }
 0x301   : > { %v4504_v57 = vmul.f32 %v4265_v28, %v4265_v28  ;;  %4805 = vmatpush.bf16.msra.mxu2 %v7751_v11  ;;  %4819 = vmatpush.bf16.msra.mxu3 %v7759_v49 }
 0x302   : > { %v4304_v5 = vpop.f32.mrf.mxu2 }
 0x303   : > { %v4512_v40 = vadd.f32 %v4504_v57, %v4496_v53  ;;  %v4305_v29 = vadd.f32 %v4304_v5, %v4291_v2 }
 0x305   : > { %v4516_v47 = vpack.c.bf16 %v4512_v40, %v4508_v38  ;;  %4806 = vmatpush.bf16.msra.mxu2 %v7750_v61  ;;  %4820 = vmatpush.bf16.msra.mxu3 %v7758_v52 }
 0x306   : > { %v4278_v19 = vpop.f32.mrf.mxu0  ;;  %v4318_v17 = vpop.f32.mrf.mxu3 }
 0x307   : > { %4797 = vmatmul.bf16.vlgmr.msra.gmra.mxu1 %v4516_v47  ;;  %v4292_v59 = vpop.f32.mrf.mxu1  ;;  %v4319_v46 = vadd.f32 %v4318_v17, %v4305_v29 }
 0x308   : > { %v4293_v31 = vadd.f32 %v4292_v59, %v4278_v19 }
 0x309   : > { %4807 = vmatpush.bf16.msra.mxu2 %v7749_v56  ;;  %4821 = vmatpush.bf16.msra.mxu3 %v7757_v20 }
 0x30a   : > { %v4306_v13 = vpop.f32.mrf.mxu2 }
 0x30b   : > { %v4307_v37 = vadd.f32 %v4306_v13, %v4293_v31 }
 0x30d   : > { %4808 = vmatpush.bf16.msra.mxu2 %v7748_v14  ;;  %4822 = vmatpush.bf16.msra.mxu3 %v7756_v62 }
 0x30e   : > { %v4332_v58 = vpop.f32.mrf.mxu0  ;;  %v4320_v12 = vpop.f32.mrf.mxu3 }
 0x30f   : > { %v4346_v30 = vpop.f32.mrf.mxu1  ;;  %v4333_v34 = vadd.f32 %v4332_v58, %v4319_v46  ;;  %v4321_v7 = vadd.f32 %v4320_v12, %v4307_v37  ;;  %v4498_v37 = vmul.f32 %v8611_v10, %v8611_v10 }
 0x311   : > { %4809 = vmatpush.bf16.msra.mxu2 %v7747_v4  ;;  %v4347_v39 = vadd.f32 %v4346_v30, %v4333_v34  ;;  %4823 = vmatpush.bf16.msra.mxu3 %v7755_v18 }
 0x315   : > { %4810 = vmatpush.bf16.msra.mxu2 %v7746_v43  ;;  %4824 = vmatpush.bf16.msra.mxu3 %v7754_v44 }
 0x316   : > { %v4334_v16 = vpop.f32.mrf.mxu0 }
 0x317   : > { %v4335_v22 = vadd.f32 %v4334_v16, %v4321_v7  ;;  %v4348_v41 = vpop.f32.mrf.mxu1 }
 0x319   : > { %v4349_v1 = vadd.f32 %v4348_v41, %v4335_v22 }
 0x31d   : > { %v4360_v36 = vpop.f32.mrf.mxu2 }
 0x31e   : > { %v4361_v42 = vadd.f32 %v4360_v36, %v4347_v39  ;;  %v4494_v36 = vmul.f32 %v8608_v25, %v8608_v25 }
 0x31f   : > { %v4402_v26 = vpop.f32.mrf.mxu1 }
 0x321   : > { %v4388_v35 = vpop.f32.mrf.mxu0 }
 0x322   : > { %v4403_v45 = vadd.f32 %v4402_v26, %v4388_v35 }
 0x325   : > { %v4362_v23 = vpop.f32.mrf.mxu2 }
 0x326   : > { %v4363_v63 = vadd.f32 %v4362_v23, %v4349_v1 }
 0x327   : > { %v4374_v21 = vpop.f32.mrf.mxu3  ;;  %v4404_v55 = vpop.f32.mrf.mxu1 }
 0x328   : > { %v4375_v50 = vadd.f32 %v4374_v21, %v4361_v42 }
 0x329   : > { %v4390_v28 = vpop.f32.mrf.mxu0 }
 0x32a   : > { %v4501_v51 = vmul.f32 %v4375_v50, %v4375_v50  ;;  %v4405_v47 = vadd.f32 %v4404_v55, %v4390_v28 }
 0x32c   : > { %v4509_v24 = vadd.f32 %v4501_v51, %v4493_v15 }
 0x32f   : > { %v4376_v60 = vpop.f32.mrf.mxu3 }
 0x330   : > { %v4377_v3 = vadd.f32 %v4376_v60, %v4363_v63 }
 0x332   : > { %v4505_v48 = vmul.f32 %v4377_v3, %v4377_v3 }
 0x334   : > { %v4513_v8 = vadd.f32 %v4505_v48, %v4497_v0  ;;  %v7905_v0 = vld [vmem:[#allocation10] ss:$0 sm:$0xff] }
 0x335   : > { %v4458_v11 = vpop.f32.mrf.mxu1 }
 0x336   : > { %v4517_v33 = vpack.c.bf16 %v4513_v8, %v4509_v24  ;;  %v7906_v8 = vld [vmem:[#allocation11] ss:$0 sm:$0xff] }
 0x338   : > { %4811 = vmatmul.bf16.vlgmr.msra.gmra.mxu2 %v4517_v33 }
 0x33d   : > { %v4460_v17 = vpop.f32.mrf.mxu1 }
 0x348   : > { %v4416_v27 = vpop.f32.mrf.mxu2 }
 0x349   : > { %v4417_v40 = vadd.f32 %v4416_v27, %v4403_v45 }
 0x350   : > { %v4418_v57 = vpop.f32.mrf.mxu2 }
 0x351   : > { %v4419_v6 = vadd.f32 %v4418_v57, %v4405_v47 }
 0x352   : > { %v4444_v38 = vpop.f32.mrf.mxu0 }
 0x356   : > { %v4430_v53 = vpop.f32.mrf.mxu3 }
 0x357   : > { %v4431_v56 = vadd.f32 %v4430_v53, %v4417_v40 }
 0x359   : > { %v4445_v14 = vadd.f32 %v4444_v38, %v4431_v56 }
 0x35a   : > { %v4446_v4 = vpop.f32.mrf.mxu0 }
 0x35b   : > { %v4459_v43 = vadd.f32 %v4458_v11, %v4445_v14 }
 0x35e   : > { %v4432_v61 = vpop.f32.mrf.mxu3 }
 0x35f   : > { %v4433_v5 = vadd.f32 %v4432_v61, %v4419_v6 }
 0x361   : > { %v4447_v59 = vadd.f32 %v4446_v4, %v4433_v5 }
 0x363   : > { %v4461_v58 = vadd.f32 %v4460_v17, %v4447_v59 }
 0x371   : > { %v4472_v54 = vpop.f32.mrf.mxu2 }
 0x372   : > { %v4473_v13 = vadd.f32 %v4472_v54, %v4459_v43 }
 0x373   : > { %v4784_v22 = vpop.f32.mrf.mxu0 }
 0x379   : > { %v4474_v2 = vpop.f32.mrf.mxu2 }
 0x37a   : > { %v4475_v31 = vadd.f32 %v4474_v2, %v4461_v58 }
 0x37b   : > { %v4486_v19 = vpop.f32.mrf.mxu3  ;;  %v4786_v25 = vpop.f32.mrf.mxu0 }
 0x37c   : > { %v4487_v29 = vadd.f32 %v4486_v19, %v4473_v13 }
 0x37e   : > { %v4502_v12 = vmul.f32 %v4487_v29, %v4487_v29 }
 0x380   : > { %v4510_v7 = vadd.f32 %v4502_v12, %v4494_v36 }
 0x383   : > { %v4488_v30 = vpop.f32.mrf.mxu3 }
 0x384   : > { %v4489_v46 = vadd.f32 %v4488_v30, %v4475_v31  ;;  %v4798_v39 = vpop.f32.mrf.mxu1 }
 0x385   : > { %v4799_v42 = vadd.f32 %v4798_v39, %v4784_v22 }
 0x386   : > { %v4506_v34 = vmul.f32 %v4489_v46, %v4489_v46 }
 0x388   : > { %v4514_v16 = vadd.f32 %v4506_v34, %v4498_v37 }
 0x38a   : > { %v4518_v21 = vpack.c.bf16 %v4514_v16, %v4510_v7 }
 0x38c   : > { %4825 = vmatmul.bf16.vlgmr.msra.gmra.mxu3 %v4518_v21  ;;  %v4800_v63 = vpop.f32.mrf.mxu1 }
 0x38d   : > { %v4801_v3 = vadd.f32 %v4800_v63, %v4786_v25 }
 0x3bb   : > { %v4812_v41 = vpop.f32.mrf.mxu2 }
 0x3bc   : > { %v4813_v23 = vadd.f32 %v4812_v41, %v4799_v42 }
 0x3c3   : > { %v4814_v51 = vpop.f32.mrf.mxu2 }
 0x3c4   : > { %v4815_v10 = vadd.f32 %v4814_v51, %v4801_v3 }
 0x40f   : > { %v4826_v1 = vpop.f32.mrf.mxu3 }
 0x410   : > { %v4827_v50 = vadd.f32 %v4826_v1, %v4813_v23 }
 0x412   : > { %v4831_v60 = vmax.f32 %v4827_v50, 1e-10 }
 0x414   : > { %7907 = vlog2.f32 %v4831_v60 }
 0x417   : > { %v4828_v9 = vpop.f32.mrf.mxu3 }
 0x418   : > { %v4829_v15 = vadd.f32 %v4828_v9, %v4815_v10 }
 0x41a   : > { %v7908_v48 = vpop.eup %7907  ;;  %v4832_v32 = vmax.f32 %v4829_v15, 1e-10 }
 0x41b   : > { %v4834_v24 = vmul.f32 0.6931472, %v7908_v48 }
 0x41c   : > { %7909 = vlog2.f32 %v4832_v32 }
 0x41d   : > { %v4841_v33 = vmul.f32 %v7905_v0, %v4834_v24 }
 0x41f   : > { %v4847_v49 = vadd.f32 %v7906_v8, %v4841_v33 }
 0x421   : > { %4849 = vst [vmem:[%s410_s17] sm:$0xff] %v4847_v49 }
 0x422   : > { %v7910_v52 = vpop.eup %7909 }
 0x423   : > { %v4836_v20 = vmul.f32 0.6931472, %v7910_v52 }
 0x425   : > { %v4842_v35 = vmul.f32 %v7905_v0, %v4836_v20 }
 0x427   : > { %v4848_v26 = vadd.f32 %v7906_v8, %v4842_v35 }
 0x429   : > { %4850 = vst [vmem:[%s410_s17 + $0x8] sm:$0xff] %v4848_v26 }
 0x42a   : > { %8118 = shalt.err (!%p8115_p0)
}
 0x42b   : > { %s8202_s2 = smov 128   ;;  %s8203_s13 = smov 8  }
 0x42c   : > { %7788 = dma.vmem_to_hbm [thread:$0]  (%p8332_p7), %s4867_s19, 256, %s4869_s8, %s4852_s28, %s8202_s2, %s8202_s2, %s8203_s13  }
 0x42d PF: > { %s4883_s5 = sand.u32 1, %s8169_s21   ;;  %p7811_p3 = pnand %p5028_p11, %p8284_p6 }
 0x42e   : > { %s4884_s23 = scalar_lea.sflag [#allocation4], %s4883_s5 }
 0x42f   : > { %p7812_p5 = pneg %p7811_p3 }
 0x431   : > { %8164 = dma.done.wait (%p7812_p5), %s4884_s23, 256  }
 0x432   : > { %8166 = vsyncadd (%p7812_p5), %s4884_s23, 4294967040  ;;  %s27_s26 = sadd.s32 1, %s8189_s26   ;;  %s8744_s25 = sld [smem:[#allocation20_spill]] }
 0x433   : > { %p24_p9 = scmp.ge.s32.totalorder %s27_s26, 4   ;;  %s8745_s23 = sld [smem:[#allocation23_spill]] }
 0x434   : > { %s8746_s24 = sld [smem:[#allocation21_spill]]  ;;  %s8748_s21 = smov %s8173_s22 }
 0x435   : > { %s8747_s7 = sld [smem:[#allocation22_spill]] }
 0x437   :  { %26 = sbr.rel (!%p24_p9) target bundleno = 15 (0xf), region = 118 }
 0x438   : > { %s8749_s22 = smov %s8744_s25 }
 0x43b   : > { %s8750_s25 = smov %s8747_s7 }
 0x43c   :  { %4890 = vsyncpa [#allocation3], 1 }
 0x43d   :  { %4892 = vsyncpa [#allocation3 + $0x1], 1 }
 0x43e   :  { %4893 = vsyncpa [#allocation6], 1 }
 0x43f   :  { %4895 = vsyncpa [#allocation6 + $0x1], 1 }
 0x440   :  { %4896 = vsyncpa [#allocation9], 1 }
 0x441   :  { %4897 = vsyncpa [#allocation12], 1 }
 0x442   :  { %4898 = vsyncpa [#allocation4], 1 }
 0x443   :  { %4900 = vsyncpa [#allocation4 + $0x1], 1 }

</bundles_post_ra>
